<compile_context>
chip_gen: v7x
topology: tpu7x:2x2x1
jax: 0.10.0
libtpu: 0.0.40
codegen_flags: <defaults>
</compile_context>

<pallas_src>
import jax
import jax.numpy as jnp
from jax.experimental import pallas as pl
from jax.experimental.pallas import tpu as pltpu

# ---- "args" (small, deterministic config) ----------------------------------
N = 256               # batch_size (batch is the real perf lever -> gridded)
W = 8                 # window_len
D = 32                # news_dim
CO = 8                # kernel_num
KS = (2, 3)           # kernel_size (conv heights)
CNN_OUT = 16          # cnn_out_size
LSTM_HIDDEN = 32      # lstm_hidden_size
MLP_HIDDEN = [16, 8]  # args.mlp_hidden (before the insert of lstm_hidden_size)
NUM_CLASSES = 4
TB = 128              # batch tile (rows per grid step)

LANES = 128
NB = len(KS) * CO                      # total conv channels (16) == fc1 input dim
# packed-weight row offsets (all multiples of 8 sublanes)
R_WC = 0                               # fused conv weight (max(KS)*D, NB)
R_LI = R_WC + max(KS) * D              # folded (fc1 @ LSTM i-gate) block (NB, 128)
R_LG = R_LI + NB                       # folded g-gate block
R_LO = R_LG + NB                       # folded o-gate block
R_M0 = R_LO + NB                       # MLP0 padded (128, 16); rows H:128 are zero
R_M1 = R_M0 + LANES                    # MLP1 (MLP_HIDDEN[0], NUM_CLASSES)
WPK_ROWS = R_M1 + MLP_HIDDEN[0]        # 288


def _sigmoid(v):
    # 1/(1+exp(-v)) with exp + approximate reciprocal, both on the EUP slot.
    return pl.reciprocal(1.0 + jnp.exp(-v), approx=True)


# ---- Pallas kernel: whole forward pass for one batch tile --------------------
def nip_kernel(x_ref, wpk_ref, bpk_ref, out_ref):
    tb = x_ref.shape[0]
    x = x_ref[...]                                 # (TB, W, D) f32

    # ---- text-CNN: both branches in ONE im2col matmul ------------------------
    taps = [x]
    for j in range(1, max(KS)):                    # wrap-shifted taps along time
        taps.append(jnp.concatenate([x[:, j:, :], x[:, :j, :]], axis=1))
    a = jnp.concatenate(taps, axis=2)              # (TB, W, max(KS)*D)
    a2 = a.reshape(tb * W, max(KS) * D)            # leading-dim collapse only
    wc = wpk_ref[R_WC:R_WC + max(KS) * D, 0:NB]    # (max(KS)*D, 16)
    y = jnp.dot(a2, wc, preferred_element_type=jnp.float32)
    y = y.reshape(tb, W, NB)                       # (TB, W, 16)

    # mask wrapped (invalid) time positions, then max-pool over time
    t_idx = jax.lax.broadcasted_iota(jnp.int32, y.shape, 1)
    c_idx = jax.lax.broadcasted_iota(jnp.int32, y.shape, 2)
    t_lim = jnp.where(c_idx < CO, W - KS[0] + 1, W - KS[1] + 1)
    y = jnp.where(t_idx < t_lim, y, -1e30)
    pooled = jnp.max(y, axis=1)                    # (TB, 16)
    # bias + ReLU hoisted: max_t relu(s_t + b) == relu(max_t s_t + b)
    feat = jnp.maximum(pooled + bpk_ref[0:1, 0:NB], 0.0)

    # ---- dropout(identity) + fc1 folded into the LSTM gate weights -----------
    # TODO(synk): training-mode dropout RNG not reproduced (inference / p=0).
    # ---- single-step LSTM from zero state (forget gate irrelevant: c0 == 0) --
    # each gate lives in lanes 0:H of its own zero-padded 128-lane block, so no
    # sub-vreg lane slicing of a single gates vreg is needed.
    gi = jnp.dot(feat, wpk_ref[R_LI:R_LI + NB, :],
                 preferred_element_type=jnp.float32) + bpk_ref[4:5, :]
    gg = jnp.dot(feat, wpk_ref[R_LG:R_LG + NB, :],
                 preferred_element_type=jnp.float32) + bpk_ref[5:6, :]
    go = jnp.dot(feat, wpk_ref[R_LO:R_LO + NB, :],
                 preferred_element_type=jnp.float32) + bpk_ref[6:7, :]
    c = _sigmoid(gi) * jnp.tanh(gg)                # padding lanes: 0.5 * 0 == 0
    hy = _sigmoid(go) * jnp.tanh(c)                # (TB, 128); lanes H:128 == 0

    # ---- MLP: Linear(32,16) -> Sigmoid -> Linear(16,C) -> Sigmoid -> Softmax --
    z = _sigmoid(jnp.dot(hy, wpk_ref[R_M0:R_M0 + LANES, 0:MLP_HIDDEN[0]],
                         preferred_element_type=jnp.float32)
                 + bpk_ref[2:3, 0:MLP_HIDDEN[0]])
    z = _sigmoid(jnp.dot(z, wpk_ref[R_M1:R_M1 + MLP_HIDDEN[0], 0:NUM_CLASSES],
                         preferred_element_type=jnp.float32)
                 + bpk_ref[3:4, 0:NUM_CLASSES])
    # softmax; z is a sigmoid output in (0,1) so no max-shift is needed
    e = jnp.exp(z)
    out_ref[...] = e * pl.reciprocal(jnp.sum(e, axis=1, keepdims=True), approx=True)


# ---- wrapper -----------------------------------------------------------------
def nip_forward(x, p, wpk, bpk):
    del p                                          # unused by the PyTorch forward too
    n = x.shape[0]
    tb = min(TB, n)
    n_pad = ((n + tb - 1) // tb) * tb
    if n_pad != n:                                 # zero-pad batch to a tile multiple
        x = jnp.pad(x, ((0, n_pad - n), (0, 0), (0, 0)))
    out = pl.pallas_call(
        nip_kernel,
        out_shape=jax.ShapeDtypeStruct((n_pad, NUM_CLASSES), jnp.float32),
        grid_spec=pltpu.PrefetchScalarGridSpec(
            num_scalar_prefetch=0,
            grid=(n_pad // tb,),
            in_specs=[
                pl.BlockSpec((tb, W, D), lambda b: (b, 0, 0)),
                pl.BlockSpec((WPK_ROWS, LANES), lambda b: (0, 0)),   # weights resident
                pl.BlockSpec((8, LANES), lambda b: (0, 0)),          # biases resident
            ],
            out_specs=pl.BlockSpec((tb, NUM_CLASSES), lambda b: (b, 0)),
        ),
        compiler_params=pltpu.CompilerParams(
            dimension_semantics=("parallel",)),    # v7x: both TCs split the batch
    )(x, wpk, bpk)
    return out[:n] if n_pad != n else out


# ---- host-side parameter packing ----------------------------------------------
def pack_params(params):
    """Pack all tensors into one (WPK_ROWS,128) weight slab + one (8,128) bias slab.

    fc1 is folded into the LSTM gate weights/biases here (dropout is identity and
    the fc1 output feeds only the LSTM), so the kernel never sees fc1 explicitly.
    """
    h = LSTM_HIDDEN
    wpk = jnp.zeros((WPK_ROWS, LANES), jnp.float32)
    # fused conv weight: rows = tap*D + d ; cols 0:CO = k=2 branch, CO:2CO = k=3
    w2 = params["cw0"].reshape(KS[0] * D, CO)
    w3 = params["cw1"].reshape(KS[1] * D, CO)
    wpk = wpk.at[R_WC:R_WC + KS[0] * D, 0:CO].set(w2)
    wpk = wpk.at[R_WC:R_WC + KS[1] * D, CO:2 * CO].set(w3)

    wih = params["wih"]                            # (CNN_OUT, 4H), cols [i|f|g|o]
    fc1w, fc1b = params["fc1w"], params["fc1b"]    # (NB, CNN_OUT), (1, CNN_OUT)
    bl = params["blstm"]                           # (1, 4H) = b_ih + b_hh
    gate_cols = {"i": (0, h), "g": (2 * h, 3 * h), "o": (3 * h, 4 * h)}
    folded_w, folded_b = {}, {}
    for name, (lo, hi) in gate_cols.items():
        folded_w[name] = fc1w @ wih[:, lo:hi]                       # (NB, H)
        folded_b[name] = fc1b @ wih[:, lo:hi] + bl[:, lo:hi]        # (1, H)
    wpk = wpk.at[R_LI:R_LI + NB, 0:h].set(folded_w["i"])
    wpk = wpk.at[R_LG:R_LG + NB, 0:h].set(folded_w["g"])
    wpk = wpk.at[R_LO:R_LO + NB, 0:h].set(folded_w["o"])
    wpk = wpk.at[R_M0:R_M0 + h, 0:MLP_HIDDEN[0]].set(params["m0w"])    # rows h:128 = 0
    wpk = wpk.at[R_M1:R_M1 + MLP_HIDDEN[0], 0:NUM_CLASSES].set(params["m1w"])

    bpk = jnp.zeros((8, LANES), jnp.float32)
    bpk = bpk.at[0, 0:CO].set(params["cb0"][0])
    bpk = bpk.at[0, CO:2 * CO].set(params["cb1"][0])
    bpk = bpk.at[2, 0:MLP_HIDDEN[0]].set(params["m0b"][0])
    bpk = bpk.at[3, 0:NUM_CLASSES].set(params["m1b"][0])
    bpk = bpk.at[4, 0:h].set(folded_b["i"][0])
    bpk = bpk.at[5, 0:h].set(folded_b["g"][0])
    bpk = bpk.at[6, 0:h].set(folded_b["o"][0])
    return wpk, bpk


# ---- pure-JAX reference for verification --------------------------------------
def nip_reference(x, params):
    feats = []
    for idx, k_sz in enumerate(KS):
        w = params[f"cw{idx}"]
        b = params[f"cb{idx}"]
        cols = []
        for t in range(W - k_sz + 1):
            s = sum(x[:, t + k, :] @ w[k] for k in range(k_sz)) + b
            cols.append(jnp.maximum(s, 0.0))
        feats.append(jnp.max(jnp.stack(cols, 0), axis=0))
    feat = jnp.concatenate(feats, axis=1)
    h = feat @ params["fc1w"] + params["fc1b"]
    gates = h @ params["wih"] + params["blstm"]
    hh = LSTM_HIDDEN
    i_g = jax.nn.sigmoid(gates[:, :hh])
    g_g = jnp.tanh(gates[:, 2 * hh:3 * hh])
    o_g = jax.nn.sigmoid(gates[:, 3 * hh:])
    hy = o_g * jnp.tanh(i_g * g_g)
    z = jax.nn.sigmoid(hy @ params["m0w"] + params["m0b"])
    z = jax.nn.sigmoid(z @ params["m1w"] + params["m1b"])
    return jax.nn.softmax(z, axis=1)


def init_params(key):
    ks = jax.random.split(key, 12)
    f_in = len(KS) * CO
    mlp_h = [LSTM_HIDDEN] + list(MLP_HIDDEN)   # mirrors self.mlp_hidden.insert(0, ...)
    scale = 0.2
    return {
        "cw0": scale * jax.random.normal(ks[0], (KS[0], D, CO), jnp.float32),
        "cb0": scale * jax.random.normal(ks[1], (1, CO), jnp.float32),
        "cw1": scale * jax.random.normal(ks[2], (KS[1], D, CO), jnp.float32),
        "cb1": scale * jax.random.normal(ks[3], (1, CO), jnp.float32),
        "fc1w": scale * jax.random.normal(ks[4], (f_in, CNN_OUT), jnp.float32),
        "fc1b": scale * jax.random.normal(ks[5], (1, CNN_OUT), jnp.float32),
        "wih": scale * jax.random.normal(ks[6], (CNN_OUT, 4 * LSTM_HIDDEN), jnp.float32),
        "blstm": scale * jax.random.normal(ks[7], (1, 4 * LSTM_HIDDEN), jnp.float32),
        "m0w": scale * jax.random.normal(ks[8], (mlp_h[0], mlp_h[1]), jnp.float32),
        "m0b": scale * jax.random.normal(ks[9], (1, mlp_h[1]), jnp.float32),
        "m1w": scale * jax.random.normal(ks[10], (mlp_h[1], NUM_CLASSES), jnp.float32),
        "m1b": scale * jax.random.normal(ks[11], (1, NUM_CLASSES), jnp.float32),
    }


if __name__ == "__main__":
    key = jax.random.PRNGKey(0)
    kx, kp, kparams = jax.random.split(key, 3)
    x = jax.random.normal(kx, (N, W, D), jnp.float32)
    p = jax.random.normal(kp, (N, 4), jnp.float32)   # unused, mirrors forward(x, p)
    params = init_params(kparams)
    wpk, bpk = pack_params(params)

    out = nip_forward(x, p, wpk, bpk)
    out = jax.block_until_ready(out)

    ref = nip_reference(x, params)
    assert out.shape == (N, NUM_CLASSES)
    # approx reciprocal (EUP) in sigmoid/softmax -> slightly loosened tolerances
    assert jnp.allclose(jnp.sum(out, axis=1), 1.0, atol=5e-3)
    assert jnp.allclose(out, ref, atol=5e-3, rtol=5e-3)
    print("KERNEL_OK")
</pallas_src>

<mosaic_0001>
module attributes {stable_mosaic.version = 11 : i64} {
  func.func @nip_kernel(%arg0: i32, %arg1: memref<128x8x32xf32, #tpu.memory_space<vmem>>, %arg2: memref<288x128xf32, #tpu.memory_space<vmem>>, %arg3: memref<8x128xf32, #tpu.memory_space<vmem>>, %arg4: memref<128x4xf32, #tpu.memory_space<vmem>>) attributes {dimension_semantics = [#tpu.dimension_semantics<parallel>], iteration_bounds = array<i64: 2>, scalar_prefetch = 0 : i64, scratch_operands = 0 : i64, tpu.core_type = #tpu.core_type<tc>, window_params = [{transform_indices = @transform_0, window_bounds = array<i64: 128, 8, 32>}, {pipeline_mode = #tpu.pipeline_mode<synchronous>, transform_indices = @transform_1, window_bounds = array<i64: 288, 128>}, {pipeline_mode = #tpu.pipeline_mode<synchronous>, transform_indices = @transform_2, window_bounds = array<i64: 8, 128>}, {transform_indices = @transform_3, window_bounds = array<i64: 128, 4>}]} {
    %c0 = arith.constant 0 : index
    %c0_0 = arith.constant 0 : index
    %c0_1 = arith.constant 0 : index
    %0 = vector.load %arg1[%c0, %c0_0, %c0_1] : memref<128x8x32xf32, #tpu.memory_space<vmem>>, vector<128x8x32xf32>
    %1 = vector.extract_strided_slice %0 {offsets = [0, 1, 0], sizes = [128, 7, 32], strides = [1, 1, 1]} : vector<128x8x32xf32> to vector<128x7x32xf32>
    %2 = vector.extract_strided_slice %0 {offsets = [0, 0, 0], sizes = [128, 1, 32], strides = [1, 1, 1]} : vector<128x8x32xf32> to vector<128x1x32xf32>
    %3 = tpu.concatenate %1, %2 in 1 : vector<128x7x32xf32>, vector<128x1x32xf32> -> vector<128x8x32xf32>
    %4 = vector.extract_strided_slice %0 {offsets = [0, 2, 0], sizes = [128, 6, 32], strides = [1, 1, 1]} : vector<128x8x32xf32> to vector<128x6x32xf32>
    %5 = vector.extract_strided_slice %0 {offsets = [0, 0, 0], sizes = [128, 2, 32], strides = [1, 1, 1]} : vector<128x8x32xf32> to vector<128x2x32xf32>
    %6 = tpu.concatenate %4, %5 in 1 : vector<128x6x32xf32>, vector<128x2x32xf32> -> vector<128x8x32xf32>
    %7 = tpu.concatenate %0, %3, %6 in 2 : vector<128x8x32xf32>, vector<128x8x32xf32>, vector<128x8x32xf32> -> vector<128x8x96xf32>
    %8 = vector.shape_cast %7 : vector<128x8x96xf32> to vector<1024x96xf32>
    %c0_2 = arith.constant 0 : index
    %c0_3 = arith.constant 0 : index
    %9 = vector.load %arg2[%c0_2, %c0_3] : memref<288x128xf32, #tpu.memory_space<vmem>>, vector<96x16xf32>
    %cst = arith.constant dense<0.000000e+00> : vector<1024x16xf32>
    %10 = tpu.matmul %8, %9, %cst {dimension_numbers = #tpu.dot_dimension_numbers<[1], [0], [0], [1], [0, 0, 1, 1], [], []>} : vector<1024x96xf32>, vector<96x16xf32>, vector<1024x16xf32> -> vector<1024x16xf32>
    %11 = vector.shape_cast %10 : vector<1024x16xf32> to vector<128x8x16xf32>
    %12 = tpu.iota {dimensions = array<i32: 1>} : vector<128x8x16xi32>
    %13 = tpu.iota {dimensions = array<i32: 2>} : vector<128x8x16xi32>
    %c8_i32 = arith.constant 8 : i32
    %14 = vector.broadcast %c8_i32 : i32 to vector<128x8x16xi32>
    %15 = arith.cmpi slt, %13, %14 : vector<128x8x16xi32>
    %c7_i32 = arith.constant 7 : i32
    %c6_i32 = arith.constant 6 : i32
    %16 = vector.broadcast %c7_i32 : i32 to vector<128x8x16xi32>
    %17 = vector.broadcast %c6_i32 : i32 to vector<128x8x16xi32>
    %18 = arith.select %15, %16, %17 : vector<128x8x16xi1>, vector<128x8x16xi32>
    %19 = arith.cmpi slt, %12, %18 : vector<128x8x16xi32>
    %cst_4 = arith.constant -1.000000e+30 : f32
    %20 = vector.broadcast %cst_4 : f32 to vector<128x8x16xf32>
    %21 = arith.select %19, %11, %20 : vector<128x8x16xi1>, vector<128x8x16xf32>
    %cst_5 = arith.constant dense<0xFF800000> : vector<128x16xf32>
    %22 = vector.multi_reduction <maximumf>, %21, %cst_5 [1] : vector<128x8x16xf32> to vector<128x16xf32>
    %c0_6 = arith.constant 0 : index
    %c0_7 = arith.constant 0 : index
    %23 = vector.load %arg3[%c0_6, %c0_7] : memref<8x128xf32, #tpu.memory_space<vmem>>, vector<1x16xf32>
    %24 = vector.broadcast %23 : vector<1x16xf32> to vector<128x16xf32>
    %25 = arith.addf %22, %24 : vector<128x16xf32>
    %cst_8 = arith.constant 0.000000e+00 : f32
    %26 = vector.broadcast %cst_8 : f32 to vector<128x16xf32>
    %27 = arith.maximumf %25, %26 : vector<128x16xf32>
    %c96 = arith.constant 96 : index
    %c0_9 = arith.constant 0 : index
    %28 = vector.load %arg2[%c96, %c0_9] : memref<288x128xf32, #tpu.memory_space<vmem>>, vector<16x128xf32>
    %cst_10 = arith.constant dense<0.000000e+00> : vector<128x128xf32>
    %29 = tpu.matmul %27, %28, %cst_10 {dimension_numbers = #tpu.dot_dimension_numbers<[1], [0], [0], [1], [0, 0, 1, 1], [], []>} : vector<128x16xf32>, vector<16x128xf32>, vector<128x128xf32> -> vector<128x128xf32>
    %c4 = arith.constant 4 : index
    %c0_11 = arith.constant 0 : index
    %30 = vector.load %arg3[%c4, %c0_11] : memref<8x128xf32, #tpu.memory_space<vmem>>, vector<1x128xf32>
    %31 = vector.broadcast %30 : vector<1x128xf32> to vector<128x128xf32>
    %32 = arith.addf %29, %31 : vector<128x128xf32>
    %c112 = arith.constant 112 : index
    %c0_12 = arith.constant 0 : index
    %33 = vector.load %arg2[%c112, %c0_12] : memref<288x128xf32, #tpu.memory_space<vmem>>, vector<16x128xf32>
    %cst_13 = arith.constant dense<0.000000e+00> : vector<128x128xf32>
    %34 = tpu.matmul %27, %33, %cst_13 {dimension_numbers = #tpu.dot_dimension_numbers<[1], [0], [0], [1], [0, 0, 1, 1], [], []>} : vector<128x16xf32>, vector<16x128xf32>, vector<128x128xf32> -> vector<128x128xf32>
    %c5 = arith.constant 5 : index
    %c0_14 = arith.constant 0 : index
    %35 = vector.load %arg3[%c5, %c0_14] : memref<8x128xf32, #tpu.memory_space<vmem>>, vector<1x128xf32>
    %36 = vector.broadcast %35 : vector<1x128xf32> to vector<128x128xf32>
    %37 = arith.addf %34, %36 : vector<128x128xf32>
    %c128 = arith.constant 128 : index
    %c0_15 = arith.constant 0 : index
    %38 = vector.load %arg2[%c128, %c0_15] : memref<288x128xf32, #tpu.memory_space<vmem>>, vector<16x128xf32>
    %cst_16 = arith.constant dense<0.000000e+00> : vector<128x128xf32>
    %39 = tpu.matmul %27, %38, %cst_16 {dimension_numbers = #tpu.dot_dimension_numbers<[1], [0], [0], [1], [0, 0, 1, 1], [], []>} : vector<128x16xf32>, vector<16x128xf32>, vector<128x128xf32> -> vector<128x128xf32>
    %c6 = arith.constant 6 : index
    %c0_17 = arith.constant 0 : index
    %40 = vector.load %arg3[%c6, %c0_17] : memref<8x128xf32, #tpu.memory_space<vmem>>, vector<1x128xf32>
    %41 = vector.broadcast %40 : vector<1x128xf32> to vector<128x128xf32>
    %42 = arith.addf %39, %41 : vector<128x128xf32>
    %cst_18 = arith.constant 0.000000e+00 : f32
    %43 = vector.broadcast %cst_18 : f32 to vector<128x128xf32>
    %44 = arith.subf %43, %32 : vector<128x128xf32>
    %45 = math.exp %44 : vector<128x128xf32>
    %cst_19 = arith.constant 1.000000e+00 : f32
    %46 = vector.broadcast %cst_19 : f32 to vector<128x128xf32>
    %47 = arith.addf %46, %45 : vector<128x128xf32>
    %48 = tpu.reciprocal %47 {approx = true} : vector<128x128xf32> -> vector<128x128xf32>
    %49 = math.tanh %37 : vector<128x128xf32>
    %50 = arith.mulf %48, %49 : vector<128x128xf32>
    %cst_20 = arith.constant 0.000000e+00 : f32
    %51 = vector.broadcast %cst_20 : f32 to vector<128x128xf32>
    %52 = arith.subf %51, %42 : vector<128x128xf32>
    %53 = math.exp %52 : vector<128x128xf32>
    %cst_21 = arith.constant 1.000000e+00 : f32
    %54 = vector.broadcast %cst_21 : f32 to vector<128x128xf32>
    %55 = arith.addf %54, %53 : vector<128x128xf32>
    %56 = tpu.reciprocal %55 {approx = true} : vector<128x128xf32> -> vector<128x128xf32>
    %57 = math.tanh %50 : vector<128x128xf32>
    %58 = arith.mulf %56, %57 : vector<128x128xf32>
    %c144 = arith.constant 144 : index
    %c0_22 = arith.constant 0 : index
    %59 = vector.load %arg2[%c144, %c0_22] : memref<288x128xf32, #tpu.memory_space<vmem>>, vector<128x16xf32>
    %cst_23 = arith.constant dense<0.000000e+00> : vector<128x16xf32>
    %60 = tpu.matmul %58, %59, %cst_23 {dimension_numbers = #tpu.dot_dimension_numbers<[1], [0], [0], [1], [0, 0, 1, 1], [], []>} : vector<128x128xf32>, vector<128x16xf32>, vector<128x16xf32> -> vector<128x16xf32>
    %c2 = arith.constant 2 : index
    %c0_24 = arith.constant 0 : index
    %61 = vector.load %arg3[%c2, %c0_24] : memref<8x128xf32, #tpu.memory_space<vmem>>, vector<1x16xf32>
    %62 = vector.broadcast %61 : vector<1x16xf32> to vector<128x16xf32>
    %63 = arith.addf %60, %62 : vector<128x16xf32>
    %cst_25 = arith.constant 0.000000e+00 : f32
    %64 = vector.broadcast %cst_25 : f32 to vector<128x16xf32>
    %65 = arith.subf %64, %63 : vector<128x16xf32>
    %66 = math.exp %65 : vector<128x16xf32>
    %cst_26 = arith.constant 1.000000e+00 : f32
    %67 = vector.broadcast %cst_26 : f32 to vector<128x16xf32>
    %68 = arith.addf %67, %66 : vector<128x16xf32>
    %69 = tpu.reciprocal %68 {approx = true} : vector<128x16xf32> -> vector<128x16xf32>
    %c272 = arith.constant 272 : index
    %c0_27 = arith.constant 0 : index
    %70 = vector.load %arg2[%c272, %c0_27] : memref<288x128xf32, #tpu.memory_space<vmem>>, vector<16x4xf32>
    %cst_28 = arith.constant dense<0.000000e+00> : vector<128x4xf32>
    %71 = tpu.matmul %69, %70, %cst_28 {dimension_numbers = #tpu.dot_dimension_numbers<[1], [0], [0], [1], [0, 0, 1, 1], [], []>} : vector<128x16xf32>, vector<16x4xf32>, vector<128x4xf32> -> vector<128x4xf32>
    %c3 = arith.constant 3 : index
    %c0_29 = arith.constant 0 : index
    %72 = vector.load %arg3[%c3, %c0_29] : memref<8x128xf32, #tpu.memory_space<vmem>>, vector<1x4xf32>
    %73 = vector.broadcast %72 : vector<1x4xf32> to vector<128x4xf32>
    %74 = arith.addf %71, %73 : vector<128x4xf32>
    %cst_30 = arith.constant 0.000000e+00 : f32
    %75 = vector.broadcast %cst_30 : f32 to vector<128x4xf32>
    %76 = arith.subf %75, %74 : vector<128x4xf32>
    %77 = math.exp %76 : vector<128x4xf32>
    %cst_31 = arith.constant 1.000000e+00 : f32
    %78 = vector.broadcast %cst_31 : f32 to vector<128x4xf32>
    %79 = arith.addf %78, %77 : vector<128x4xf32>
    %80 = tpu.reciprocal %79 {approx = true} : vector<128x4xf32> -> vector<128x4xf32>
    %81 = math.exp %80 : vector<128x4xf32>
    %cst_32 = arith.constant dense<0.000000e+00> : vector<128xf32>
    %82 = vector.multi_reduction <add>, %81, %cst_32 [1] : vector<128x4xf32> to vector<128xf32>
    %83 = vector.shape_cast %82 : vector<128xf32> to vector<128x1xf32>
    %84 = tpu.reciprocal %83 {approx = true} : vector<128x1xf32> -> vector<128x1xf32>
    %85 = vector.broadcast %84 : vector<128x1xf32> to vector<128x4xf32>
    %86 = arith.mulf %81, %85 : vector<128x4xf32>
    %c0_33 = arith.constant 0 : index
    %c0_34 = arith.constant 0 : index
    %87 = vector.load %arg4[%c0_33, %c0_34] : memref<128x4xf32, #tpu.memory_space<vmem>>, vector<128x4xf32>
    tpu.vector_store %arg4[%c0_33, %c0_34], %86 {strides = array<i32>} : memref<128x4xf32, #tpu.memory_space<vmem>>, vector<128x4xf32>,
    return
  }
  func.func @transform_0(%arg0: i32) -> (i32, i32, i32) {
    %c0_i32 = arith.constant 0 : i32
    %c0_i32_0 = arith.constant 0 : i32
    %c0_i32_1 = arith.constant 0 : i32
    return %arg0, %c0_i32, %c0_i32_0 : i32, i32, i32
  }
  func.func @transform_1(%arg0: i32) -> (i32, i32) {
    %c0_i32 = arith.constant 0 : i32
    %c0_i32_0 = arith.constant 0 : i32
    %c0_i32_1 = arith.constant 0 : i32
    return %c0_i32, %c0_i32_0 : i32, i32
  }
  func.func @transform_2(%arg0: i32) -> (i32, i32) {
    %c0_i32 = arith.constant 0 : i32
    %c0_i32_0 = arith.constant 0 : i32
    %c0_i32_1 = arith.constant 0 : i32
    return %c0_i32, %c0_i32_0 : i32, i32
  }
  func.func @transform_3(%arg0: i32) -> (i32, i32) {
    %c0_i32 = arith.constant 0 : i32
    %c0_i32_0 = arith.constant 0 : i32
    return %arg0, %c0_i32 : i32, i32
  }
}

</mosaic_0001>

<bundles_post_ra>
// kernel: tpu_custom_call.1
= control target key start
LH: loop header
LB: loop body
LE: loop exit
PB: predicated region body
PF: predicated region fallthrough
CT: control target
= control target key end

     0   :  { %s8068_s12 = smov 0   ;;  %s10677_s0 = inlined_call_operand.vmem [shape: f32[256,8,32], index: 0, kind: input, shape index: {}]   ;;  %s10678_s1 = inlined_call_operand.vmem [shape: f32[288,128], index: 1, kind: input, shape index: {}]   ;;  %s10679_s2 = inlined_call_operand.vmem [shape: f32[8,128], index: 2, kind: input, shape index: {}]   ;;  %s10680_s3 = inlined_call_operand.vmem [shape: f32[256,4], index: 3, kind: output, shape index: {}]  }
   0x1 LB: > { %s6659_s13 = sadd.s32 4294967295, %s8043_s12   ;;  %p6663_p0 = scmp.ge.s32.totalorder %s8043_s12, 1  ;;  %s8043_s12 = sphi %s8068_s12, %s13_s12  }
   0x2   : > { %p138_p1 = scmp.lt.s32.totalorder %s8043_s12, 3 }
   0x4   : > { %p139_p2 = pnand %p6663_p0, %p138_p1 }
   0x5   : > { %s6664_s14 = sshll.u32 (!%p139_p2), %s6659_s13, 7  ;;  %v2482_v0 = vld [vmem:[%s10678_s1] sm:$0xff] (!%p139_p2)  ;;  %v2483_v1 = vld [vmem:[%s10678_s1 + $0x8] sm:$0xff] (!%p139_p2)  ;;  %v2484_v2 = vld [vmem:[%s10678_s1 + $0x10] sm:$0xff] (!%p139_p2)  ;;  %s8045_s8 = smov (!%p139_p2), 64   ;;  %vm2224_vm0 = vcmask (!%p139_p2), 261120  }
   0x6   : > { %142 = sbr.rel (%p139_p2) target bundleno = 1867 (0x74b), region = 32  ;;  %p163_p3 = scmp.lt.s32.totalorder (!%p139_p2), %s6664_s14, 255  ;;  %v7496_v3 = vpack.c.bf16 (!%p139_p2), %v2483_v1, %v2482_v0  ;;  %v2485_v4 = vld [vmem:[%s10678_s1 + $0x18] sm:$0xff] (!%p139_p2)  ;;  %v2486_v6 = vld [vmem:[%s10678_s1 + $0x20] sm:$0xff] (!%p139_p2)  ;;  %v2487_v7 = vld [vmem:[%s10678_s1 + $0x28] sm:$0xff] (!%p139_p2)  ;;  %vm2353_vm1 = vcmask (!%p139_p2), 523264  }
   0x7   : > { %v7500_v5 = vpack.c.bf16 (!%p139_p2), %v2485_v4, %v2484_v2  ;;  %v7504_v8 = vpack.c.bf16 (!%p139_p2), %v2487_v7, %v2486_v6  ;;  %v2488_v9 = vld [vmem:[%s10678_s1 + $0x30] sm:$0xff] (!%p139_p2)  ;;  %v2489_v10 = vld [vmem:[%s10678_s1 + $0x38] sm:$0xff] (!%p139_p2)  ;;  %s8046_s9 = smov (!%p139_p2), 32   ;;  %v2490_v18 = vld [vmem:[%s10678_s1 + $0x40] sm:$0xff] (!%p139_p2)  ;;  %vm2494_vm2 = vcmask (!%p139_p2), 785408   ;;  %vm3719_vm5 = vcmask (!%p139_p2), 130048  }
   0x8   : > { %7497 = vmatprep.subr.bf16.mxu0 (!%p139_p2), %v7496_v3  ;;  %7568 = vmatprep.subr.bf16.mxu1 (!%p139_p2), %v7496_v3  ;;  %v7508_v15 = vpack.c.bf16 (!%p139_p2), %v2489_v10, %v2488_v9  ;;  %v2491_v19 = vld [vmem:[%s10678_s1 + $0x48] sm:$0xff] (!%p139_p2)  ;;  %v2492_v25 = vld [vmem:[%s10678_s1 + $0x50] sm:$0xff] (!%p139_p2)  ;;  %v2493_v26 = vld [vmem:[%s10678_s1 + $0x58] sm:$0xff] (!%p139_p2)  ;;  %vm5013_vm6 = vcmask (!%p139_p2), 1041409   ;;  %vm5016_vm7 = vcmask (!%p139_p2), 1042434   ;;  %vm5019_vm8 = vcmask (!%p139_p2), 1043459  }
   0x9   : > { %7499 = vmatpush3.bf16.msra.mxu0 (!%p139_p2), %v7496_v3  ;;  %7574 = vmatpush3.bf16.msra.mxu1 (!%p139_p2), %v7496_v3  ;;  %v7512_v22 = vpack.c.bf16 (!%p139_p2), %v2491_v19, %v2490_v18  ;;  %v7516_v27 = vpack.c.bf16 (!%p139_p2), %v2493_v26, %v2492_v25  ;;  %vm5022_vm9 = vcmask (!%p139_p2), 1044484   ;;  %vm5025_vm10 = vcmask (!%p139_p2), 1045509   ;;  %s6666_s11 = sshll.u32 (!%p139_p2), %s6659_s13, 4 }
   0xa   : > { %7501 = vmatprep.subr.bf16.mxu0 (!%p139_p2), %v7500_v5  ;;  %7569 = vmatprep.subr.bf16.mxu1 (!%p139_p2), %v7500_v5  ;;  %vm5028_vm11 = vcmask (!%p139_p2), 1046534   ;;  %vm5031_vm12 = vcmask (!%p139_p2), 1047559   ;;  %vm6506_vm13 = vcmask (!%p139_p2), 31744   ;;  %p169_p4 = scmp.lt.s32.totalorder (!%p139_p2), %s6666_s11, 31 }
   0xd   : > { %s10684_s14 = smov (!%p163_p3, %s6664_s14), 255  ;;  %7503 = vmatpush3.bf16.msra.mxu0 %v7500_v5  ;;  %7575 = vmatpush3.bf16.msra.mxu1 %v7500_v5  ;;  %s10686_s11 = smov (!%p169_p4, %s6666_s11), 31 }
   0xe   : > { %s6665_s27 = sshll.u32 %s10684_s14, 3  ;;  %7505 = vmatprep.subr.bf16.mxu0 %v7504_v8  ;;  %7570 = vmatprep.subr.bf16.mxu1 %v7504_v8  ;;  %s6667_s14 = sshll.u32 %s10686_s11, 3 }
   0xf   : > { %s8099_s30 = scalar_lea.vmem %s10677_s0, %s6665_s27  ;;  %s10624_s17 = scalar_lea.vmem %s10680_s3, %s6667_s14 }
  0x10   : > { %v8108_v11 = vld [vmem:[%s8099_s30] sm:$0xff]  ;;  %v8111_v12 = vld [vmem:[%s8099_s30 + $0x8] sm:$0xff]  ;;  %v8126_v20 = vld [vmem:[%s8099_s30 + $0x18] sm:$0xff] }
  0x11   : > { %v815_v13 = vrot.slane %v8108_v11, 2  ;;  %v430_v14 = vrot.slane %v8108_v11, 1  ;;  %v816_v16 = vrot.slane %v8111_v12, 2  ;;  %v431_v17 = vrot.slane %v8111_v12, 1  ;;  %v8129_v21 = vld [vmem:[%s8099_s30 + $0x10] sm:$0xff]  ;;  %7507 = vmatpush3.bf16.msra.mxu0 %v7504_v8  ;;  %7576 = vmatpush3.bf16.msra.mxu1 %v7504_v8  ;;  %v8146_v30 = vld [vmem:[%s8099_s30 + $0x28] sm:$0xff] }
  0x12   : > { %7509 = vmatprep.subr.bf16.mxu0 %v7508_v15  ;;  %7571 = vmatprep.subr.bf16.mxu1 %v7508_v15  ;;  %v433_v23 = vrot.slane %v8126_v20, 1  ;;  %v432_v24 = vrot.slane %v8129_v21, 1  ;;  %v818_v28 = vrot.slane %v8126_v20, 2  ;;  %v817_v29 = vrot.slane %v8129_v21, 2  ;;  %v8149_v31 = vld [vmem:[%s8099_s30 + $0x20] sm:$0xff]  ;;  %v8160_v36 = vld [vmem:[%s8099_s30 + $0x38] sm:$0xff] }
  0x13   : > { %1840 = vrot.lane.b32.xlu1 %v815_v13, %s8045_s8  ;;  %1328 = vrot.lane.b32.xlu0 %v430_v14, %s8046_s9  ;;  %v435_v32 = vrot.slane %v8146_v30, 1  ;;  %v434_v33 = vrot.slane %v8149_v31, 1  ;;  %v820_v34 = vrot.slane %v8146_v30, 2  ;;  %v819_v35 = vrot.slane %v8149_v31, 2  ;;  %v8163_v37 = vld [vmem:[%s8099_s30 + $0x30] sm:$0xff]  ;;  %v8174_v42 = vld [vmem:[%s8099_s30 + $0x48] sm:$0xff] }
  0x14   : > { %v437_v38 = vrot.slane %v8160_v36, 1  ;;  %v436_v39 = vrot.slane %v8163_v37, 1  ;;  %v822_v40 = vrot.slane %v8160_v36, 2  ;;  %v821_v41 = vrot.slane %v8163_v37, 2  ;;  %v8177_v43 = vld [vmem:[%s8099_s30 + $0x40] sm:$0xff]  ;;  %v8188_v48 = vld [vmem:[%s8099_s30 + $0x58] sm:$0xff] }
  0x15   : > { %7511 = vmatpush3.bf16.msra.mxu0 %v7508_v15  ;;  %7577 = vmatpush3.bf16.msra.mxu1 %v7508_v15  ;;  %v439_v44 = vrot.slane %v8174_v42, 1  ;;  %v438_v45 = vrot.slane %v8177_v43, 1  ;;  %v824_v46 = vrot.slane %v8174_v42, 2  ;;  %v823_v47 = vrot.slane %v8177_v43, 2  ;;  %v8191_v49 = vld [vmem:[%s8099_s30 + $0x50] sm:$0xff]  ;;  %v8202_v54 = vld [vmem:[%s8099_s30 + $0x68] sm:$0xff] }
  0x16   : > { %7513 = vmatprep.subr.bf16.mxu0 %v7512_v22  ;;  %7572 = vmatprep.subr.bf16.mxu1 %v7512_v22  ;;  %v441_v50 = vrot.slane %v8188_v48, 1  ;;  %v440_v51 = vrot.slane %v8191_v49, 1  ;;  %v826_v52 = vrot.slane %v8188_v48, 2  ;;  %v825_v53 = vrot.slane %v8191_v49, 2  ;;  %v8205_v55 = vld [vmem:[%s8099_s30 + $0x60] sm:$0xff]  ;;  %v8216_v60 = vld [vmem:[%s8099_s30 + $0x78] sm:$0xff] }
  0x17   : > { %1842 = vrot.lane.b32.xlu1 %v816_v16, %s8045_s8  ;;  %1330 = vrot.lane.b32.xlu0 %v431_v17, %s8046_s9  ;;  %v443_v56 = vrot.slane %v8202_v54, 1  ;;  %v442_v57 = vrot.slane %v8205_v55, 1  ;;  %v828_v58 = vrot.slane %v8202_v54, 2  ;;  %v827_v59 = vrot.slane %v8205_v55, 2  ;;  %v8219_v61 = vld [vmem:[%s8099_s30 + $0x70] sm:$0xff]  ;;  %v8230_v2 = vld [vmem:[%s8099_s30 + $0x88] sm:$0xff] }
  0x18   : > { %v445_v62 = vrot.slane %v8216_v60, 1  ;;  %v444_v63 = vrot.slane %v8219_v61, 1  ;;  %v830_v0 = vrot.slane %v8216_v60, 2  ;;  %v829_v1 = vrot.slane %v8219_v61, 2  ;;  %v8233_v3 = vld [vmem:[%s8099_s30 + $0x80] sm:$0xff]  ;;  %v8244_v8 = vld [vmem:[%s8099_s30 + $0x98] sm:$0xff] }
  0x19   : > { %7515 = vmatpush3.bf16.msra.mxu0 %v7512_v22  ;;  %7578 = vmatpush3.bf16.msra.mxu1 %v7512_v22  ;;  %v447_v4 = vrot.slane %v8230_v2, 1  ;;  %v446_v5 = vrot.slane %v8233_v3, 1  ;;  %v832_v6 = vrot.slane %v8230_v2, 2  ;;  %v831_v7 = vrot.slane %v8233_v3, 2  ;;  %v8247_v9 = vld [vmem:[%s8099_s30 + $0x90] sm:$0xff]  ;;  %v8258_v16 = vld [vmem:[%s8099_s30 + $0xa8] sm:$0xff] }
  0x1a   : > { %7517 = vmatprep.subr.bf16.mxu0 %v7516_v27  ;;  %7573 = vmatprep.subr.bf16.mxu1 %v7516_v27  ;;  %v449_v10 = vrot.slane %v8244_v8, 1  ;;  %v448_v13 = vrot.slane %v8247_v9, 1  ;;  %v834_v14 = vrot.slane %v8244_v8, 2  ;;  %v833_v15 = vrot.slane %v8247_v9, 2  ;;  %v8261_v17 = vld [vmem:[%s8099_s30 + $0xa0] sm:$0xff]  ;;  %v8275_v25 = vld [vmem:[%s8099_s30 + $0xb0] sm:$0xff] }
  0x1b   : > { %1334 = vrot.lane.b32.xlu1 %v433_v23, %s8046_s9  ;;  %1332 = vrot.lane.b32.xlu0 %v432_v24, %s8046_s9  ;;  %v451_v18 = vrot.slane %v8258_v16, 1  ;;  %v450_v19 = vrot.slane %v8261_v17, 1  ;;  %v836_v22 = vrot.slane %v8258_v16, 2  ;;  %v835_v23 = vrot.slane %v8261_v17, 2  ;;  %v8272_v24 = vld [vmem:[%s8099_s30 + $0xb8] sm:$0xff] }
  0x1c   : > { %v453_v26 = vrot.slane %v8272_v24, 1 }
  0x1d   : > { %7519 = vmatpush3.bf16.msra.mxu0 %v7516_v27  ;;  %7579 = vmatpush3.bf16.msra.mxu1 %v7516_v27  ;;  %v452_v27 = vrot.slane %v8275_v25, 1 }
  0x1f   : > { %1846 = vrot.lane.b32.xlu1 %v818_v28, %s8045_s8  ;;  %1844 = vrot.lane.b32.xlu0 %v817_v29, %s8045_s8  ;;  %v838_v28 = vrot.slane %v8272_v24, 2  ;;  %v837_v29 = vrot.slane %v8275_v25, 2 }
  0x23   : > { %1338 = vrot.lane.b32.xlu1 %v435_v32, %s8046_s9  ;;  %1336 = vrot.lane.b32.xlu0 %v434_v33, %s8046_s9  ;;  %v8286_v32 = vld [vmem:[%s8099_s30 + $0xc8] sm:$0xff]  ;;  %v8289_v33 = vld [vmem:[%s8099_s30 + $0xc0] sm:$0xff] }
  0x27   : > { %1850 = vrot.lane.b32.xlu1 %v820_v34, %s8045_s8  ;;  %1848 = vrot.lane.b32.xlu0 %v819_v35, %s8045_s8  ;;  %v455_v34 = vrot.slane %v8286_v32, 1  ;;  %v454_v35 = vrot.slane %v8289_v33, 1 }
  0x2b   : > { %1342 = vrot.lane.b32.xlu1 %v437_v38, %s8046_s9  ;;  %1340 = vrot.lane.b32.xlu0 %v436_v39, %s8046_s9  ;;  %v840_v38 = vrot.slane %v8286_v32, 2  ;;  %v839_v39 = vrot.slane %v8289_v33, 2 }
  0x2f   : > { %1854 = vrot.lane.b32.xlu1 %v822_v40, %s8045_s8  ;;  %1852 = vrot.lane.b32.xlu0 %v821_v41, %s8045_s8  ;;  %v8300_v40 = vld [vmem:[%s8099_s30 + $0xd8] sm:$0xff]  ;;  %v8303_v41 = vld [vmem:[%s8099_s30 + $0xd0] sm:$0xff] }
  0x33   : > { %1346 = vrot.lane.b32.xlu1 %v439_v44, %s8046_s9  ;;  %1344 = vrot.lane.b32.xlu0 %v438_v45, %s8046_s9  ;;  %v457_v44 = vrot.slane %v8300_v40, 1  ;;  %v456_v45 = vrot.slane %v8303_v41, 1 }
  0x37   : > { %1858 = vrot.lane.b32.xlu1 %v824_v46, %s8045_s8  ;;  %1856 = vrot.lane.b32.xlu0 %v823_v47, %s8045_s8  ;;  %v842_v46 = vrot.slane %v8300_v40, 2  ;;  %v841_v47 = vrot.slane %v8303_v41, 2 }
  0x3b   : > { %1350 = vrot.lane.b32.xlu1 %v441_v50, %s8046_s9  ;;  %1348 = vrot.lane.b32.xlu0 %v440_v51, %s8046_s9  ;;  %v8314_v50 = vld [vmem:[%s8099_s30 + $0xe8] sm:$0xff]  ;;  %v8317_v51 = vld [vmem:[%s8099_s30 + $0xe0] sm:$0xff] }
  0x3f   : > { %1862 = vrot.lane.b32.xlu1 %v826_v52, %s8045_s8  ;;  %1860 = vrot.lane.b32.xlu0 %v825_v53, %s8045_s8  ;;  %v459_v52 = vrot.slane %v8314_v50, 1  ;;  %v458_v53 = vrot.slane %v8317_v51, 1 }
  0x43   : > { %1354 = vrot.lane.b32.xlu1 %v443_v56, %s8046_s9  ;;  %1352 = vrot.lane.b32.xlu0 %v442_v57, %s8046_s9  ;;  %v844_v56 = vrot.slane %v8314_v50, 2  ;;  %v843_v57 = vrot.slane %v8317_v51, 2 }
  0x47   : > { %1866 = vrot.lane.b32.xlu1 %v828_v58, %s8045_s8  ;;  %1864 = vrot.lane.b32.xlu0 %v827_v59, %s8045_s8  ;;  %v8328_v58 = vld [vmem:[%s8099_s30 + $0xf8] sm:$0xff]  ;;  %v8331_v59 = vld [vmem:[%s8099_s30 + $0xf0] sm:$0xff] }
  0x4b   : > { %1358 = vrot.lane.b32.xlu1 %v445_v62, %s8046_s9  ;;  %1356 = vrot.lane.b32.xlu0 %v444_v63, %s8046_s9 }
  0x4f   : > { %1870 = vrot.lane.b32.xlu1 %v830_v0, %s8045_s8  ;;  %1868 = vrot.lane.b32.xlu0 %v829_v1, %s8045_s8 }
  0x53   : > { %1362 = vrot.lane.b32.xlu1 %v447_v4, %s8046_s9  ;;  %1360 = vrot.lane.b32.xlu0 %v446_v5, %s8046_s9  ;;  %v461_v4 = vrot.slane %v8328_v58, 1  ;;  %v460_v5 = vrot.slane %v8331_v59, 1 }
  0x57   : > { %1874 = vrot.lane.b32.xlu1 %v832_v6, %s8045_s8  ;;  %1872 = vrot.lane.b32.xlu0 %v831_v7, %s8045_s8 }
  0x5b   : > { %1366 = vrot.lane.b32.xlu1 %v449_v10, %s8046_s9  ;;  %1364 = vrot.lane.b32.xlu0 %v448_v13, %s8046_s9  ;;  %v846_v13 = vrot.slane %v8328_v58, 2 }
  0x5f   : > { %1878 = vrot.lane.b32.xlu1 %v834_v14, %s8045_s8  ;;  %1876 = vrot.lane.b32.xlu0 %v833_v15, %s8045_s8  ;;  %v845_v14 = vrot.slane %v8331_v59, 2  ;;  %v8350_v15 = vld [vmem:[%s8099_s30 + $0x108] sm:$0xff] }
  0x63   : > { %1370 = vrot.lane.b32.xlu1 %v451_v18, %s8046_s9  ;;  %1368 = vrot.lane.b32.xlu0 %v450_v19, %s8046_s9  ;;  %v8353_v18 = vld [vmem:[%s8099_s30 + $0x100] sm:$0xff] }
  0x67   : > { %1882 = vrot.lane.b32.xlu1 %v836_v22, %s8045_s8  ;;  %1880 = vrot.lane.b32.xlu0 %v835_v23, %s8045_s8  ;;  %v462_v23 = vrot.slane %v8353_v18, 1 }
  0x6b   : > { %1374 = vrot.lane.b32.xlu1 %v453_v26, %s8046_s9  ;;  %1372 = vrot.lane.b32.xlu0 %v452_v27, %s8046_s9 }
  0x6f   : > { %1886 = vrot.lane.b32.xlu1 %v838_v28, %s8045_s8  ;;  %1884 = vrot.lane.b32.xlu0 %v837_v29, %s8045_s8 }
  0x73   : > { %1378 = vrot.lane.b32.xlu1 %v455_v34, %s8046_s9  ;;  %1376 = vrot.lane.b32.xlu0 %v454_v35, %s8046_s9 }
  0x77   : > { %1890 = vrot.lane.b32.xlu1 %v840_v38, %s8045_s8  ;;  %1888 = vrot.lane.b32.xlu0 %v839_v39, %s8045_s8  ;;  %v848_v38 = vrot.slane %v8350_v15, 2  ;;  %v847_v39 = vrot.slane %v8353_v18, 2 }
  0x7b   : > { %1382 = vrot.lane.b32.xlu1 %v457_v44, %s8046_s9  ;;  %1380 = vrot.lane.b32.xlu0 %v456_v45, %s8046_s9  ;;  %v8374_v44 = vld [vmem:[%s8099_s30 + $0x110] sm:$0xff] }
  0x7f   : > { %1894 = vrot.lane.b32.xlu1 %v842_v46, %s8045_s8  ;;  %1892 = vrot.lane.b32.xlu0 %v841_v47, %s8045_s8  ;;  %v464_v47 = vrot.slane %v8374_v44, 1 }
  0x83   : > { %1386 = vrot.lane.b32.xlu1 %v459_v52, %s8046_s9  ;;  %1384 = vrot.lane.b32.xlu0 %v458_v53, %s8046_s9 }
  0x85   : > { %v1841_v62 = vpop.permute.xlu1 %1840  ;;  %v1329_v63 = vpop.permute.xlu0 %1328 }
  0x86   : > { %v2225_v0 = vsel %vm2224_vm0, %v8108_v11, %v1329_v63 }
  0x87   : > { %1898 = vrot.lane.b32.xlu1 %v844_v56, %s8045_s8  ;;  %1896 = vrot.lane.b32.xlu0 %v843_v57, %s8045_s8  ;;  %v2354_v1 = vsel %vm2353_vm1, %v2225_v0, %v1841_v62 }
  0x88   : > { %7136 = vmatprep.mubr.msk.f32.mxu0 %vm2494_vm2, %v2354_v1  ;;  %v849_v1 = vrot.slane %v8374_v44, 2 }
  0x89   : > { %v1843_v6 = vpop.permute.xlu1 %1842  ;;  %v1331_v7 = vpop.permute.xlu0 %1330 }
  0x8a   : > { %v2226_v10 = vsel %vm2224_vm0, %v8111_v12, %v1331_v7  ;;  %v463_v12 = vrot.slane %v8350_v15, 1 }
  0x8b   : > { %1390 = vrot.lane.b32.xlu1 %v461_v4, %s8046_s9  ;;  %1388 = vrot.lane.b32.xlu0 %v460_v5, %s8046_s9  ;;  %v2355_v11 = vsel %vm2353_vm1, %v2226_v10, %v1843_v6  ;;  %v8396_v4 = vld [vmem:[%s8099_s30 + $0x120] sm:$0xff] }
  0x8c   : > { %7137 = vmatmul.mubr.msk.f32.vlgmr.msra.gmra.mrb[0].mxu0 %vm2494_vm2, %v2355_v11  ;;  %v466_v7 = vrot.slane %v8396_v4, 1 }
  0x8d   : > { %v1335_v19 = vpop.permute.xlu1 %1334  ;;  %v1333_v22 = vpop.permute.xlu0 %1332 }
  0x8e   : > { %v2228_v26 = vsel %vm2224_vm0, %v8126_v20, %v1335_v19  ;;  %v2227_v27 = vsel %vm2224_vm0, %v8129_v21, %v1333_v22  ;;  %v8371_v20 = vld [vmem:[%s8099_s30 + $0x118] sm:$0xff] }
  0x8f   : > { %1902 = vrot.lane.b32.xlu1 %v846_v13, %s8045_s8  ;;  %1900 = vrot.lane.b32.xlu0 %v845_v14, %s8045_s8  ;;  %v465_v46 = vrot.slane %v8371_v20, 1  ;;  %v850_v0 = vrot.slane %v8371_v20, 2 }
  0x91   : > { %v1847_v28 = vpop.permute.xlu1 %1846  ;;  %v1845_v29 = vpop.permute.xlu0 %1844 }
  0x92   : > { %v2357_v34 = vsel %vm2353_vm1, %v2228_v26, %v1847_v28  ;;  %v2356_v35 = vsel %vm2353_vm1, %v2227_v27, %v1845_v29  ;;  %v8418_v26 = vld [vmem:[%s8099_s30 + $0x130] sm:$0xff] }
  0x93   : > { %1394 = vrot.lane.b32.xlu1 %v463_v12, %s8046_s9  ;;  %1392 = vrot.lane.b32.xlu0 %v462_v23, %s8046_s9  ;;  %v851_v23 = vrot.slane %v8396_v4, 2  ;;  %v468_v29 = vrot.slane %v8418_v26, 1 }
  0x94   : > { %7139 = vmatprep.mubr.msk.f32.mxu0 %vm2494_vm2, %v2356_v35 }
  0x95   : > { %7140 = vmatmul.mubr.msk.f32.gmra.mrb[2].mxu0 %vm2494_vm2, %v2357_v34  ;;  %v1339_v21 = vpop.permute.xlu1 %1338  ;;  %v1337_v45 = vpop.permute.xlu0 %1336 }
  0x96   : > { %v2230_v52 = vsel %vm2224_vm0, %v8146_v30, %v1339_v21  ;;  %v2229_v53 = vsel %vm2224_vm0, %v8149_v31, %v1337_v45  ;;  %v8393_v30 = vld [vmem:[%s8099_s30 + $0x128] sm:$0xff] }
  0x97   : > { %1906 = vrot.lane.b32.xlu1 %v848_v38, %s8045_s8  ;;  %1904 = vrot.lane.b32.xlu0 %v847_v39, %s8045_s8  ;;  %v467_v6 = vrot.slane %v8393_v30, 1  ;;  %v852_v12 = vrot.slane %v8393_v30, 2 }
  0x99   : > { %v1851_v56 = vpop.permute.xlu1 %1850  ;;  %v1849_v57 = vpop.permute.xlu0 %1848 }
  0x9a   : > { %v2359_v62 = vsel %vm2353_vm1, %v2230_v52, %v1851_v56  ;;  %v2358_v63 = vsel %vm2353_vm1, %v2229_v53, %v1849_v57  ;;  %v8440_v52 = vld [vmem:[%s8099_s30 + $0x140] sm:$0xff] }
  0x9b   : > { %1398 = vrot.lane.b32.xlu1 %v465_v46, %s8046_s9  ;;  %1396 = vrot.lane.b32.xlu0 %v464_v47, %s8046_s9  ;;  %v853_v47 = vrot.slane %v8418_v26, 2  ;;  %v470_v57 = vrot.slane %v8440_v52, 1 }
  0x9c   : > { %7142 = vmatprep.mubr.msk.f32.mxu0 %vm2494_vm2, %v2358_v63 }
  0x9d   : > { %7143 = vmatmul.mubr.msk.f32.gmra.mrb[4].mxu0 %vm2494_vm2, %v2359_v62  ;;  %v1343_v31 = vpop.permute.xlu1 %1342  ;;  %v1341_v5 = vpop.permute.xlu0 %1340 }
  0x9e   : > { %v2232_v10 = vsel %vm2224_vm0, %v8160_v36, %v1343_v31  ;;  %v2231_v11 = vsel %vm2224_vm0, %v8163_v37, %v1341_v5  ;;  %v8415_v36 = vld [vmem:[%s8099_s30 + $0x138] sm:$0xff] }
  0x9f   : > { %1910 = vrot.lane.b32.xlu1 %v850_v0, %s8045_s8  ;;  %1908 = vrot.lane.b32.xlu0 %v849_v1, %s8045_s8  ;;  %v469_v28 = vrot.slane %v8415_v36, 1  ;;  %v854_v46 = vrot.slane %v8415_v36, 2 }
  0xa1   : > { %v1855_v13 = vpop.permute.xlu1 %1854  ;;  %v1853_v14 = vpop.permute.xlu0 %1852 }
  0xa2   : > { %v2361_v19 = vsel %vm2353_vm1, %v2232_v10, %v1855_v13  ;;  %v2360_v22 = vsel %vm2353_vm1, %v2231_v11, %v1853_v14  ;;  %v8462_v10 = vld [vmem:[%s8099_s30 + $0x150] sm:$0xff] }
  0xa3   : > { %1402 = vrot.lane.b32.xlu1 %v467_v6, %s8046_s9  ;;  %1400 = vrot.lane.b32.xlu0 %v466_v7, %s8046_s9  ;;  %v855_v7 = vrot.slane %v8440_v52, 2  ;;  %v472_v14 = vrot.slane %v8462_v10, 1 }
  0xa4   : > { %7145 = vmatprep.mubr.msk.f32.mxu0 %vm2494_vm2, %v2360_v22 }
  0xa5   : > { %7146 = vmatmul.mubr.msk.f32.gmra.mrb[6].mxu0 %vm2494_vm2, %v2361_v19  ;;  %v1347_v37 = vpop.permute.xlu1 %1346  ;;  %v1345_v27 = vpop.permute.xlu0 %1344 }
  0xa6   : > { %v2234_v34 = vsel %vm2224_vm0, %v8174_v42, %v1347_v37  ;;  %v2233_v35 = vsel %vm2224_vm0, %v8177_v43, %v1345_v27  ;;  %v8437_v42 = vld [vmem:[%s8099_s30 + $0x148] sm:$0xff] }
  0xa7   : > { %1914 = vrot.lane.b32.xlu1 %v852_v12, %s8045_s8  ;;  %1912 = vrot.lane.b32.xlu0 %v851_v23, %s8045_s8  ;;  %v471_v56 = vrot.slane %v8437_v42, 1  ;;  %v856_v6 = vrot.slane %v8437_v42, 2 }
  0xa9   : > { %v1859_v38 = vpop.permute.xlu1 %1858  ;;  %v1857_v39 = vpop.permute.xlu0 %1856 }
  0xaa   : > { %v2363_v21 = vsel %vm2353_vm1, %v2234_v34, %v1859_v38  ;;  %v2362_v45 = vsel %vm2353_vm1, %v2233_v35, %v1857_v39  ;;  %v8484_v34 = vld [vmem:[%s8099_s30 + $0x160] sm:$0xff] }
  0xab   : > { %1406 = vrot.lane.b32.xlu1 %v469_v28, %s8046_s9  ;;  %1404 = vrot.lane.b32.xlu0 %v468_v29, %s8046_s9  ;;  %v857_v29 = vrot.slane %v8462_v10, 2  ;;  %v474_v39 = vrot.slane %v8484_v34, 1 }
  0xac   : > { %7148 = vmatprep.mubr.msk.f32.mxu0 %vm2494_vm2, %v2362_v45 }
  0xad   : > { %7149 = vmatmul.mubr.msk.f32.gmra.mrb[8].mxu0 %vm2494_vm2, %v2363_v21  ;;  %v1351_v43 = vpop.permute.xlu1 %1350  ;;  %v1349_v53 = vpop.permute.xlu0 %1348 }
  0xae   : > { %v2236_v62 = vsel %vm2224_vm0, %v8188_v48, %v1351_v43  ;;  %v2235_v63 = vsel %vm2224_vm0, %v8191_v49, %v1349_v53  ;;  %v8459_v48 = vld [vmem:[%s8099_s30 + $0x158] sm:$0xff] }
  0xaf   : > { %1918 = vrot.lane.b32.xlu1 %v854_v46, %s8045_s8  ;;  %1916 = vrot.lane.b32.xlu0 %v853_v47, %s8045_s8  ;;  %v473_v13 = vrot.slane %v8459_v48, 1  ;;  %v858_v28 = vrot.slane %v8459_v48, 2 }
  0xb1   : > { %v1863_v0 = vpop.permute.xlu1 %1862  ;;  %v1861_v1 = vpop.permute.xlu0 %1860 }
  0xb2   : > { %v2365_v31 = vsel %vm2353_vm1, %v2236_v62, %v1863_v0  ;;  %v2364_v5 = vsel %vm2353_vm1, %v2235_v63, %v1861_v1  ;;  %v8506_v62 = vld [vmem:[%s8099_s30 + $0x170] sm:$0xff] }
  0xb3   : > { %1410 = vrot.lane.b32.xlu1 %v471_v56, %s8046_s9  ;;  %1408 = vrot.lane.b32.xlu0 %v470_v57, %s8046_s9  ;;  %v859_v57 = vrot.slane %v8484_v34, 2  ;;  %v476_v1 = vrot.slane %v8506_v62, 1 }
  0xb4   : > { %7151 = vmatprep.mubr.msk.f32.mxu0 %vm2494_vm2, %v2364_v5 }
  0xb5   : > { %7152 = vmatmul.mubr.msk.f32.gmra.mrb[10].mxu0 %vm2494_vm2, %v2365_v31  ;;  %v1355_v49 = vpop.permute.xlu1 %1354  ;;  %v1353_v11 = vpop.permute.xlu0 %1352 }
  0xb6   : > { %v2238_v19 = vsel %vm2224_vm0, %v8202_v54, %v1355_v49  ;;  %v2237_v22 = vsel %vm2224_vm0, %v8205_v55, %v1353_v11  ;;  %v8481_v54 = vld [vmem:[%s8099_s30 + $0x168] sm:$0xff] }
  0xb7   : > { %1922 = vrot.lane.b32.xlu1 %v856_v6, %s8045_s8  ;;  %1920 = vrot.lane.b32.xlu0 %v855_v7, %s8045_s8  ;;  %v475_v38 = vrot.slane %v8481_v54, 1  ;;  %v860_v56 = vrot.slane %v8481_v54, 2 }
  0xb9   : > { %v1867_v12 = vpop.permute.xlu1 %1866  ;;  %v1865_v23 = vpop.permute.xlu0 %1864 }
  0xba   : > { %v2367_v37 = vsel %vm2353_vm1, %v2238_v19, %v1867_v12  ;;  %v2366_v27 = vsel %vm2353_vm1, %v2237_v22, %v1865_v23  ;;  %v8528_v19 = vld [vmem:[%s8099_s30 + $0x180] sm:$0xff] }
  0xbb   : > { %1414 = vrot.lane.b32.xlu1 %v473_v13, %s8046_s9  ;;  %1412 = vrot.lane.b32.xlu0 %v472_v14, %s8046_s9  ;;  %v861_v14 = vrot.slane %v8506_v62, 2  ;;  %v478_v23 = vrot.slane %v8528_v19, 1 }
  0xbc   : > { %7154 = vmatprep.mubr.msk.f32.mxu0 %vm2494_vm2, %v2366_v27 }
  0xbd   : > { %7155 = vmatmul.mubr.msk.f32.gmra.mrb[12].mxu0 %vm2494_vm2, %v2367_v37  ;;  %v1359_v55 = vpop.permute.xlu1 %1358  ;;  %v1357_v35 = vpop.permute.xlu0 %1356 }
  0xbe   : > { %v2240_v21 = vsel %vm2224_vm0, %v8216_v60, %v1359_v55  ;;  %v2239_v45 = vsel %vm2224_vm0, %v8219_v61, %v1357_v35  ;;  %v8503_v60 = vld [vmem:[%s8099_s30 + $0x178] sm:$0xff] }
  0xbf   : > { %1926 = vrot.lane.b32.xlu1 %v858_v28, %s8045_s8  ;;  %1924 = vrot.lane.b32.xlu0 %v857_v29, %s8045_s8  ;;  %v477_v0 = vrot.slane %v8503_v60, 1  ;;  %v862_v13 = vrot.slane %v8503_v60, 2 }
  0xc1   : > { %v1871_v46 = vpop.permute.xlu1 %1870  ;;  %v1869_v47 = vpop.permute.xlu0 %1868 }
  0xc2   : > { %v2369_v43 = vsel %vm2353_vm1, %v2240_v21, %v1871_v46  ;;  %v2368_v53 = vsel %vm2353_vm1, %v2239_v45, %v1869_v47  ;;  %v8550_v21 = vld [vmem:[%s8099_s30 + $0x190] sm:$0xff] }
  0xc3   : > { %1418 = vrot.lane.b32.xlu1 %v475_v38, %s8046_s9  ;;  %1416 = vrot.lane.b32.xlu0 %v474_v39, %s8046_s9  ;;  %v863_v39 = vrot.slane %v8528_v19, 2  ;;  %v480_v47 = vrot.slane %v8550_v21, 1 }
  0xc4   : > { %7157 = vmatprep.mubr.msk.f32.mxu0 %vm2494_vm2, %v2368_v53 }
  0xc5   : > { %7158 = vmatmul.mubr.msk.f32.gmra.mrb[14].mxu0 %vm2494_vm2, %v2369_v43  ;;  %v1363_v61 = vpop.permute.xlu1 %1362  ;;  %v1361_v63 = vpop.permute.xlu0 %1360 }
  0xc6   : > { %v2242_v31 = vsel %vm2224_vm0, %v8230_v2, %v1363_v61  ;;  %v2241_v5 = vsel %vm2224_vm0, %v8233_v3, %v1361_v63  ;;  %v8525_v2 = vld [vmem:[%s8099_s30 + $0x188] sm:$0xff] }
  0xc7   : > { %1930 = vrot.lane.b32.xlu1 %v860_v56, %s8045_s8  ;;  %1928 = vrot.lane.b32.xlu0 %v859_v57, %s8045_s8  ;;  %v479_v12 = vrot.slane %v8525_v2, 1  ;;  %v864_v38 = vrot.slane %v8525_v2, 2 }
  0xc9   : > { %v1875_v6 = vpop.permute.xlu1 %1874  ;;  %v1873_v7 = vpop.permute.xlu0 %1872 }
  0xca   : > { %v2371_v49 = vsel %vm2353_vm1, %v2242_v31, %v1875_v6  ;;  %v2370_v11 = vsel %vm2353_vm1, %v2241_v5, %v1873_v7  ;;  %v8572_v31 = vld [vmem:[%s8099_s30 + $0x1a0] sm:$0xff] }
  0xcb   : > { %1422 = vrot.lane.b32.xlu1 %v477_v0, %s8046_s9  ;;  %1420 = vrot.lane.b32.xlu0 %v476_v1, %s8046_s9  ;;  %v865_v1 = vrot.slane %v8550_v21, 2  ;;  %v482_v7 = vrot.slane %v8572_v31, 1 }
  0xcc   : > { %7160 = vmatprep.mubr.msk.f32.mxu0 %vm2494_vm2, %v2370_v11 }
  0xcd   : > { %7161 = vmatmul.mubr.msk.f32.gmra.mrb[16].mxu0 %vm2494_vm2, %v2371_v49  ;;  %v1367_v3 = vpop.permute.xlu1 %1366  ;;  %v1365_v22 = vpop.permute.xlu0 %1364 }
  0xce   : > { %v2244_v37 = vsel %vm2224_vm0, %v8244_v8, %v1367_v3  ;;  %v2243_v27 = vsel %vm2224_vm0, %v8247_v9, %v1365_v22  ;;  %v8547_v8 = vld [vmem:[%s8099_s30 + $0x198] sm:$0xff] }
  0xcf   : > { %1934 = vrot.lane.b32.xlu1 %v862_v13, %s8045_s8  ;;  %1932 = vrot.lane.b32.xlu0 %v861_v14, %s8045_s8  ;;  %v481_v46 = vrot.slane %v8547_v8, 1  ;;  %v866_v0 = vrot.slane %v8547_v8, 2 }
  0xd1   : > { %v1879_v28 = vpop.permute.xlu1 %1878  ;;  %v1877_v29 = vpop.permute.xlu0 %1876 }
  0xd2   : > { %v2373_v55 = vsel %vm2353_vm1, %v2244_v37, %v1879_v28  ;;  %v2372_v35 = vsel %vm2353_vm1, %v2243_v27, %v1877_v29  ;;  %v8594_v37 = vld [vmem:[%s8099_s30 + $0x1b0] sm:$0xff] }
  0xd3   : > { %1426 = vrot.lane.b32.xlu1 %v479_v12, %s8046_s9  ;;  %1424 = vrot.lane.b32.xlu0 %v478_v23, %s8046_s9  ;;  %v867_v23 = vrot.slane %v8572_v31, 2  ;;  %v484_v29 = vrot.slane %v8594_v37, 1 }
  0xd4   : > { %7163 = vmatprep.mubr.msk.f32.mxu0 %vm2494_vm2, %v2372_v35 }
  0xd5   : > { %7164 = vmatmul.mubr.msk.f32.gmra.mrb[18].mxu0 %vm2494_vm2, %v2373_v55  ;;  %v1371_v9 = vpop.permute.xlu1 %1370  ;;  %v1369_v45 = vpop.permute.xlu0 %1368 }
  0xd6   : > { %v2246_v43 = vsel %vm2224_vm0, %v8258_v16, %v1371_v9  ;;  %v2245_v53 = vsel %vm2224_vm0, %v8261_v17, %v1369_v45  ;;  %v8569_v16 = vld [vmem:[%s8099_s30 + $0x1a8] sm:$0xff] }
  0xd7   : > { %1938 = vrot.lane.b32.xlu1 %v864_v38, %s8045_s8  ;;  %1936 = vrot.lane.b32.xlu0 %v863_v39, %s8045_s8  ;;  %v483_v6 = vrot.slane %v8569_v16, 1  ;;  %v868_v12 = vrot.slane %v8569_v16, 2 }
  0xd9   : > { %v1883_v56 = vpop.permute.xlu1 %1882  ;;  %v1881_v57 = vpop.permute.xlu0 %1880 }
  0xda   : > { %v2375_v61 = vsel %vm2353_vm1, %v2246_v43, %v1883_v56  ;;  %v2374_v63 = vsel %vm2353_vm1, %v2245_v53, %v1881_v57  ;;  %v8616_v43 = vld [vmem:[%s8099_s30 + $0x1c0] sm:$0xff] }
  0xdb   : > { %1430 = vrot.lane.b32.xlu1 %v481_v46, %s8046_s9  ;;  %1428 = vrot.lane.b32.xlu0 %v480_v47, %s8046_s9  ;;  %v869_v47 = vrot.slane %v8594_v37, 2  ;;  %v486_v57 = vrot.slane %v8616_v43, 1 }
  0xdc   : > { %7166 = vmatprep.mubr.msk.f32.mxu0 %vm2494_vm2, %v2374_v63 }
  0xdd   : > { %7167 = vmatmul.mubr.msk.f32.gmra.mrb[20].mxu0 %vm2494_vm2, %v2375_v61  ;;  %v1375_v17 = vpop.permute.xlu1 %1374  ;;  %v1373_v5 = vpop.permute.xlu0 %1372 }
  0xde   : > { %v2248_v49 = vsel %vm2224_vm0, %v8272_v24, %v1375_v17  ;;  %v2247_v11 = vsel %vm2224_vm0, %v8275_v25, %v1373_v5  ;;  %v8591_v24 = vld [vmem:[%s8099_s30 + $0x1b8] sm:$0xff] }
  0xdf   : > { %1942 = vrot.lane.b32.xlu1 %v866_v0, %s8045_s8  ;;  %1940 = vrot.lane.b32.xlu0 %v865_v1, %s8045_s8  ;;  %v485_v28 = vrot.slane %v8591_v24, 1  ;;  %v870_v46 = vrot.slane %v8591_v24, 2 }
  0xe1   : > { %v1887_v13 = vpop.permute.xlu1 %1886  ;;  %v1885_v14 = vpop.permute.xlu0 %1884 }
  0xe2   : > { %v2377_v3 = vsel %vm2353_vm1, %v2248_v49, %v1887_v13  ;;  %v2376_v22 = vsel %vm2353_vm1, %v2247_v11, %v1885_v14  ;;  %v8638_v49 = vld [vmem:[%s8099_s30 + $0x1d0] sm:$0xff] }
  0xe3   : > { %1434 = vrot.lane.b32.xlu1 %v483_v6, %s8046_s9  ;;  %1432 = vrot.lane.b32.xlu0 %v482_v7, %s8046_s9  ;;  %v871_v7 = vrot.slane %v8616_v43, 2  ;;  %v488_v14 = vrot.slane %v8638_v49, 1 }
  0xe4   : > { %7169 = vmatprep.mubr.msk.f32.mxu0 %vm2494_vm2, %v2376_v22 }
  0xe5   : > { %7170 = vmatmul.mubr.msk.f32.gmra.mrb[22].mxu0 %vm2494_vm2, %v2377_v3  ;;  %v1379_v25 = vpop.permute.xlu1 %1378  ;;  %v1377_v27 = vpop.permute.xlu0 %1376 }
  0xe6   : > { %v2250_v55 = vsel %vm2224_vm0, %v8286_v32, %v1379_v25  ;;  %v2249_v35 = vsel %vm2224_vm0, %v8289_v33, %v1377_v27  ;;  %v8613_v32 = vld [vmem:[%s8099_s30 + $0x1c8] sm:$0xff] }
  0xe7   : > { %1946 = vrot.lane.b32.xlu1 %v868_v12, %s8045_s8  ;;  %1944 = vrot.lane.b32.xlu0 %v867_v23, %s8045_s8  ;;  %v487_v56 = vrot.slane %v8613_v32, 1  ;;  %v872_v6 = vrot.slane %v8613_v32, 2 }
  0xe9   : > { %v1891_v38 = vpop.permute.xlu1 %1890  ;;  %v1889_v39 = vpop.permute.xlu0 %1888 }
  0xea   : > { %v2379_v9 = vsel %vm2353_vm1, %v2250_v55, %v1891_v38  ;;  %v2378_v45 = vsel %vm2353_vm1, %v2249_v35, %v1889_v39  ;;  %v8660_v55 = vld [vmem:[%s8099_s30 + $0x1e0] sm:$0xff] }
  0xeb   : > { %1438 = vrot.lane.b32.xlu1 %v485_v28, %s8046_s9  ;;  %1436 = vrot.lane.b32.xlu0 %v484_v29, %s8046_s9  ;;  %v873_v29 = vrot.slane %v8638_v49, 2  ;;  %v490_v39 = vrot.slane %v8660_v55, 1 }
  0xec   : > { %7172 = vmatprep.mubr.msk.f32.mxu0 %vm2494_vm2, %v2378_v45 }
  0xed   : > { %7173 = vmatmul.mubr.msk.f32.gmra.mrb[24].mxu0 %vm2494_vm2, %v2379_v9  ;;  %v1383_v33 = vpop.permute.xlu1 %1382  ;;  %v1381_v53 = vpop.permute.xlu0 %1380 }
  0xee   : > { %v2252_v61 = vsel %vm2224_vm0, %v8300_v40, %v1383_v33  ;;  %v2251_v63 = vsel %vm2224_vm0, %v8303_v41, %v1381_v53  ;;  %v8635_v40 = vld [vmem:[%s8099_s30 + $0x1d8] sm:$0xff] }
  0xef   : > { %1950 = vrot.lane.b32.xlu1 %v870_v46, %s8045_s8  ;;  %1948 = vrot.lane.b32.xlu0 %v869_v47, %s8045_s8  ;;  %v489_v13 = vrot.slane %v8635_v40, 1  ;;  %v874_v28 = vrot.slane %v8635_v40, 2 }
  0xf1   : > { %v1895_v0 = vpop.permute.xlu1 %1894  ;;  %v1893_v1 = vpop.permute.xlu0 %1892 }
  0xf2   : > { %v2381_v17 = vsel %vm2353_vm1, %v2252_v61, %v1895_v0  ;;  %v2380_v5 = vsel %vm2353_vm1, %v2251_v63, %v1893_v1  ;;  %v8682_v61 = vld [vmem:[%s8099_s30 + $0x1f0] sm:$0xff] }
  0xf3   : > { %1442 = vrot.lane.b32.xlu1 %v487_v56, %s8046_s9  ;;  %1440 = vrot.lane.b32.xlu0 %v486_v57, %s8046_s9  ;;  %v875_v57 = vrot.slane %v8660_v55, 2  ;;  %v492_v1 = vrot.slane %v8682_v61, 1 }
  0xf4   : > { %7175 = vmatprep.mubr.msk.f32.mxu0 %vm2494_vm2, %v2380_v5 }
  0xf5   : > { %7176 = vmatmul.mubr.msk.f32.gmra.mrb[26].mxu0 %vm2494_vm2, %v2381_v17  ;;  %v1387_v41 = vpop.permute.xlu1 %1386  ;;  %v1385_v11 = vpop.permute.xlu0 %1384 }
  0xf6   : > { %v2254_v3 = vsel %vm2224_vm0, %v8314_v50, %v1387_v41  ;;  %v2253_v22 = vsel %vm2224_vm0, %v8317_v51, %v1385_v11  ;;  %v8657_v50 = vld [vmem:[%s8099_s30 + $0x1e8] sm:$0xff] }
  0xf7   : > { %1954 = vrot.lane.b32.xlu1 %v872_v6, %s8045_s8  ;;  %1952 = vrot.lane.b32.xlu0 %v871_v7, %s8045_s8  ;;  %v491_v38 = vrot.slane %v8657_v50, 1  ;;  %v876_v56 = vrot.slane %v8657_v50, 2 }
  0xf9   : > { %v1899_v12 = vpop.permute.xlu1 %1898  ;;  %v1897_v23 = vpop.permute.xlu0 %1896 }
  0xfa   : > { %v2383_v25 = vsel %vm2353_vm1, %v2254_v3, %v1899_v12  ;;  %v2382_v27 = vsel %vm2353_vm1, %v2253_v22, %v1897_v23  ;;  %v8704_v3 = vld [vmem:[%s8099_s30 + $0x200] sm:$0xff] }
  0xfb   : > { %1446 = vrot.lane.b32.xlu1 %v489_v13, %s8046_s9  ;;  %1444 = vrot.lane.b32.xlu0 %v488_v14, %s8046_s9  ;;  %v877_v14 = vrot.slane %v8682_v61, 2  ;;  %v494_v23 = vrot.slane %v8704_v3, 1 }
  0xfc   : > { %7178 = vmatprep.mubr.msk.f32.mxu0 %vm2494_vm2, %v2382_v27 }
  0xfd   : > { %7179 = vmatmul.mubr.msk.f32.gmra.mrb[28].mxu0 %vm2494_vm2, %v2383_v25  ;;  %v1391_v51 = vpop.permute.xlu1 %1390  ;;  %v1389_v35 = vpop.permute.xlu0 %1388 }
  0xfe   : > { %v2256_v9 = vsel %vm2224_vm0, %v8328_v58, %v1391_v51  ;;  %v2255_v45 = vsel %vm2224_vm0, %v8331_v59, %v1389_v35  ;;  %v8679_v58 = vld [vmem:[%s8099_s30 + $0x1f8] sm:$0xff] }
  0xff   : > { %1958 = vrot.lane.b32.xlu1 %v874_v28, %s8045_s8  ;;  %1956 = vrot.lane.b32.xlu0 %v873_v29, %s8045_s8  ;;  %v493_v0 = vrot.slane %v8679_v58, 1  ;;  %v878_v13 = vrot.slane %v8679_v58, 2 }
 0x101   : > { %v1903_v46 = vpop.permute.xlu1 %1902  ;;  %v1901_v47 = vpop.permute.xlu0 %1900 }
 0x102   : > { %v2385_v33 = vsel %vm2353_vm1, %v2256_v9, %v1903_v46  ;;  %v2384_v53 = vsel %vm2353_vm1, %v2255_v45, %v1901_v47  ;;  %v8726_v9 = vld [vmem:[%s8099_s30 + $0x210] sm:$0xff] }
 0x103   : > { %1450 = vrot.lane.b32.xlu1 %v491_v38, %s8046_s9  ;;  %1448 = vrot.lane.b32.xlu0 %v490_v39, %s8046_s9  ;;  %v879_v39 = vrot.slane %v8704_v3, 2  ;;  %v496_v47 = vrot.slane %v8726_v9, 1 }
 0x104   : > { %7181 = vmatprep.mubr.msk.f32.mxu0 %vm2494_vm2, %v2384_v53 }
 0x105   : > { %7182 = vmatmul.mubr.msk.f32.gmra.mrb[30].mxu0 %vm2494_vm2, %v2385_v33  ;;  %v1395_v59 = vpop.permute.xlu1 %1394  ;;  %v1393_v63 = vpop.permute.xlu0 %1392 }
 0x106   : > { %v2258_v17 = vsel %vm2224_vm0, %v8350_v15, %v1395_v59  ;;  %v2257_v5 = vsel %vm2224_vm0, %v8353_v18, %v1393_v63  ;;  %v8701_v15 = vld [vmem:[%s8099_s30 + $0x208] sm:$0xff] }
 0x107   : > { %1962 = vrot.lane.b32.xlu1 %v876_v56, %s8045_s8  ;;  %1960 = vrot.lane.b32.xlu0 %v875_v57, %s8045_s8  ;;  %v495_v12 = vrot.slane %v8701_v15, 1  ;;  %v880_v38 = vrot.slane %v8701_v15, 2 }
 0x109   : > { %v1907_v6 = vpop.permute.xlu1 %1906  ;;  %v1905_v7 = vpop.permute.xlu0 %1904 }
 0x10a   : > { %v2387_v41 = vsel %vm2353_vm1, %v2258_v17, %v1907_v6  ;;  %v2386_v11 = vsel %vm2353_vm1, %v2257_v5, %v1905_v7  ;;  %v8748_v17 = vld [vmem:[%s8099_s30 + $0x220] sm:$0xff] }
 0x10b   : > { %1454 = vrot.lane.b32.xlu1 %v493_v0, %s8046_s9  ;;  %1452 = vrot.lane.b32.xlu0 %v492_v1, %s8046_s9  ;;  %v881_v1 = vrot.slane %v8726_v9, 2  ;;  %v498_v7 = vrot.slane %v8748_v17, 1 }
 0x10c   : > { %7184 = vmatprep.mubr.msk.f32.mxu0 %vm2494_vm2, %v2386_v11 }
 0x10d   : > { %7185 = vmatmul.mubr.msk.f32.gmra.mrb[32].mxu0 %vm2494_vm2, %v2387_v41  ;;  %v1399_v18 = vpop.permute.xlu1 %1398  ;;  %v1397_v22 = vpop.permute.xlu0 %1396 }
 0x10e   : > { %v2260_v25 = vsel %vm2224_vm0, %v8371_v20, %v1399_v18  ;;  %v2259_v27 = vsel %vm2224_vm0, %v8374_v44, %v1397_v22  ;;  %v8723_v20 = vld [vmem:[%s8099_s30 + $0x218] sm:$0xff] }
 0x10f   : > { %1966 = vrot.lane.b32.xlu1 %v878_v13, %s8045_s8  ;;  %1964 = vrot.lane.b32.xlu0 %v877_v14, %s8045_s8  ;;  %v497_v46 = vrot.slane %v8723_v20, 1  ;;  %v882_v0 = vrot.slane %v8723_v20, 2 }
 0x111   : > { %v1911_v28 = vpop.permute.xlu1 %1910  ;;  %v1909_v29 = vpop.permute.xlu0 %1908 }
 0x112   : > { %v2389_v51 = vsel %vm2353_vm1, %v2260_v25, %v1911_v28  ;;  %v2388_v35 = vsel %vm2353_vm1, %v2259_v27, %v1909_v29  ;;  %v244_v25 = vld [vmem:[%s8099_s30 + $0x230] sm:$0xff] }
 0x113   : > { %1458 = vrot.lane.b32.xlu1 %v495_v12, %s8046_s9  ;;  %1456 = vrot.lane.b32.xlu0 %v494_v23, %s8046_s9  ;;  %v883_v23 = vrot.slane %v8748_v17, 2  ;;  %v500_v29 = vrot.slane %v244_v25, 1 }
 0x114   : > { %7187 = vmatprep.mubr.msk.f32.mxu0 %vm2494_vm2, %v2388_v35 }
 0x115   : > { %7188 = vmatmul.mubr.msk.f32.gmra.mrb[34].mxu0 %vm2494_vm2, %v2389_v51  ;;  %v1403_v44 = vpop.permute.xlu1 %1402  ;;  %v1401_v45 = vpop.permute.xlu0 %1400 }
 0x116   : > { %v2262_v33 = vsel %vm2224_vm0, %v8393_v30, %v1403_v44  ;;  %v2261_v53 = vsel %vm2224_vm0, %v8396_v4, %v1401_v45  ;;  %v8745_v30 = vld [vmem:[%s8099_s30 + $0x228] sm:$0xff] }
 0x117   : > { %1970 = vrot.lane.b32.xlu1 %v880_v38, %s8045_s8  ;;  %1968 = vrot.lane.b32.xlu0 %v879_v39, %s8045_s8  ;;  %v499_v6 = vrot.slane %v8745_v30, 1  ;;  %v884_v12 = vrot.slane %v8745_v30, 2 }
 0x119   : > { %v1915_v56 = vpop.permute.xlu1 %1914  ;;  %v1913_v57 = vpop.permute.xlu0 %1912 }
 0x11a   : > { %v2391_v59 = vsel %vm2353_vm1, %v2262_v33, %v1915_v56  ;;  %v2390_v63 = vsel %vm2353_vm1, %v2261_v53, %v1913_v57  ;;  %v247_v33 = vld [vmem:[%s8099_s30 + $0x248] sm:$0xff]  ;;  %v246_v53 = vld [vmem:[%s8099_s30 + $0x240] sm:$0xff] }
 0x11b   : > { %1462 = vrot.lane.b32.xlu1 %v497_v46, %s8046_s9  ;;  %1460 = vrot.lane.b32.xlu0 %v496_v47, %s8046_s9  ;;  %v885_v47 = vrot.slane %v244_v25, 2  ;;  %v503_v56 = vrot.slane %v247_v33, 1  ;;  %v502_v57 = vrot.slane %v246_v53, 1 }
 0x11c   : > { %7190 = vmatprep.mubr.msk.f32.mxu0 %vm2494_vm2, %v2390_v63 }
 0x11d   : > { %7191 = vmatmul.mubr.msk.f32.gmra.mrb[36].mxu0 %vm2494_vm2, %v2391_v59  ;;  %v1407_v4 = vpop.permute.xlu1 %1406  ;;  %v1405_v5 = vpop.permute.xlu0 %1404 }
 0x11e   : > { %v2264_v41 = vsel %vm2224_vm0, %v8415_v36, %v1407_v4  ;;  %v2263_v11 = vsel %vm2224_vm0, %v8418_v26, %v1405_v5  ;;  %v245_v36 = vld [vmem:[%s8099_s30 + $0x238] sm:$0xff] }
 0x11f   : > { %1974 = vrot.lane.b32.xlu1 %v882_v0, %s8045_s8  ;;  %1972 = vrot.lane.b32.xlu0 %v881_v1, %s8045_s8  ;;  %v501_v28 = vrot.slane %v245_v36, 1  ;;  %v886_v46 = vrot.slane %v245_v36, 2 }
 0x121   : > { %v1919_v13 = vpop.permute.xlu1 %1918  ;;  %v1917_v14 = vpop.permute.xlu0 %1916 }
 0x122   : > { %v2393_v18 = vsel %vm2353_vm1, %v2264_v41, %v1919_v13  ;;  %v2392_v22 = vsel %vm2353_vm1, %v2263_v11, %v1917_v14  ;;  %v249_v41 = vld [vmem:[%s8099_s30 + $0x258] sm:$0xff]  ;;  %v248_v11 = vld [vmem:[%s8099_s30 + $0x250] sm:$0xff] }
 0x123   : > { %1466 = vrot.lane.b32.xlu1 %v499_v6, %s8046_s9  ;;  %1464 = vrot.lane.b32.xlu0 %v498_v7, %s8046_s9  ;;  %v888_v6 = vrot.slane %v247_v33, 2  ;;  %v887_v7 = vrot.slane %v246_v53, 2  ;;  %v505_v13 = vrot.slane %v249_v41, 1  ;;  %v504_v14 = vrot.slane %v248_v11, 1 }
 0x124   : > { %7193 = vmatprep.mubr.msk.f32.mxu0 %vm2494_vm2, %v2392_v22 }
 0x125   : > { %7194 = vmatmul.mubr.msk.f32.gmra.mrb[38].mxu0 %vm2494_vm2, %v2393_v18  ;;  %v1411_v26 = vpop.permute.xlu1 %1410  ;;  %v1409_v27 = vpop.permute.xlu0 %1408 }
 0x126   : > { %v2266_v51 = vsel %vm2224_vm0, %v8437_v42, %v1411_v26  ;;  %v2265_v35 = vsel %vm2224_vm0, %v8440_v52, %v1409_v27  ;;  %v890_v26 = vrot.slane %v249_v41, 2  ;;  %v889_v27 = vrot.slane %v248_v11, 2  ;;  %v255_v41 = vld [vmem:[%s8099_s30 + $0x288] sm:$0xff]  ;;  %v254_v11 = vld [vmem:[%s8099_s30 + $0x280] sm:$0xff] }
 0x127   : > { %1978 = vrot.lane.b32.xlu1 %v884_v12, %s8045_s8  ;;  %1976 = vrot.lane.b32.xlu0 %v883_v23, %s8045_s8 }
 0x129   : > { %v1923_v38 = vpop.permute.xlu1 %1922  ;;  %v1921_v39 = vpop.permute.xlu0 %1920 }
 0x12a   : > { %v2395_v44 = vsel %vm2353_vm1, %v2266_v51, %v1923_v38  ;;  %v2394_v45 = vsel %vm2353_vm1, %v2265_v35, %v1921_v39 }
 0x12b   : > { %1470 = vrot.lane.b32.xlu1 %v501_v28, %s8046_s9  ;;  %1468 = vrot.lane.b32.xlu0 %v500_v29, %s8046_s9  ;;  %v251_v28 = vld [vmem:[%s8099_s30 + $0x268] sm:$0xff]  ;;  %v250_v29 = vld [vmem:[%s8099_s30 + $0x260] sm:$0xff] }
 0x12c   : > { %7196 = vmatprep.mubr.msk.f32.mxu0 %vm2494_vm2, %v2394_v45  ;;  %v507_v51 = vrot.slane %v251_v28, 1  ;;  %v506_v35 = vrot.slane %v250_v29, 1  ;;  %v892_v33 = vrot.slane %v251_v28, 2  ;;  %v891_v53 = vrot.slane %v250_v29, 2  ;;  %v256_v28 = vld [vmem:[%s8099_s30 + $0x290] sm:$0xff] }
 0x12d   : > { %7197 = vmatmul.mubr.msk.f32.gmra.mrb[40].mxu0 %vm2494_vm2, %v2395_v44  ;;  %v1415_v42 = vpop.permute.xlu1 %1414  ;;  %v1413_v52 = vpop.permute.xlu0 %1412 }
 0x12e   : > { %v2268_v59 = vsel %vm2224_vm0, %v8459_v48, %v1415_v42  ;;  %v2267_v63 = vsel %vm2224_vm0, %v8462_v10, %v1413_v52  ;;  %v253_v42 = vld [vmem:[%s8099_s30 + $0x278] sm:$0xff]  ;;  %v252_v52 = vld [vmem:[%s8099_s30 + $0x270] sm:$0xff] }
 0x12f   : > { %1982 = vrot.lane.b32.xlu1 %v886_v46, %s8045_s8  ;;  %1980 = vrot.lane.b32.xlu0 %v885_v47, %s8045_s8 }
 0x131   : > { %v1927_v0 = vpop.permute.xlu1 %1926  ;;  %v1925_v1 = vpop.permute.xlu0 %1924 }
 0x132   : > { %v2397_v4 = vsel %vm2353_vm1, %v2268_v59, %v1927_v0  ;;  %v2396_v5 = vsel %vm2353_vm1, %v2267_v63, %v1925_v1 }
 0x133   : > { %1474 = vrot.lane.b32.xlu1 %v503_v56, %s8046_s9  ;;  %1472 = vrot.lane.b32.xlu0 %v502_v57, %s8046_s9  ;;  %v509_v56 = vrot.slane %v253_v42, 1  ;;  %v508_v57 = vrot.slane %v252_v52, 1 }
 0x134   : > { %7199 = vmatprep.mubr.msk.f32.mxu0 %vm2494_vm2, %v2396_v5 }
 0x135   : > { %7200 = vmatmul.mubr.msk.f32.gmra.mrb[42].mxu0 %vm2494_vm2, %v2397_v4  ;;  %v1419_v48 = vpop.permute.xlu1 %1418  ;;  %v1417_v10 = vpop.permute.xlu0 %1416 }
 0x136   : > { %v2270_v18 = vsel %vm2224_vm0, %v8481_v54, %v1419_v48  ;;  %v2269_v22 = vsel %vm2224_vm0, %v8484_v34, %v1417_v10  ;;  %v511_v48 = vrot.slane %v255_v41, 1  ;;  %v510_v10 = vrot.slane %v254_v11, 1 }
 0x137   : > { %1986 = vrot.lane.b32.xlu1 %v888_v6, %s8045_s8  ;;  %1984 = vrot.lane.b32.xlu0 %v887_v7, %s8045_s8  ;;  %v894_v6 = vrot.slane %v253_v42, 2  ;;  %v893_v7 = vrot.slane %v252_v52, 2  ;;  %v897_v42 = vrot.slane %v256_v28, 2 }
 0x139   : > { %v1931_v12 = vpop.permute.xlu1 %1930  ;;  %v1929_v23 = vpop.permute.xlu0 %1928 }
 0x13a   : > { %v2399_v36 = vsel %vm2353_vm1, %v2270_v18, %v1931_v12  ;;  %v2398_v25 = vsel %vm2353_vm1, %v2269_v22, %v1929_v23 }
 0x13b   : > { %1478 = vrot.lane.b32.xlu1 %v505_v13, %s8046_s9  ;;  %1476 = vrot.lane.b32.xlu0 %v504_v14, %s8046_s9  ;;  %v3584_v13 = vlaneseq }
 0x13c   : > { %7202 = vmatprep.mubr.msk.f32.mxu0 %vm2494_vm2, %v2398_v25  ;;  %v896_v25 = vrot.slane %v255_v41, 2 }
 0x13d   : > { %7203 = vmatmul.mubr.msk.f32.gmra.mrb[44].mxu0 %vm2494_vm2, %v2399_v36  ;;  %v1423_v54 = vpop.permute.xlu1 %1422  ;;  %v1421_v34 = vpop.permute.xlu0 %1420 }
 0x13e   : > { %v2272_v38 = vsel %vm2224_vm0, %v8503_v60, %v1423_v54  ;;  %v2271_v39 = vsel %vm2224_vm0, %v8506_v62, %v1421_v34  ;;  %v512_v34 = vrot.slane %v256_v28, 1 }
 0x13f   : > { %1990 = vrot.lane.b32.xlu1 %v890_v26, %s8045_s8  ;;  %1988 = vrot.lane.b32.xlu0 %v889_v27, %s8045_s8  ;;  %v895_v26 = vrot.slane %v254_v11, 2  ;;  %v3587_v27 = vand.u32 127, %v3584_v13 }
 0x141   : > { %v1935_v44 = vpop.permute.xlu1 %1934  ;;  %v1933_v45 = vpop.permute.xlu0 %1932  ;;  %vm3588_vm3 = vcmp.lt.s32.totalorder %v3587_v27, 8 }
 0x142   : > { %v2401_v46 = vsel %vm2353_vm1, %v2272_v38, %v1935_v44  ;;  %v2400_v47 = vsel %vm2353_vm1, %v2271_v39, %v1933_v45  ;;  %v3585_v45 = vshrl.u32 %v3584_v13, 7 }
 0x143   : > { %1482 = vrot.lane.b32.xlu1 %v507_v51, %s8046_s9  ;;  %1480 = vrot.lane.b32.xlu0 %v506_v35, %s8046_s9  ;;  %v278_v51 = vld [vmem:[%s8099_s30 + $0x340] sm:$0xff] }
 0x144   : > { %7205 = vmatprep.mubr.msk.f32.mxu0 %vm2494_vm2, %v2400_v47  ;;  %v534_v52 = vrot.slane %v278_v51, 1 }
 0x145   : > { %7206 = vmatmul.mubr.msk.f32.gmra.mrb[46].mxu0 %vm2494_vm2, %v2401_v46  ;;  %v1427_v60 = vpop.permute.xlu1 %1426  ;;  %v1425_v62 = vpop.permute.xlu0 %1424 }
 0x146   : > { %v2274_v59 = vsel %vm2224_vm0, %v8525_v2, %v1427_v60  ;;  %v2273_v63 = vsel %vm2224_vm0, %v8528_v19, %v1425_v62 }
 0x147   : > { %1994 = vrot.lane.b32.xlu1 %v892_v33, %s8045_s8  ;;  %1992 = vrot.lane.b32.xlu0 %v891_v53, %s8045_s8  ;;  %v8047_v33 = vmov 6  }
 0x148   : > { %v3589_v53 = vsel %vm3588_vm3, 7, %v8047_v33 }
 0x149   : > { %v1939_v0 = vpop.permute.xlu1 %1938  ;;  %v1937_v1 = vpop.permute.xlu0 %1936  ;;  %vm8867_vm4 = vcmp.lt.s32.totalorder %v3585_v45, %v3589_v53 }
 0x14a   : > { %v2403_v4 = vsel %vm2353_vm1, %v2274_v59, %v1939_v0  ;;  %v2402_v5 = vsel %vm2353_vm1, %v2273_v63, %v1937_v1 }
 0x14b   : > { %1486 = vrot.lane.b32.xlu1 %v509_v56, %s8046_s9  ;;  %1484 = vrot.lane.b32.xlu0 %v508_v57, %s8046_s9 }
 0x14c   : > { %7208 = vmatprep.mubr.msk.f32.mxu0 %vm2494_vm2, %v2402_v5 }
 0x14d   : > { %7209 = vmatmul.mubr.msk.f32.gmra.mrb[48].mxu0 %vm2494_vm2, %v2403_v4  ;;  %v1431_v2 = vpop.permute.xlu1 %1430  ;;  %v1429_v19 = vpop.permute.xlu0 %1428 }
 0x14e   : > { %v2276_v14 = vsel %vm2224_vm0, %v8547_v8, %v1431_v2  ;;  %v2275_v18 = vsel %vm2224_vm0, %v8550_v21, %v1429_v19  ;;  %v257_v8 = vld [vmem:[%s8099_s30 + $0x298] sm:$0xff] }
 0x14f   : > { %1998 = vrot.lane.b32.xlu1 %v894_v6, %s8045_s8  ;;  %1996 = vrot.lane.b32.xlu0 %v893_v7, %s8045_s8  ;;  %v513_v54 = vrot.slane %v257_v8, 1  ;;  %v898_v57 = vrot.slane %v257_v8, 2 }
 0x151   : > { %v1943_v22 = vpop.permute.xlu1 %1942  ;;  %v1941_v12 = vpop.permute.xlu0 %1940 }
 0x152   : > { %v2405_v23 = vsel %vm2353_vm1, %v2276_v14, %v1943_v22  ;;  %v2404_v36 = vsel %vm2353_vm1, %v2275_v18, %v1941_v12  ;;  %v8889_v14 = vld [vmem:[%s8099_s30 + $0x2a8] sm:$0xff]  ;;  %v258_v18 = vld [vmem:[%s8099_s30 + $0x2a0] sm:$0xff] }
 0x153   : > { %1490 = vrot.lane.b32.xlu1 %v511_v48, %s8046_s9  ;;  %1488 = vrot.lane.b32.xlu0 %v510_v10, %s8046_s9  ;;  %v919_v10 = vrot.slane %v278_v51, 2  ;;  %v515_v27 = vrot.slane %v8889_v14, 1  ;;  %v514_v8 = vrot.slane %v258_v18, 1 }
 0x154   : > { %7211 = vmatprep.mubr.msk.f32.mxu0 %vm2494_vm2, %v2404_v36  ;;  %v8894_v36 = vld [vmem:[%s8099_s30 + $0x350] sm:$0xff] }
 0x155   : > { %7212 = vmatmul.mubr.msk.f32.gmra.mrb[50].mxu0 %vm2494_vm2, %v2405_v23  ;;  %v1435_v21 = vpop.permute.xlu1 %1434  ;;  %v1433_v29 = vpop.permute.xlu0 %1432 }
 0x156   : > { %v2278_v35 = vsel %vm2224_vm0, %v8569_v16, %v1435_v21  ;;  %v2277_v38 = vsel %vm2224_vm0, %v8572_v31, %v1433_v29  ;;  %v279_v16 = vld [vmem:[%s8099_s30 + $0x348] sm:$0xff]  ;;  %v899_v29 = vrot.slane %v258_v18, 2 }
 0x157   : > { %2002 = vrot.lane.b32.xlu1 %v896_v25, %s8045_s8  ;;  %2000 = vrot.lane.b32.xlu0 %v895_v26, %s8045_s8  ;;  %v535_v59 = vrot.slane %v279_v16, 1 }
 0x159   : > { %v1947_v39 = vpop.permute.xlu1 %1946  ;;  %v1945_v44 = vpop.permute.xlu0 %1944 }
 0x15a   : > { %v2407_v46 = vsel %vm2353_vm1, %v2278_v35, %v1947_v39  ;;  %v2406_v47 = vsel %vm2353_vm1, %v2277_v38, %v1945_v44 }
 0x15b   : > { %1494 = vrot.lane.b32.xlu1 %v513_v54, %s8046_s9  ;;  %1492 = vrot.lane.b32.xlu0 %v512_v34, %s8046_s9  ;;  %v536_v54 = vrot.slane %v8894_v36, 1 }
 0x15c   : > { %7214 = vmatprep.mubr.msk.f32.mxu0 %vm2494_vm2, %v2406_v47 }
 0x15d   : > { %7215 = vmatmul.mubr.msk.f32.gmra.mrb[52].mxu0 %vm2494_vm2, %v2407_v46  ;;  %v1439_v31 = vpop.permute.xlu1 %1438  ;;  %v1437_v60 = vpop.permute.xlu0 %1436 }
 0x15e   : > { %v2280_v1 = vsel %vm2224_vm0, %v8591_v24, %v1439_v31  ;;  %v2279_v4 = vsel %vm2224_vm0, %v8594_v37, %v1437_v60  ;;  %v920_v37 = vrot.slane %v279_v16, 2 }
 0x15f   : > { %2004 = vrot.lane.b32.xlu1 %v897_v42, %s8045_s8  ;;  %v7138_v56 = vpop.f32.mrb[0].mxu0  ;;  %1536 = vrot.lane.b32.xlu0 %v534_v52, %s8046_s9 }
 0x160   : > { %v3592_v63 = vsel %vm8867_vm4, %v7138_v56, -1e+30  ;;  %v2945_v0 = vpop.f32.mrb[1].mxu0  ;;  %v281_v56 = vld [vmem:[%s8099_s30 + $0x358] sm:$0xff] }
 0x161   : > { %v3727_v5 = vsel %vm3719_vm5, %v3592_v63, -inf  ;;  %v3591_v6 = vsel %vm8867_vm4, %v2945_v0, -1e+30  ;;  %v1951_v7 = vpop.permute.xlu1 %1950  ;;  %v1949_v41 = vpop.permute.xlu0 %1948 }
 0x162   : > { %v3728_v11 = vrot.slane %v3727_v5, 4  ;;  %v3720_v2 = vsel %vm3719_vm5, %v3591_v6, -inf  ;;  %v2409_v19 = vsel %vm2353_vm1, %v2280_v1, %v1951_v7  ;;  %v2408_v24 = vsel %vm2353_vm1, %v2279_v4, %v1949_v41 }
 0x163   : > { %v3721_v48 = vrot.slane %v3720_v2, 4  ;;  %2006 = vrot.lane.b32.xlu1 %v898_v57, %s8045_s8  ;;  %1538 = vrot.lane.b32.xlu0 %v535_v59, %s8046_s9  ;;  %v537_v41 = vrot.slane %v281_v56, 1 }
 0x164   : > { %v3729_v13 = vmax.f32 %v3727_v5, %v3728_v11  ;;  %7217 = vmatprep.mubr.msk.f32.mxu0 %vm2494_vm2, %v2408_v24  ;;  %v900_v5 = vrot.slane %v8889_v14, 2  ;;  %v922_v11 = vrot.slane %v281_v56, 2 }
 0x165   : > { %v3722_v22 = vmax.f32 %v3720_v2, %v3721_v48  ;;  %7218 = vmatmul.mubr.msk.f32.gmra.mrb[54].mxu0 %vm2494_vm2, %v2409_v19  ;;  %v1443_v12 = vpop.permute.xlu1 %1442  ;;  %v1441_v23 = vpop.permute.xlu0 %1440 }
 0x166   : > { %v3730_v25 = vrot.slane %v3729_v13, 2  ;;  %v2282_v51 = vsel %vm2224_vm0, %v8613_v32, %v1443_v12  ;;  %v2281_v35 = vsel %vm2224_vm0, %v8616_v43, %v1441_v23  ;;  %v8913_v32 = vld [vmem:[%s10679_s2] ss:$0 sm:$0xff] }
 0x167   : > { %v3723_v26 = vrot.slane %v3722_v22, 2  ;;  %2050 = vrot.lane.b32.xlu1 %v920_v37, %s8045_s8  ;;  %2048 = vrot.lane.b32.xlu0 %v919_v10, %s8045_s8  ;;  %v921_v37 = vrot.slane %v8894_v36, 2  ;;  %v8938_v36 = vld [vmem:[%s8099_s30 + $0x2b8] sm:$0xff] }
 0x168   : > { %v3731_v28 = vmax.f32 %v3729_v13, %v3730_v25  ;;  %v7141_v21 = vpop.f32.mrb[2].mxu0  ;;  %v902_v56 = vrot.slane %v8938_v36, 2 }
 0x169   : > { %v3724_v34 = vmax.f32 %v3722_v22, %v3723_v26  ;;  %v3594_v38 = vsel %vm8867_vm4, %v7141_v21, -1e+30  ;;  %v2955_v39 = vpop.f32.mrb[3].mxu0  ;;  %v1955_v44 = vpop.permute.xlu1 %1954 }
 0x16a   : > { %v3732_v45 = vrot.slane %v3731_v28, 1  ;;  %v3741_v46 = vsel %vm3719_vm5, %v3594_v38, -inf  ;;  %v3593_v47 = vsel %vm8867_vm4, %v2955_v39, -1e+30  ;;  %v2411_v33 = vsel %vm2353_vm1, %v2282_v51, %v1955_v44  ;;  %v1953_v53 = vpop.permute.xlu0 %1952 }
 0x16b   : > { %v3725_v43 = vrot.slane %v3724_v34, 1  ;;  %v3742_v42 = vrot.slane %v3741_v46, 4  ;;  %v3734_v52 = vsel %vm3719_vm5, %v3593_v47, -inf  ;;  %v2410_v16 = vsel %vm2353_vm1, %v2281_v35, %v1953_v53  ;;  %1498 = vrot.lane.b32.xlu1 %v515_v27, %s8046_s9  ;;  %1496 = vrot.lane.b32.xlu0 %v514_v8, %s8046_s9  ;;  %v8941_v8 = vld [vmem:[%s8099_s30 + $0x2b0] sm:$0xff] }
 0x16c   : > { %v3733_v31 = vmax.f32 %v3731_v28, %v3732_v45  ;;  %v3735_v60 = vrot.slane %v3734_v52, 4  ;;  %7220 = vmatprep.mubr.msk.f32.mxu0 %vm2494_vm2, %v2410_v16  ;;  %v516_v47 = vrot.slane %v8941_v8, 1 }
 0x16d   : > { %v3726_v57 = vmax.f32 %v3724_v34, %v3725_v43  ;;  %v3743_v59 = vmax.f32 %v3741_v46, %v3742_v42  ;;  %7221 = vmatmul.mubr.msk.f32.gmra.mrb[56].mxu0 %vm2494_vm2, %v2411_v33  ;;  %v1447_v63 = vpop.permute.xlu1 %1446  ;;  %v517_v46 = vrot.slane %v8938_v36, 1  ;;  %v8956_v33 = vld [vmem:[%s8099_s30 + $0x368] sm:$0xff] }
 0x16e   : > { %v4622_v0 = vadd.f32 %v8913_v32, %v3733_v31  ;;  %v3736_v1 = vmax.f32 %v3734_v52, %v3735_v60  ;;  %v1445_v4 = vpop.permute.xlu0 %1444  ;;  %v2284_v24 = vsel %vm2224_vm0, %v8635_v40, %v1447_v63  ;;  %v901_v52 = vrot.slane %v8941_v8, 2 }
 0x16f   : > { %v4621_v6 = vadd.f32 %v8913_v32, %v3726_v57  ;;  %v3744_v7 = vrot.slane %v3743_v59, 2  ;;  %2008 = vrot.lane.b32.xlu1 %v899_v29, %s8045_s8  ;;  %1540 = vrot.lane.b32.xlu0 %v536_v54, %s8046_s9  ;;  %v2283_v14 = vsel %vm2224_vm0, %v8638_v49, %v1445_v4  ;;  %v8948_v54 = vld [vmem:[%s8099_s30 + $0x360] sm:$0xff] }
 0x170   : > { %v4750_v2 = vmax.f32 %v4622_v0, 0.0  ;;  %v3737_v19 = vrot.slane %v3736_v1, 2  ;;  %v7144_v48 = vpop.f32.mrb[4].mxu0  ;;  %v538_v16 = vrot.slane %v8948_v54, 1  ;;  %v539_v0 = vrot.slane %v8956_v33, 1 }
 0x171   : > { %v4749_v10 = vmax.f32 %v4621_v6, 0.0  ;;  %v3745_v13 = vmax.f32 %v3743_v59, %v3744_v7  ;;  %v3596_v18 = vsel %vm8867_vm4, %v7144_v48, -1e+30  ;;  %v2965_v22 = vpop.f32.mrb[5].mxu0  ;;  %v1959_v12 = vpop.permute.xlu1 %1958  ;;  %v923_v8 = vrot.slane %v8948_v54, 2 }
 0x172   : > { %v5012_v23 = vrot.slane %v4750_v2, 7  ;;  %v3738_v25 = vmax.f32 %v3736_v1, %v3737_v19  ;;  %v3755_v26 = vsel %vm3719_vm5, %v3596_v18, -inf  ;;  %v3595_v40 = vsel %vm8867_vm4, %v2965_v22, -1e+30  ;;  %v1957_v27 = vpop.permute.xlu0 %1956 }
 0x173   : > { %v3746_v28 = vrot.slane %v3745_v13, 1  ;;  %v3756_v49 = vrot.slane %v3755_v26, 4  ;;  %v3748_v21 = vsel %vm3719_vm5, %v3595_v40, -inf  ;;  %v2413_v29 = vsel %vm2353_vm1, %v2284_v24, %v1959_v12  ;;  %2010 = vrot.lane.b32.xlu1 %v900_v5, %s8045_s8  ;;  %1542 = vrot.lane.b32.xlu0 %v537_v41, %s8046_s9 }
 0x174   : > { %v5014_v34 = vsel %vm5013_vm6, %v5012_v23, %v4749_v10  ;;  %v3739_v51 = vrot.slane %v3738_v25, 1  ;;  %v3749_v35 = vrot.slane %v3748_v21, 4  ;;  %v2412_v38 = vsel %vm2353_vm1, %v2283_v14, %v1957_v27  ;;  %v8982_v23 = vld [vmem:[%s8099_s30 + $0x2c8] sm:$0xff] }
 0x175   : > { %v3747_v39 = vmax.f32 %v3745_v13, %v3746_v28  ;;  %v3757_v44 = vmax.f32 %v3755_v26, %v3756_v49  ;;  %7223 = vmatprep.mubr.msk.f32.mxu0 %vm2494_vm2, %v2412_v38  ;;  %v1451_v45 = vpop.permute.xlu1 %1450  ;;  %v924_v1 = vrot.slane %v8956_v33, 2  ;;  %v8987_v28 = vld [vmem:[%s8099_s30 + $0x2c0] sm:$0xff] }
 0x176   : > { %v3740_v53 = vmax.f32 %v3738_v25, %v3739_v51  ;;  %v3750_v43 = vmax.f32 %v3748_v21, %v3749_v35  ;;  %7224 = vmatmul.mubr.msk.f32.gmra.mrb[58].mxu0 %vm2494_vm2, %v2413_v29  ;;  %v1449_v42 = vpop.permute.xlu0 %1448  ;;  %v2286_v5 = vsel %vm2224_vm0, %v8657_v50, %v1451_v45  ;;  %v903_v36 = vrot.slane %v8987_v28, 2 }
 0x177   : > { %v4624_v31 = vadd.f32 %v8913_v32, %v3747_v39  ;;  %v3758_v60 = vrot.slane %v3757_v44, 2  ;;  %2054 = vrot.lane.b32.xlu1 %v922_v11, %s8045_s8  ;;  %2052 = vrot.lane.b32.xlu0 %v921_v37, %s8045_s8  ;;  %v2285_v6 = vsel %vm2224_vm0, %v8660_v55, %v1449_v42 }
 0x178   : > { %v4623_v57 = vadd.f32 %v8913_v32, %v3740_v53  ;;  %v3751_v59 = vrot.slane %v3750_v43, 2  ;;  %v7147_v63 = vpop.f32.mrb[6].mxu0  ;;  %v518_v53 = vrot.slane %v8987_v28, 1 }
 0x179   : > { %v3759_v4 = vmax.f32 %v3757_v44, %v3758_v60  ;;  %v3598_v7 = vsel %vm8867_vm4, %v7147_v63, -1e+30  ;;  %v2975_v41 = vpop.f32.mrb[7].mxu0  ;;  %v1963_v11 = vpop.permute.xlu1 %1962  ;;  %v4752_v10 = vmax.f32 %v4624_v31, 0.0  ;;  %v519_v44 = vrot.slane %v8982_v23, 1 }
 0x17a   : > { %v4751_v2 = vmax.f32 %v4623_v57, 0.0  ;;  %v3752_v19 = vmax.f32 %v3750_v43, %v3751_v59  ;;  %v3769_v24 = vsel %vm3719_vm5, %v3598_v7, -inf  ;;  %v3597_v48 = vsel %vm8867_vm4, %v2975_v41, -1e+30  ;;  %v1961_v37 = vpop.permute.xlu0 %1960  ;;  %v9013_v41 = vld [vmem:[%s8099_s30 + $0x370] sm:$0xff] }
 0x17b   : > { %v3760_v13 = vrot.slane %v3759_v4, 1  ;;  %v3770_v50 = vrot.slane %v3769_v24, 4  ;;  %v3762_v55 = vsel %vm3719_vm5, %v3597_v48, -inf  ;;  %1502 = vrot.lane.b32.xlu1 %v517_v46, %s8046_s9  ;;  %1500 = vrot.lane.b32.xlu0 %v516_v47, %s8046_s9  ;;  %v2415_v12 = vsel %vm2353_vm1, %v2286_v5, %v1963_v11 }
 0x17c   : > { %v5015_v14 = vrot.slane %v4751_v2, 6  ;;  %v3753_v18 = vrot.slane %v3752_v19, 1  ;;  %v3763_v22 = vrot.slane %v3762_v55, 4  ;;  %v2414_v40 = vsel %vm2353_vm1, %v2285_v6, %v1961_v37 }
 0x17d   : > { %v3761_v25 = vmax.f32 %v3759_v4, %v3760_v13  ;;  %v3771_v26 = vmax.f32 %v3769_v24, %v3770_v50  ;;  %v1455_v27 = vpop.permute.xlu1 %1454  ;;  %7226 = vmatprep.mubr.msk.f32.mxu0 %vm2494_vm2, %v2414_v40  ;;  %v5018_v35 = vrot.slane %v4752_v10, 5 }
 0x17e   : > { %v5017_v49 = vsel %vm5016_vm7, %v5015_v14, %v5014_v34  ;;  %v3754_v21 = vmax.f32 %v3752_v19, %v3753_v18  ;;  %v3764_v29 = vmax.f32 %v3762_v55, %v3763_v22  ;;  %v1453_v51 = vpop.permute.xlu0 %1452  ;;  %7227 = vmatmul.mubr.msk.f32.gmra.mrb[60].mxu0 %vm2494_vm2, %v2415_v12  ;;  %v2288_v34 = vsel %vm2224_vm0, %v8679_v58, %v1455_v27 }
 0x17f   : > { %v4626_v38 = vadd.f32 %v8913_v32, %v3761_v25  ;;  %v3772_v39 = vrot.slane %v3771_v26, 2  ;;  %2012 = vrot.lane.b32.xlu1 %v901_v52, %s8045_s8  ;;  %1544 = vrot.lane.b32.xlu0 %v538_v16, %s8046_s9  ;;  %v2287_v42 = vsel %vm2224_vm0, %v8682_v61, %v1453_v51  ;;  %v5020_v57 = vsel %vm5019_vm8, %v5018_v35, %v5017_v49 }
 0x180   : > { %v4625_v45 = vadd.f32 %v8913_v32, %v3754_v21  ;;  %v3765_v46 = vrot.slane %v3764_v29, 2  ;;  %v7150_v47 = vpop.f32.mrb[8].mxu0  ;;  %v540_v14 = vrot.slane %v9013_v41, 1 }
 0x181   : > { %v3773_v43 = vmax.f32 %v3771_v26, %v3772_v39  ;;  %v3600_v52 = vsel %vm8867_vm4, %v7150_v47, -1e+30  ;;  %v2985_v31 = vpop.f32.mrb[9].mxu0  ;;  %v1967_v60 = vpop.permute.xlu1 %1966  ;;  %v4754_v5 = vmax.f32 %v4626_v38, 0.0 }
 0x182   : > { %v4753_v59 = vmax.f32 %v4625_v45, 0.0  ;;  %v3766_v63 = vmax.f32 %v3764_v29, %v3765_v46  ;;  %v3783_v58 = vsel %vm3719_vm5, %v3600_v52, -inf  ;;  %v3599_v16 = vsel %vm8867_vm4, %v2985_v31, -1e+30  ;;  %v1965_v4 = vpop.permute.xlu0 %1964  ;;  %v9044_v46 = vld [vmem:[%s8099_s30 + $0x378] sm:$0xff] }
 0x183   : > { %v3774_v6 = vrot.slane %v3773_v43, 1  ;;  %v3784_v7 = vrot.slane %v3783_v58, 4  ;;  %v3776_v61 = vsel %vm3719_vm5, %v3599_v16, -inf  ;;  %2014 = vrot.lane.b32.xlu1 %v902_v56, %s8045_s8  ;;  %v2417_v24 = vsel %vm2353_vm1, %v2288_v34, %v1967_v60  ;;  %1546 = vrot.lane.b32.xlu0 %v539_v0, %s8046_s9 }
 0x184   : > { %v5021_v11 = vrot.slane %v4753_v59, 4  ;;  %v3767_v2 = vrot.slane %v3766_v63, 1  ;;  %v3777_v19 = vrot.slane %v3776_v61, 4  ;;  %v2416_v10 = vsel %vm2353_vm1, %v2287_v42, %v1965_v4 }
 0x185   : > { %v3775_v48 = vmax.f32 %v3773_v43, %v3774_v6  ;;  %v3785_v37 = vmax.f32 %v3783_v58, %v3784_v7  ;;  %v1459_v13 = vpop.permute.xlu1 %1458  ;;  %7229 = vmatprep.mubr.msk.f32.mxu0 %vm2494_vm2, %v2416_v10  ;;  %v5024_v18 = vrot.slane %v4754_v5, 3  ;;  %v541_v58 = vrot.slane %v9044_v46, 1 }
 0x186   : > { %v3768_v56 = vmax.f32 %v3766_v63, %v3767_v2  ;;  %v3778_v50 = vmax.f32 %v3776_v61, %v3777_v19  ;;  %v1457_v55 = vpop.permute.xlu0 %1456  ;;  %7230 = vmatmul.mubr.msk.f32.gmra.mrb[62].mxu0 %vm2494_vm2, %v2417_v24  ;;  %v5023_v0 = vsel %vm5022_vm9, %v5021_v11, %v5020_v57  ;;  %v2290_v40 = vsel %vm2224_vm0, %v8701_v15, %v1459_v13 }
 0x187   : > { %v4628_v22 = vadd.f32 %v8913_v32, %v3775_v48  ;;  %v3786_v12 = vrot.slane %v3785_v37, 2  ;;  %2058 = vrot.lane.b32.xlu1 %v924_v1, %s8045_s8  ;;  %v2289_v27 = vsel %vm2224_vm0, %v8704_v3, %v1457_v55  ;;  %2056 = vrot.lane.b32.xlu0 %v923_v8, %s8045_s8  ;;  %v5026_v35 = vsel %vm5025_vm10, %v5024_v18, %v5023_v0  ;;  %v9081_v0 = vld [vmem:[%s8099_s30 + $0x2d8] sm:$0xff] }
 0x188   : > { %v4627_v25 = vadd.f32 %v8913_v32, %v3768_v56  ;;  %v3779_v26 = vrot.slane %v3778_v50, 2  ;;  %v7153_v49 = vpop.f32.mrb[10].mxu0  ;;  %v904_v63 = vrot.slane %v8982_v23, 2  ;;  %v926_v5 = vrot.slane %v9044_v46, 2 }
 0x189   : > { %v3787_v21 = vmax.f32 %v3785_v37, %v3786_v12  ;;  %v3602_v33 = vsel %vm8867_vm4, %v7153_v49, -1e+30  ;;  %v2995_v1 = vpop.f32.mrb[11].mxu0  ;;  %v1971_v29 = vpop.permute.xlu1 %1970  ;;  %v4756_v51 = vmax.f32 %v4628_v22, 0.0  ;;  %v925_v7 = vrot.slane %v9013_v41, 2  ;;  %v264_v49 = vld [vmem:[%s8099_s30 + $0x2d0] sm:$0xff] }
 0x18a   : > { %v4755_v38 = vmax.f32 %v4627_v25, 0.0  ;;  %v3780_v39 = vmax.f32 %v3778_v50, %v3779_v26  ;;  %v3797_v15 = vsel %vm3719_vm5, %v3602_v33, -inf  ;;  %v3601_v3 = vsel %vm8867_vm4, %v2995_v1, -1e+30  ;;  %v1969_v45 = vpop.permute.xlu0 %1968 }
 0x18b   : > { %v3788_v54 = vrot.slane %v3787_v21, 1  ;;  %v3798_v8 = vrot.slane %v3797_v15, 4  ;;  %v3790_v34 = vsel %vm3719_vm5, %v3601_v3, -inf  ;;  %v2419_v47 = vsel %vm2353_vm1, %v2290_v40, %v1971_v29  ;;  %1506 = vrot.lane.b32.xlu1 %v519_v44, %s8046_s9  ;;  %1504 = vrot.lane.b32.xlu0 %v518_v53, %s8046_s9 }
 0x18c   : > { %v5027_v43 = vrot.slane %v4755_v38, 2  ;;  %v3781_v42 = vrot.slane %v3780_v39, 1  ;;  %v3791_v52 = vrot.slane %v3790_v34, 4  ;;  %v2418_v31 = vsel %vm2353_vm1, %v2289_v27, %v1969_v45 }
 0x18d   : > { %v3789_v60 = vmax.f32 %v3787_v21, %v3788_v54  ;;  %v3799_v57 = vmax.f32 %v3797_v15, %v3798_v8  ;;  %7232 = vmatprep.mubr.msk.f32.mxu0 %vm2494_vm2, %v2418_v31  ;;  %v1463_v59 = vpop.permute.xlu1 %1462  ;;  %v5030_v61 = vrot.slane %v4756_v51, 1  ;;  %v9090_v51 = vld [vmem:[%s8099_s30 + $0x380] sm:$0xff]  ;;  %v521_v15 = vrot.slane %v9081_v0, 1 }
 0x18e   : > { %v3782_v16 = vmax.f32 %v3780_v39, %v3781_v42  ;;  %v3792_v44 = vmax.f32 %v3790_v34, %v3791_v52  ;;  %7233 = vmatmul.mubr.msk.f32.gmra.mrb[64].mxu0 %vm2494_vm2, %v2419_v47  ;;  %v1461_v4 = vpop.permute.xlu0 %1460  ;;  %v5029_v6 = vsel %vm5028_vm11, %v5027_v43, %v5026_v35  ;;  %v2292_v2 = vsel %vm2224_vm0, %v8723_v20, %v1463_v59 }
 0x18f   : > { %v4630_v28 = vadd.f32 %v8913_v32, %v3789_v60  ;;  %v3800_v53 = vrot.slane %v3799_v57, 2  ;;  %2016 = vrot.lane.b32.xlu1 %v903_v36, %s8045_s8  ;;  %v2291_v19 = vsel %vm2224_vm0, %v8726_v9, %v1461_v4  ;;  %1548 = vrot.lane.b32.xlu0 %v540_v14, %s8046_s9  ;;  %v9073_v36 = vsel %vm5031_vm12, %v5030_v61, %v5029_v6 }
 0x190   : > { %v4629_v23 = vadd.f32 %v8913_v32, %v3782_v16  ;;  %v3793_v11 = vrot.slane %v3792_v44, 2  ;;  %v7156_v24 = vpop.f32.mrb[12].mxu0  ;;  %v520_v46 = vrot.slane %v264_v49, 1  ;;  %v905_v54 = vrot.slane %v264_v49, 2 }
 0x191   : > { %v4758_v48 = vmax.f32 %v4630_v28, 0.0  ;;  %v3801_v37 = vmax.f32 %v3799_v57, %v3800_v53  ;;  %v3604_v10 = vsel %vm8867_vm4, %v7156_v24, -1e+30  ;;  %v3005_v41 = vpop.f32.mrb[13].mxu0  ;;  %v1975_v13 = vpop.permute.xlu1 %1974  ;;  %v542_v43 = vrot.slane %v9090_v51, 1 }
 0x192   : > { %v4757_v56 = vmax.f32 %v4629_v23, 0.0  ;;  %v3794_v20 = vmax.f32 %v3792_v44, %v3793_v11  ;;  %v3811_v50 = vsel %vm3719_vm5, %v3604_v10, -inf  ;;  %v3603_v9 = vsel %vm8867_vm4, %v3005_v41, -1e+30  ;;  %v1973_v55 = vpop.permute.xlu0 %1972  ;;  %v9118_v10 = vld [vmem:[%s8099_s30 + $0x2e8] sm:$0xff] }
 0x193   : > { %v5033_v14 = vrot.slane %v4758_v48, 7  ;;  %v3802_v18 = vrot.slane %v3801_v37, 1  ;;  %v3812_v22 = vrot.slane %v3811_v50, 4  ;;  %v3804_v12 = vsel %vm3719_vm5, %v3603_v9, -inf  ;;  %2018 = vrot.lane.b32.xlu1 %v904_v63, %s8045_s8  ;;  %1550 = vrot.lane.b32.xlu0 %v541_v58, %s8046_s9 }
 0x194   : > { %v3795_v25 = vrot.slane %v3794_v20, 1  ;;  %v3805_v26 = vrot.slane %v3804_v12, 4  ;;  %v2421_v40 = vsel %vm2353_vm1, %v2292_v2, %v1975_v13  ;;  %v2420_v27 = vsel %vm2353_vm1, %v2291_v19, %v1973_v55 }
 0x195   : > { %v5034_v21 = vsel %vm5013_vm6, %v5033_v14, %v4757_v56  ;;  %v3803_v33 = vmax.f32 %v3801_v37, %v3802_v18  ;;  %v3813_v1 = vmax.f32 %v3811_v50, %v3812_v22  ;;  %7235 = vmatprep.mubr.msk.f32.mxu0 %vm2494_vm2, %v2420_v27  ;;  %v1467_v29 = vpop.permute.xlu1 %1466  ;;  %v906_v42 = vrot.slane %v9081_v0, 2 }
 0x196   : > { %v3796_v35 = vmax.f32 %v3794_v20, %v3795_v25  ;;  %v3806_v38 = vmax.f32 %v3804_v12, %v3805_v26  ;;  %7236 = vmatmul.mubr.msk.f32.gmra.mrb[66].mxu0 %vm2494_vm2, %v2421_v40  ;;  %v1465_v39 = vpop.permute.xlu0 %1464  ;;  %v2294_v60 = vsel %vm2224_vm0, %v8745_v30, %v1467_v29  ;;  %v927_v26 = vrot.slane %v9090_v51, 2 }
 0x197   : > { %v4632_v3 = vadd.f32 %v8913_v32, %v3803_v33  ;;  %v3814_v45 = vrot.slane %v3813_v1, 2  ;;  %2062 = vrot.lane.b32.xlu1 %v926_v5, %s8045_s8  ;;  %2060 = vrot.lane.b32.xlu0 %v925_v7, %s8045_s8  ;;  %v2293_v28 = vsel %vm2224_vm0, %v8748_v17, %v1465_v39  ;;  %v9112_v7 = vld [vmem:[%s8099_s30 + $0x388] sm:$0xff]  ;;  %v523_v40 = vrot.slane %v9118_v10, 1 }
 0x198   : > { %v4631_v8 = vadd.f32 %v8913_v32, %v3796_v35  ;;  %v3807_v34 = vrot.slane %v3806_v38, 2  ;;  %v7159_v47 = vpop.f32.mrb[14].mxu0  ;;  %v543_v50 = vrot.slane %v9112_v7, 1  ;;  %v928_v18 = vrot.slane %v9112_v7, 2 }
 0x199   : > { %v4760_v52 = vmax.f32 %v4632_v3, 0.0  ;;  %v3815_v31 = vmax.f32 %v3813_v1, %v3814_v45  ;;  %v3606_v57 = vsel %vm8867_vm4, %v7159_v47, -1e+30  ;;  %v3015_v59 = vpop.f32.mrb[15].mxu0  ;;  %v1979_v63 = vpop.permute.xlu1 %1978  ;;  %v9146_v47 = vld [vmem:[%s8099_s30 + $0x2e0] sm:$0xff] }
 0x19a   : > { %v4759_v58 = vmax.f32 %v4631_v8, 0.0  ;;  %v3808_v16 = vmax.f32 %v3806_v38, %v3807_v34  ;;  %v3825_v44 = vsel %vm3719_vm5, %v3606_v57, -inf  ;;  %v3605_v4 = vsel %vm8867_vm4, %v3015_v59, -1e+30  ;;  %v1977_v5 = vpop.permute.xlu0 %1976 }
 0x19b   : > { %v3816_v6 = vrot.slane %v3815_v31, 1  ;;  %v3826_v53 = vrot.slane %v3825_v44, 4  ;;  %v3818_v30 = vsel %vm3719_vm5, %v3605_v4, -inf  ;;  %1510 = vrot.lane.b32.xlu1 %v521_v15, %s8046_s9  ;;  %v2423_v2 = vsel %vm2353_vm1, %v2294_v60, %v1979_v63  ;;  %1508 = vrot.lane.b32.xlu0 %v520_v46, %s8046_s9  ;;  %v7976_v46 = vld [vmem:[%s8099_s30 + $0x230] sm:$0xff] }
 0x19c   : > { %v5035_v61 = vrot.slane %v4759_v58, 6  ;;  %v3809_v23 = vrot.slane %v3808_v16, 1  ;;  %v3819_v11 = vrot.slane %v3818_v30, 4  ;;  %v5037_v19 = vrot.slane %v4760_v52, 5 }
 0x19d   : > { %v3817_v24 = vmax.f32 %v3815_v31, %v3816_v6  ;;  %v3827_v48 = vmax.f32 %v3825_v44, %v3826_v53  ;;  %v2422_v37 = vsel %vm2353_vm1, %v2293_v28, %v1977_v5  ;;  %v1471_v17 = vpop.permute.xlu1 %1470  ;;  %v9152_v44 = vld [vmem:[%s8099_s30 + $0x390] sm:$0xff]  ;;  %v522_v6 = vrot.slane %v9146_v47, 1 }
 0x19e   : > { %v5036_v41 = vsel %vm5016_vm7, %v5035_v61, %v5034_v21  ;;  %v3810_v13 = vmax.f32 %v3808_v16, %v3809_v23  ;;  %v3820_v56 = vmax.f32 %v3818_v30, %v3819_v11  ;;  %7238 = vmatprep.mubr.msk.f32.mxu0 %vm2494_vm2, %v2422_v37  ;;  %v1469_v20 = vpop.permute.xlu0 %1468  ;;  %v7975_v21 = vld [vmem:[%s8099_s30 + $0x238] sm:$0xff]  ;;  %v907_v30 = vrot.slane %v9146_v47, 2  ;;  %v7977_v37 = vld [vmem:[%s8099_s30 + $0x248] sm:$0xff] }
 0x19f   : > { %v4634_v9 = vadd.f32 %v8913_v32, %v3817_v24  ;;  %v5038_v55 = vsel %vm5019_vm8, %v5037_v19, %v5036_v41  ;;  %v3828_v14 = vrot.slane %v3827_v48, 2  ;;  %7239 = vmatmul.mubr.msk.f32.gmra.mrb[68].mxu0 %vm2494_vm2, %v2423_v2  ;;  %2020 = vrot.lane.b32.xlu1 %v905_v54, %s8045_s8  ;;  %v2296_v33 = vsel %vm2224_vm0, %v7975_v21, %v1471_v17 }
 0x1a0   : > { %v4633_v22 = vadd.f32 %v8913_v32, %v3810_v13  ;;  %v3821_v12 = vrot.slane %v3820_v56, 2  ;;  %v7162_v25 = vpop.f32.mrb[16].mxu0  ;;  %1552 = vrot.lane.b32.xlu0 %v542_v43, %s8046_s9  ;;  %v2295_v54 = vsel %vm2224_vm0, %v7976_v46, %v1469_v20  ;;  %v544_v2 = vrot.slane %v9152_v44, 1 }
 0x1a1   : > { %v4762_v27 = vmax.f32 %v4634_v9, 0.0  ;;  %v3829_v49 = vmax.f32 %v3827_v48, %v3828_v14  ;;  %v3608_v1 = vsel %vm8867_vm4, %v7162_v25, -1e+30  ;;  %v3025_v29 = vpop.f32.mrb[17].mxu0  ;;  %v1983_v35 = vpop.permute.xlu1 %1982  ;;  %v908_v19 = vrot.slane %v9118_v10, 2  ;;  %v9221_v10 = vld [vmem:[%s8099_s30 + $0x3a0] sm:$0xff] }
 0x1a2   : > { %v4761_v38 = vmax.f32 %v4633_v22, 0.0  ;;  %v3822_v39 = vmax.f32 %v3820_v56, %v3821_v12  ;;  %v3839_v15 = vsel %vm3719_vm5, %v3608_v1, -inf  ;;  %v3607_v51 = vsel %vm8867_vm4, %v3025_v29, -1e+30  ;;  %v1981_v3 = vpop.permute.xlu0 %1980  ;;  %v7978_v22 = vld [vmem:[%s8099_s30 + $0x240] sm:$0xff] }
 0x1a3   : > { %v3830_v45 = vrot.slane %v3829_v49, 1  ;;  %v3840_v8 = vrot.slane %v3839_v15, 4  ;;  %v3832_v34 = vsel %vm3719_vm5, %v3607_v51, -inf  ;;  %2022 = vrot.lane.b32.xlu1 %v906_v42, %s8045_s8  ;;  %v2425_v60 = vsel %vm2353_vm1, %v2296_v33, %v1983_v35 }
 0x1a4   : > { %v5039_v43 = vrot.slane %v4761_v38, 4  ;;  %v3823_v52 = vrot.slane %v3822_v39, 1  ;;  %v3833_v31 = vrot.slane %v3832_v34, 4  ;;  %1554 = vrot.lane.b32.xlu0 %v543_v50, %s8046_s9  ;;  %v5041_v57 = vrot.slane %v4762_v27, 3  ;;  %v9180_v27 = vld [vmem:[%s8099_s30 + $0x398] sm:$0xff] }
 0x1a5   : > { %v3831_v59 = vmax.f32 %v3829_v49, %v3830_v45  ;;  %v3841_v63 = vmax.f32 %v3839_v15, %v3840_v8  ;;  %v2424_v58 = vsel %vm2353_vm1, %v2295_v54, %v1981_v3  ;;  %v1475_v16 = vpop.permute.xlu1 %1474  ;;  %v545_v45 = vrot.slane %v9180_v27, 1 }
 0x1a6   : > { %v5040_v0 = vsel %vm5022_vm9, %v5039_v43, %v5038_v55  ;;  %v3824_v42 = vmax.f32 %v3822_v39, %v3823_v52  ;;  %v3834_v4 = vmax.f32 %v3832_v34, %v3833_v31  ;;  %7241 = vmatprep.mubr.msk.f32.mxu0 %vm2494_vm2, %v2424_v58  ;;  %v1473_v5 = vpop.permute.xlu0 %1472  ;;  %v2298_v17 = vsel %vm2224_vm0, %v7977_v37, %v1475_v16  ;;  %v7979_v31 = vld [vmem:[%s8099_s30 + $0x258] sm:$0xff]  ;;  %v7980_v16 = vld [vmem:[%s8099_s30 + $0x250] sm:$0xff] }
 0x1a7   : > { %v4636_v28 = vadd.f32 %v8913_v32, %v3831_v59  ;;  %v3842_v53 = vrot.slane %v3841_v63, 2  ;;  %7242 = vmatmul.mubr.msk.f32.gmra.mrb[70].mxu0 %vm2494_vm2, %v2425_v60  ;;  %2066 = vrot.lane.b32.xlu1 %v928_v18, %s8045_s8  ;;  %v5042_v7 = vsel %vm5025_vm10, %v5041_v57, %v5040_v0  ;;  %v2297_v12 = vsel %vm2224_vm0, %v7978_v22, %v1473_v5 }
 0x1a8   : > { %v4635_v61 = vadd.f32 %v8913_v32, %v3824_v42  ;;  %v3835_v23 = vrot.slane %v3834_v4, 2  ;;  %v7165_v11 = vpop.f32.mrb[18].mxu0  ;;  %2064 = vrot.lane.b32.xlu0 %v927_v26, %s8045_s8  ;;  %v930_v34 = vrot.slane %v9180_v27, 2  ;;  %v929_v59 = vrot.slane %v9152_v44, 2 }
 0x1a9   : > { %v4764_v24 = vmax.f32 %v4636_v28, 0.0  ;;  %v3843_v48 = vmax.f32 %v3841_v63, %v3842_v53  ;;  %v3610_v41 = vsel %vm8867_vm4, %v7165_v11, -1e+30  ;;  %v3035_v13 = vpop.f32.mrb[19].mxu0  ;;  %v1987_v56 = vpop.permute.xlu1 %1986 }
 0x1aa   : > { %v4763_v20 = vmax.f32 %v4635_v61, 0.0  ;;  %v3836_v50 = vmax.f32 %v3834_v4, %v3835_v23  ;;  %v3853_v9 = vsel %vm3719_vm5, %v3610_v41, -inf  ;;  %v3609_v55 = vsel %vm8867_vm4, %v3035_v13, -1e+30  ;;  %v1985_v14 = vpop.permute.xlu0 %1984  ;;  %v268_v41 = vld [vmem:[%s8099_s30 + $0x2f0] sm:$0xff] }
 0x1ab   : > { %v3844_v18 = vrot.slane %v3843_v48, 1  ;;  %v3854_v25 = vrot.slane %v3853_v9, 4  ;;  %v3846_v26 = vsel %vm3719_vm5, %v3609_v55, -inf  ;;  %1514 = vrot.lane.b32.xlu1 %v523_v40, %s8046_s9  ;;  %v2427_v1 = vsel %vm2353_vm1, %v2298_v17, %v1987_v56 }
 0x1ac   : > { %v5043_v49 = vrot.slane %v4763_v20, 2  ;;  %v3837_v21 = vrot.slane %v3836_v50, 1  ;;  %v3847_v33 = vrot.slane %v3846_v26, 4  ;;  %1512 = vrot.lane.b32.xlu0 %v522_v6, %s8046_s9  ;;  %v5045_v29 = vrot.slane %v4764_v24, 1 }
 0x1ad   : > { %v3845_v35 = vmax.f32 %v3843_v48, %v3844_v18  ;;  %v3855_v38 = vmax.f32 %v3853_v9, %v3854_v25  ;;  %v2426_v39 = vsel %vm2353_vm1, %v2297_v12, %v1985_v14  ;;  %v1479_v15 = vpop.permute.xlu1 %1478  ;;  %v524_v12 = vrot.slane %v268_v41, 1 }
 0x1ae   : > { %v3838_v51 = vmax.f32 %v3836_v50, %v3837_v21  ;;  %v3848_v3 = vmax.f32 %v3846_v26, %v3847_v33  ;;  %7244 = vmatprep.mubr.msk.f32.mxu0 %vm2494_vm2, %v2426_v39  ;;  %v1477_v40 = vpop.permute.xlu0 %1476  ;;  %v5044_v46 = vsel %vm5028_vm11, %v5043_v49, %v5042_v7  ;;  %v2300_v60 = vsel %vm2224_vm0, %v7979_v31, %v1479_v15 }
 0x1af   : > { %v4638_v54 = vadd.f32 %v8913_v32, %v3845_v35  ;;  %v3856_v8 = vrot.slane %v3855_v38, 2  ;;  %7245 = vmatmul.mubr.msk.f32.gmra.mrb[72].mxu0 %vm2494_vm2, %v2427_v1  ;;  %2024 = vrot.lane.b32.xlu1 %v907_v30, %s8045_s8  ;;  %v9193_v47 = vsel %vm5031_vm12, %v5045_v29, %v5044_v46  ;;  %v2299_v0 = vsel %vm2224_vm0, %v7980_v16, %v1477_v40  ;;  %v7981_v35 = vld [vmem:[%s8099_s30 + $0x268] sm:$0xff] }
 0x1b0   : > { %v4637_v43 = vadd.f32 %v8913_v32, %v3838_v51  ;;  %v3849_v52 = vrot.slane %v3848_v3, 2  ;;  %v7168_v57 = vpop.f32.mrb[20].mxu0  ;;  %1556 = vrot.lane.b32.xlu0 %v544_v2, %s8046_s9  ;;  %v9212_v2 = vld [vmem:[%s8099_s30 + $0x2f8] sm:$0xff]  ;;  %v909_v25 = vrot.slane %v268_v41, 2  ;;  %v546_v21 = vrot.slane %v9221_v10, 1 }
 0x1b1   : > { %v4766_v63 = vmax.f32 %v4638_v54, 0.0  ;;  %v3857_v58 = vmax.f32 %v3855_v38, %v3856_v8  ;;  %v3612_v42 = vsel %vm8867_vm4, %v7168_v57, -1e+30  ;;  %v3045_v4 = vpop.f32.mrb[21].mxu0  ;;  %v1991_v5 = vpop.permute.xlu1 %1990  ;;  %v525_v14 = vrot.slane %v9212_v2, 1 }
 0x1b2   : > { %v4765_v6 = vmax.f32 %v4637_v43, 0.0  ;;  %v3850_v28 = vmax.f32 %v3848_v3, %v3849_v52  ;;  %v3867_v53 = vsel %vm3719_vm5, %v3612_v42, -inf  ;;  %v3611_v30 = vsel %vm8867_vm4, %v3045_v4, -1e+30  ;;  %v1989_v44 = vpop.permute.xlu0 %1988 }
 0x1b3   : > { %v5047_v7 = vrot.slane %v4766_v63, 7  ;;  %v3858_v61 = vrot.slane %v3857_v58, 1  ;;  %v3868_v23 = vrot.slane %v3867_v53, 4  ;;  %v3860_v11 = vsel %vm3719_vm5, %v3611_v30, -inf  ;;  %2026 = vrot.lane.b32.xlu1 %v908_v19, %s8045_s8 }
 0x1b4   : > { %v3851_v24 = vrot.slane %v3850_v28, 1  ;;  %v3861_v48 = vrot.slane %v3860_v11, 4  ;;  %v2429_v37 = vsel %vm2353_vm1, %v2300_v60, %v1991_v5  ;;  %v2428_v17 = vsel %vm2353_vm1, %v2299_v0, %v1989_v44  ;;  %1558 = vrot.lane.b32.xlu0 %v545_v45, %s8046_s9  ;;  %v9243_v60 = vld [vmem:[%s8099_s30 + $0x3a8] sm:$0xff] }
 0x1b5   : > { %v5048_v13 = vsel %vm5013_vm6, %v5047_v7, %v4765_v6  ;;  %v3859_v56 = vmax.f32 %v3857_v58, %v3858_v61  ;;  %v3869_v20 = vmax.f32 %v3867_v53, %v3868_v23  ;;  %7247 = vmatprep.mubr.msk.f32.mxu0 %vm2494_vm2, %v2428_v17  ;;  %v1483_v50 = vpop.permute.xlu1 %1482  ;;  %v910_v33 = vrot.slane %v9212_v2, 2  ;;  %v9249_v6 = vld [vmem:[%s8099_s30 + $0x308] sm:$0xff] }
 0x1b6   : > { %v3852_v19 = vmax.f32 %v3850_v28, %v3851_v24  ;;  %v3862_v9 = vmax.f32 %v3860_v11, %v3861_v48  ;;  %7248 = vmatmul.mubr.msk.f32.gmra.mrb[74].mxu0 %vm2494_vm2, %v2429_v37  ;;  %v1481_v55 = vpop.permute.xlu0 %1480  ;;  %v2302_v38 = vsel %vm2224_vm0, %v7981_v35, %v1483_v50  ;;  %v547_v7 = vrot.slane %v9243_v60, 1  ;;  %v7983_v50 = vld [vmem:[%s8099_s30 + $0x278] sm:$0xff] }
 0x1b7   : > { %v4640_v18 = vadd.f32 %v8913_v32, %v3859_v56  ;;  %v3870_v22 = vrot.slane %v3869_v20, 2  ;;  %2070 = vrot.lane.b32.xlu1 %v930_v34, %s8045_s8  ;;  %v7982_v34 = vld [vmem:[%s8099_s30 + $0x260] sm:$0xff]  ;;  %v932_v11 = vrot.slane %v9243_v60, 2  ;;  %v931_v41 = vrot.slane %v9221_v10, 2 }
 0x1b8   : > { %v4639_v26 = vadd.f32 %v8913_v32, %v3852_v19  ;;  %v3863_v27 = vrot.slane %v3862_v9, 2  ;;  %v7171_v49 = vpop.f32.mrb[22].mxu0  ;;  %2068 = vrot.lane.b32.xlu0 %v929_v59, %s8045_s8  ;;  %v2301_v43 = vsel %vm2224_vm0, %v7982_v34, %v1481_v55 }
 0x1b9   : > { %v4768_v1 = vmax.f32 %v4640_v18, 0.0  ;;  %v3871_v29 = vmax.f32 %v3869_v20, %v3870_v22  ;;  %v3614_v39 = vsel %vm8867_vm4, %v7171_v49, -1e+30  ;;  %v3055_v15 = vpop.f32.mrb[23].mxu0  ;;  %v1995_v51 = vpop.permute.xlu1 %1994 }
 0x1ba   : > { %v4767_v3 = vmax.f32 %v4639_v26, 0.0  ;;  %v3864_v40 = vmax.f32 %v3862_v9, %v3863_v27  ;;  %v3881_v45 = vsel %vm3719_vm5, %v3614_v39, -inf  ;;  %v3613_v46 = vsel %vm8867_vm4, %v3055_v15, -1e+30  ;;  %v1993_v54 = vpop.permute.xlu0 %1992  ;;  %v7984_v26 = vld [vmem:[%s8099_s30 + $0x270] sm:$0xff] }
 0x1bb   : > { %v3872_v8 = vrot.slane %v3871_v29, 1  ;;  %v3882_v52 = vrot.slane %v3881_v45, 4  ;;  %v3874_v31 = vsel %vm3719_vm5, %v3613_v46, -inf  ;;  %1518 = vrot.lane.b32.xlu1 %v525_v14, %s8046_s9  ;;  %v2431_v58 = vsel %vm2353_vm1, %v2302_v38, %v1995_v51  ;;  %v9283_v46 = vld [vmem:[%s8099_s30 + $0x3b0] sm:$0xff] }
 0x1bc   : > { %v5049_v57 = vrot.slane %v4767_v3, 6  ;;  %v3865_v59 = vrot.slane %v3864_v40, 1  ;;  %v3875_v63 = vrot.slane %v3874_v31, 4  ;;  %1516 = vrot.lane.b32.xlu0 %v524_v12, %s8046_s9  ;;  %v5051_v16 = vrot.slane %v4768_v1, 5  ;;  %v9277_v1 = vld [vmem:[%s8099_s30 + $0x300] sm:$0xff] }
 0x1bd   : > { %v3873_v0 = vmax.f32 %v3871_v29, %v3872_v8  ;;  %v3883_v42 = vmax.f32 %v3881_v45, %v3882_v52  ;;  %v2430_v4 = vsel %vm2353_vm1, %v2301_v43, %v1993_v54  ;;  %v1487_v5 = vpop.permute.xlu1 %1486  ;;  %v526_v8 = vrot.slane %v9277_v1, 1  ;;  %v9291_v43 = vld [vmem:[%s10679_s2] ss:$0 sm:$0xff] }
 0x1be   : > { %v5050_v28 = vsel %vm5016_vm7, %v5049_v57, %v5048_v13  ;;  %v3866_v53 = vmax.f32 %v3864_v40, %v3865_v59  ;;  %v3876_v30 = vmax.f32 %v3874_v31, %v3875_v63  ;;  %7250 = vmatprep.mubr.msk.f32.mxu0 %vm2494_vm2, %v2430_v4  ;;  %v1485_v44 = vpop.permute.xlu0 %1484  ;;  %v527_v13 = vrot.slane %v9249_v6, 1 }
 0x1bf   : > { %v4642_v61 = vadd.f32 %v8913_v32, %v3873_v0  ;;  %v3884_v23 = vrot.slane %v3883_v42, 2  ;;  %7251 = vmatmul.mubr.msk.f32.gmra.mrb[76].mxu0 %vm2494_vm2, %v2431_v58  ;;  %2028 = vrot.lane.b32.xlu1 %v909_v25, %s8045_s8  ;;  %v5052_v24 = vsel %vm5019_vm8, %v5051_v16, %v5050_v28  ;;  %v2304_v19 = vsel %vm2224_vm0, %v7983_v50, %v1487_v5  ;;  %v7986_v58 = vld [vmem:[%s8099_s30 + $0x288] sm:$0xff]  ;;  %v7987_v5 = vld [vmem:[%s8099_s30 + $0x280] sm:$0xff] }
 0x1c0   : > { %v4641_v48 = vadd.f32 %v8913_v32, %v3866_v53  ;;  %v3877_v37 = vrot.slane %v3876_v30, 2  ;;  %v7174_v17 = vpop.f32.mrb[24].mxu0  ;;  %1560 = vrot.lane.b32.xlu0 %v546_v21, %s8046_s9  ;;  %v2303_v27 = vsel %vm2224_vm0, %v7984_v26, %v1485_v44  ;;  %v911_v60 = vrot.slane %v9277_v1, 2 }
 0x1c1   : > { %v4770_v56 = vmax.f32 %v4642_v61, 0.0  ;;  %v3885_v20 = vmax.f32 %v3883_v42, %v3884_v23  ;;  %v3616_v9 = vsel %vm8867_vm4, %v7174_v17, -1e+30  ;;  %v3065_v55 = vpop.f32.mrb[25].mxu0  ;;  %v1999_v32 = vpop.permute.xlu1 %1998  ;;  %v548_v42 = vrot.slane %v9283_v46, 1 }
 0x1c2   : > { %v4769_v14 = vmax.f32 %v4641_v48, 0.0  ;;  %v3878_v18 = vmax.f32 %v3876_v30, %v3877_v37  ;;  %v3895_v22 = vsel %vm3719_vm5, %v3616_v9, -inf  ;;  %v3615_v10 = vsel %vm8867_vm4, %v3065_v55, -1e+30  ;;  %v1997_v12 = vpop.permute.xlu0 %1996 }
 0x1c3   : > { %v3886_v25 = vrot.slane %v3885_v20, 1  ;;  %v3896_v49 = vrot.slane %v3895_v22, 4  ;;  %v3888_v21 = vsel %vm3719_vm5, %v3615_v10, -inf  ;;  %2030 = vrot.lane.b32.xlu1 %v910_v33, %s8045_s8  ;;  %v2433_v39 = vsel %vm2353_vm1, %v2304_v19, %v1999_v32 }
 0x1c4   : > { %v5053_v29 = vrot.slane %v4769_v14, 4  ;;  %v3879_v35 = vrot.slane %v3878_v18, 1  ;;  %v3889_v38 = vrot.slane %v3888_v21, 4  ;;  %1562 = vrot.lane.b32.xlu0 %v547_v7, %s8046_s9  ;;  %v5055_v15 = vrot.slane %v4770_v56, 3 }
 0x1c5   : > { %v3887_v51 = vmax.f32 %v3885_v20, %v3886_v25  ;;  %v3897_v3 = vmax.f32 %v3895_v22, %v3896_v49  ;;  %v2432_v40 = vsel %vm2353_vm1, %v2303_v27, %v1997_v12  ;;  %v1491_v45 = vpop.permute.xlu1 %1490  ;;  %v912_v49 = vrot.slane %v9249_v6, 2 }
 0x1c6   : > { %v3880_v2 = vmax.f32 %v3878_v18, %v3879_v35  ;;  %v3890_v33 = vmax.f32 %v3888_v21, %v3889_v38  ;;  %7253 = vmatprep.mubr.msk.f32.mxu0 %vm2494_vm2, %v2432_v40  ;;  %v1489_v54 = vpop.permute.xlu0 %1488  ;;  %v5054_v34 = vsel %vm5022_vm9, %v5053_v29, %v5052_v24  ;;  %v2306_v16 = vsel %vm2224_vm0, %v7986_v58, %v1491_v45  ;;  %v293_v18 = vld [vmem:[%s8099_s30 + $0x3b8] sm:$0xff] }
 0x1c7   : > { %v4644_v52 = vadd.f32 %v9291_v43, %v3887_v51  ;;  %v3898_v31 = vrot.slane %v3897_v3, 2  ;;  %7254 = vmatmul.mubr.msk.f32.gmra.mrb[78].mxu0 %vm2494_vm2, %v2433_v39  ;;  %2074 = vrot.lane.b32.xlu1 %v932_v11, %s8045_s8  ;;  %v5056_v57 = vsel %vm5025_vm10, %v5055_v15, %v5054_v34  ;;  %v2305_v28 = vsel %vm2224_vm0, %v7987_v5, %v1489_v54 }
 0x1c8   : > { %v4643_v59 = vadd.f32 %v9291_v43, %v3880_v2  ;;  %v3891_v63 = vrot.slane %v3890_v33, 2  ;;  %v7177_v0 = vpop.f32.mrb[26].mxu0  ;;  %2072 = vrot.lane.b32.xlu0 %v931_v41, %s8045_s8  ;;  %v549_v38 = vrot.slane %v293_v18, 1  ;;  %v934_v39 = vrot.slane %v293_v18, 2  ;;  %v7990_v18 = vld [vmem:[%s8099_s30 + $0x340] sm:$0xff] }
 0x1c9   : > { %v3899_v4 = vmax.f32 %v3897_v3, %v3898_v31  ;;  %v3618_v53 = vsel %vm8867_vm4, %v7177_v0, -1e+30  ;;  %v3075_v30 = vpop.f32.mrb[27].mxu0  ;;  %v2003_v44 = vpop.permute.xlu1 %2002  ;;  %v4772_v7 = vmax.f32 %v4644_v52, 0.0  ;;  %v7988_v3 = vld [vmem:[%s8099_s30 + $0x290] sm:$0xff] }
 0x1ca   : > { %v4771_v61 = vmax.f32 %v4643_v59, 0.0  ;;  %v3892_v23 = vmax.f32 %v3890_v33, %v3891_v63  ;;  %v3909_v11 = vsel %vm3719_vm5, %v3618_v53, -inf  ;;  %v3617_v24 = vsel %vm8867_vm4, %v3075_v30, -1e+30  ;;  %v2001_v48 = vpop.permute.xlu0 %2000  ;;  %v9339_v63 = vld [vmem:[%s8099_s30 + $0x318] sm:$0xff] }
 0x1cb   : > { %v3900_v37 = vrot.slane %v3899_v4, 1  ;;  %v3910_v17 = vrot.slane %v3909_v11, 4  ;;  %v3902_v41 = vsel %vm3719_vm5, %v3617_v24, -inf  ;;  %v2435_v56 = vsel %vm2353_vm1, %v2306_v16, %v2003_v44  ;;  %1522 = vrot.lane.b32.xlu1 %v527_v13, %s8046_s9  ;;  %v7989_v53 = vld [vmem:[%s8099_s30 + $0x298] sm:$0xff] }
 0x1cc   : > { %v5057_v20 = vrot.slane %v4771_v61, 2  ;;  %v3893_v50 = vrot.slane %v3892_v23, 1  ;;  %v3903_v19 = vrot.slane %v3902_v41, 4  ;;  %v2434_v9 = vsel %vm2353_vm1, %v2305_v28, %v2001_v48  ;;  %1520 = vrot.lane.b32.xlu0 %v526_v8, %s8046_s9  ;;  %v9352_v61 = vld [vmem:[%s8099_s30 + $0x3c0] sm:$0xff] }
 0x1cd   : > { %v3901_v55 = vmax.f32 %v3899_v4, %v3900_v37  ;;  %v3911_v32 = vmax.f32 %v3909_v11, %v3910_v17  ;;  %7256 = vmatprep.mubr.msk.f32.mxu0 %vm2494_vm2, %v2434_v9  ;;  %v1495_v14 = vpop.permute.xlu1 %1494  ;;  %v5059_v22 = vrot.slane %v4772_v7, 1  ;;  %v9345_v4 = vld [vmem:[%s8099_s30 + $0x310] sm:$0xff]  ;;  %v550_v9 = vrot.slane %v9352_v61, 1 }
 0x1ce   : > { %v3894_v10 = vmax.f32 %v3892_v23, %v3893_v50  ;;  %v3904_v12 = vmax.f32 %v3902_v41, %v3903_v19  ;;  %7257 = vmatmul.mubr.msk.f32.gmra.mrb[80].mxu0 %vm2494_vm2, %v2435_v56  ;;  %v1493_v13 = vpop.permute.xlu0 %1492  ;;  %v5058_v25 = vsel %vm5028_vm11, %v5057_v20, %v5056_v57  ;;  %v2308_v30 = vsel %vm2224_vm0, %v7989_v53, %v1495_v14 }
 0x1cf   : > { %v4646_v26 = vadd.f32 %v9291_v43, %v3901_v55  ;;  %v3912_v27 = vrot.slane %v3911_v32, 2  ;;  %2032 = vrot.lane.b32.xlu1 %v911_v60, %s8045_s8  ;;  %v9325_v21 = vsel %vm5031_vm12, %v5059_v22, %v5058_v25  ;;  %v2307_v40 = vsel %vm2224_vm0, %v7988_v3, %v1493_v13 }
 0x1d0   : > { %v4645_v1 = vadd.f32 %v9291_v43, %v3894_v10  ;;  %v3905_v29 = vrot.slane %v3904_v12, 2  ;;  %v7180_v35 = vpop.f32.mrb[28].mxu0  ;;  %1564 = vrot.lane.b32.xlu0 %v548_v42, %s8046_s9  ;;  %v933_v42 = vrot.slane %v9283_v46, 2  ;;  %v529_v46 = vrot.slane %v9339_v63, 1 }
 0x1d1   : > { %v4774_v15 = vmax.f32 %v4646_v26, 0.0  ;;  %v3913_v51 = vmax.f32 %v3911_v32, %v3912_v27  ;;  %v3620_v6 = vsel %vm8867_vm4, %v7180_v35, -1e+30  ;;  %v3085_v45 = vpop.f32.mrb[29].mxu0  ;;  %v2005_v2 = vpop.permute.xlu1 %2004  ;;  %v528_v41 = vrot.slane %v9345_v4, 1  ;;  %v7991_v35 = vld [vmem:[%s8099_s30 + $0x348] sm:$0xff] }
 0x1d2   : > { %v4773_v33 = vmax.f32 %v4645_v1, 0.0  ;;  %v3906_v54 = vmax.f32 %v3904_v12, %v3905_v29  ;;  %v3923_v8 = vsel %vm3719_vm5, %v3620_v6, -inf  ;;  %v3619_v34 = vsel %vm8867_vm4, %v3085_v45, -1e+30  ;;  %v1537_v52 = vpop.permute.xlu0 %1536 }
 0x1d3   : > { %v5061_v31 = vrot.slane %v4774_v15, 7  ;;  %v3914_v60 = vrot.slane %v3913_v51, 1  ;;  %v3924_v57 = vrot.slane %v3923_v8, 4  ;;  %v3916_v59 = vsel %vm3719_vm5, %v3619_v34, -inf  ;;  %2034 = vrot.lane.b32.xlu1 %v912_v49, %s8045_s8 }
 0x1d4   : > { %v3907_v58 = vrot.slane %v3906_v54, 1  ;;  %v3917_v16 = vrot.slane %v3916_v59, 4  ;;  %v2436_v0 = vsel %vm2353_vm1, %v2307_v40, %v2005_v2  ;;  %1566 = vrot.lane.b32.xlu0 %v549_v38, %s8046_s9  ;;  %v913_v56 = vrot.slane %v9345_v4, 2 }
 0x1d5   : > { %v5062_v5 = vsel %vm5013_vm6, %v5061_v31, %v4773_v33  ;;  %v3915_v28 = vmax.f32 %v3913_v51, %v3914_v60  ;;  %v3925_v44 = vmax.f32 %v3923_v8, %v3924_v57  ;;  %7259 = vmatprep.mubr.msk.f32.mxu0 %vm2494_vm2, %v2436_v0  ;;  %v2007_v7 = vpop.permute.xlu1 %2006  ;;  %v914_v55 = vrot.slane %v9339_v63, 2  ;;  %v9377_v51 = vld [vmem:[%s8099_s30 + $0x3c8] sm:$0xff] }
 0x1d6   : > { %v3908_v23 = vmax.f32 %v3906_v54, %v3907_v58  ;;  %v3918_v11 = vmax.f32 %v3916_v59, %v3917_v16  ;;  %v2437_v24 = vsel %vm2353_vm1, %v2308_v30, %v2007_v7  ;;  %v1539_v48 = vpop.permute.xlu0 %1538  ;;  %v2329_v22 = vsel %vm2224_vm0, %v7990_v18, %v1537_v52  ;;  %v9383_v52 = vld [vmem:[%s8099_s30 + $0x328] sm:$0xff]  ;;  %v9389_v16 = vld [vmem:[%s8099_s30 + $0x320] sm:$0xff] }
 0x1d7   : > { %v4648_v37 = vadd.f32 %v9291_v43, %v3915_v28  ;;  %v3926_v17 = vrot.slane %v3925_v44, 2  ;;  %2078 = vrot.lane.b32.xlu1 %v934_v39, %s8045_s8  ;;  %7260 = vmatmul.mubr.msk.f32.gmra.mrb[82].mxu0 %vm2494_vm2, %v2437_v24  ;;  %v2330_v38 = vsel %vm2224_vm0, %v7991_v35, %v1539_v48  ;;  %v551_v58 = vrot.slane %v9377_v51, 1 }
 0x1d8   : > { %v4647_v20 = vadd.f32 %v9291_v43, %v3908_v23  ;;  %v3919_v50 = vrot.slane %v3918_v11, 2  ;;  %v7183_v19 = vpop.f32.mrb[30].mxu0  ;;  %2076 = vrot.lane.b32.xlu0 %v933_v42, %s8045_s8  ;;  %v936_v4 = vrot.slane %v9377_v51, 2  ;;  %v531_v7 = vrot.slane %v9383_v52, 1 }
 0x1d9   : > { %v4776_v32 = vmax.f32 %v4648_v37, 0.0  ;;  %v3927_v14 = vmax.f32 %v3925_v44, %v3926_v17  ;;  %v3622_v10 = vsel %vm8867_vm4, %v7183_v19, -1e+30  ;;  %v3095_v12 = vpop.f32.mrb[31].mxu0  ;;  %v2051_v13 = vpop.permute.xlu1 %2050  ;;  %v935_v44 = vrot.slane %v9352_v61, 2  ;;  %v7992_v19 = vld [vmem:[%s8099_s30 + $0x2a0] sm:$0xff] }
 0x1da   : > { %v4775_v25 = vmax.f32 %v4647_v20, 0.0  ;;  %v3920_v26 = vmax.f32 %v3918_v11, %v3919_v50  ;;  %v3937_v27 = vsel %vm3719_vm5, %v3622_v10, -inf  ;;  %v3621_v49 = vsel %vm8867_vm4, %v3095_v12, -1e+30  ;;  %v2049_v1 = vpop.permute.xlu0 %2048 }
 0x1db   : > { %v3928_v29 = vrot.slane %v3927_v14, 1  ;;  %v3938_v39 = vrot.slane %v3937_v27, 4  ;;  %v3930_v15 = vsel %vm3719_vm5, %v3621_v49, -inf  ;;  %1526 = vrot.lane.b32.xlu1 %v529_v46, %s8046_s9  ;;  %v2459_v45 = vsel %vm2353_vm1, %v2330_v38, %v2051_v13 }
 0x1dc   : > { %v5063_v3 = vrot.slane %v4775_v25, 6  ;;  %v3921_v40 = vrot.slane %v3920_v26, 1  ;;  %v3931_v6 = vrot.slane %v3930_v15, 4  ;;  %1524 = vrot.lane.b32.xlu0 %v528_v41, %s8046_s9  ;;  %v5065_v2 = vrot.slane %v4776_v32, 5 }
 0x1dd   : > { %v3929_v33 = vmax.f32 %v3927_v14, %v3928_v29  ;;  %v3939_v54 = vmax.f32 %v3937_v27, %v3938_v39  ;;  %v2458_v8 = vsel %vm2353_vm1, %v2329_v22, %v2049_v1  ;;  %v1499_v34 = vpop.permute.xlu1 %1498  ;;  %v530_v37 = vrot.slane %v9389_v16, 1  ;;  %v9418_v29 = vld [vmem:[%s8099_s30 + $0x3d0] sm:$0xff] }
 0x1de   : > { %v5064_v31 = vsel %vm5016_vm7, %v5063_v3, %v5062_v5  ;;  %v3922_v60 = vmax.f32 %v3920_v26, %v3921_v40  ;;  %v3932_v57 = vmax.f32 %v3930_v15, %v3931_v6  ;;  %7292 = vmatprep.mubr.msk.f32.mxu1 %vm2494_vm2, %v2458_v8  ;;  %v1497_v59 = vpop.permute.xlu0 %1496  ;;  %v7993_v26 = vld [vmem:[%s8099_s30 + $0x2a8] sm:$0xff]  ;;  %v915_v3 = vrot.slane %v9389_v16, 2 }
 0x1df   : > { %v4650_v0 = vadd.f32 %v9291_v43, %v3929_v33  ;;  %v3940_v42 = vrot.slane %v3939_v54, 2  ;;  %7293 = vmatmul.mubr.msk.f32.vlgmr.msra.gmra.mrb[0].mxu1 %vm2494_vm2, %v2459_v45  ;;  %2036 = vrot.lane.b32.xlu1 %v913_v56, %s8045_s8  ;;  %v5066_v5 = vsel %vm5019_vm8, %v5065_v2, %v5064_v31  ;;  %v2310_v27 = vsel %vm2224_vm0, %v7993_v26, %v1499_v34  ;;  %v7994_v2 = vld [vmem:[%s8099_s30 + $0x350] sm:$0xff]  ;;  %v7995_v31 = vld [vmem:[%s8099_s30 + $0x358] sm:$0xff] }
 0x1e0   : > { %v4649_v28 = vadd.f32 %v9291_v43, %v3922_v60  ;;  %v3933_v53 = vrot.slane %v3932_v57, 2  ;;  %v7186_v30 = vpop.f32.mrb[32].mxu0  ;;  %1568 = vrot.lane.b32.xlu0 %v550_v9, %s8046_s9  ;;  %v2309_v9 = vsel %vm2224_vm0, %v7992_v19, %v1497_v59  ;;  %v552_v8 = vrot.slane %v9418_v29, 1 }
 0x1e1   : > { %v4778_v23 = vmax.f32 %v4650_v0, 0.0  ;;  %v3941_v11 = vmax.f32 %v3939_v54, %v3940_v42  ;;  %v3624_v24 = vsel %vm8867_vm4, %v7186_v30, -1e+30  ;;  %v3105_v48 = vpop.f32.mrb[33].mxu0  ;;  %v2009_v46 = vpop.permute.xlu1 %2008 }
 0x1e2   : > { %v4777_v17 = vmax.f32 %v4649_v28, 0.0  ;;  %v3934_v41 = vmax.f32 %v3932_v57, %v3933_v53  ;;  %v3951_v56 = vsel %vm3719_vm5, %v3624_v24, -inf  ;;  %v3623_v20 = vsel %vm8867_vm4, %v3105_v48, -1e+30  ;;  %v1541_v61 = vpop.permute.xlu0 %1540 }
 0x1e3   : > { %v3942_v50 = vrot.slane %v3941_v11, 1  ;;  %v3952_v32 = vrot.slane %v3951_v56, 4  ;;  %v3944_v14 = vsel %vm3719_vm5, %v3623_v20, -inf  ;;  %2038 = vrot.lane.b32.xlu1 %v914_v55, %s8045_s8  ;;  %v2438_v12 = vsel %vm2353_vm1, %v2309_v9, %v2009_v46 }
 0x1e4   : > { %v5067_v18 = vrot.slane %v4777_v17, 4  ;;  %v3935_v22 = vrot.slane %v3934_v41, 1  ;;  %v3945_v10 = vrot.slane %v3944_v14, 4  ;;  %1570 = vrot.lane.b32.xlu0 %v551_v58, %s8046_s9  ;;  %v5069_v13 = vrot.slane %v4778_v23, 3  ;;  %7262 = vmatprep.mubr.msk.f32.mxu0 %vm2494_vm2, %v2438_v12 }
 0x1e5   : > { %v3943_v25 = vmax.f32 %v3941_v11, %v3942_v50  ;;  %v3953_v49 = vmax.f32 %v3951_v56, %v3952_v32  ;;  %v2011_v1 = vpop.permute.xlu1 %2010  ;;  %v2331_v33 = vsel %vm2224_vm0, %v7994_v2, %v1541_v61  ;;  %v916_v32 = vrot.slane %v9383_v52, 2 }
 0x1e6   : > { %v3936_v63 = vmax.f32 %v3934_v41, %v3935_v22  ;;  %v3946_v55 = vmax.f32 %v3944_v14, %v3945_v10  ;;  %v2439_v35 = vsel %vm2353_vm1, %v2310_v27, %v2011_v1  ;;  %v1543_v38 = vpop.permute.xlu0 %1542  ;;  %v5068_v39 = vsel %vm5022_vm9, %v5067_v18, %v5066_v5  ;;  %v9449_v41 = vld [vmem:[%s8099_s30 + $0x3d8] sm:$0xff] }
 0x1e7   : > { %v4652_v15 = vadd.f32 %v9291_v43, %v3943_v25  ;;  %v3954_v51 = vrot.slane %v3953_v49, 2  ;;  %2082 = vrot.lane.b32.xlu1 %v936_v4, %s8045_s8  ;;  %7263 = vmatmul.mubr.msk.f32.gmra.mrb[84].mxu0 %vm2494_vm2, %v2439_v35  ;;  %v5070_v40 = vsel %vm5025_vm10, %v5069_v13, %v5068_v39  ;;  %v2332_v60 = vsel %vm2224_vm0, %v7995_v31, %v1543_v38  ;;  %v9470_v38 = vld [vmem:[%s8099_s30 + $0x338] sm:$0xff] }
 0x1e8   : > { %v4651_v6 = vadd.f32 %v9291_v43, %v3936_v63  ;;  %v3947_v45 = vrot.slane %v3946_v55, 2  ;;  %v7189_v54 = vpop.f32.mrb[34].mxu0  ;;  %2080 = vrot.lane.b32.xlu0 %v935_v44, %s8045_s8  ;;  %v553_v18 = vrot.slane %v9449_v41, 1  ;;  %v938_v52 = vrot.slane %v9449_v41, 2 }
 0x1e9   : > { %v3955_v34 = vmax.f32 %v3953_v49, %v3954_v51  ;;  %v3626_v57 = vsel %vm8867_vm4, %v7189_v54, -1e+30  ;;  %v3115_v59 = vpop.f32.mrb[35].mxu0  ;;  %v2055_v58 = vpop.permute.xlu1 %2054  ;;  %v4780_v0 = vmax.f32 %v4652_v15, 0.0  ;;  %v937_v25 = vrot.slane %v9418_v29, 2  ;;  %v7996_v49 = vld [vmem:[%s8099_s30 + $0x2b0] sm:$0xff] }
 0x1ea   : > { %v4779_v42 = vmax.f32 %v4651_v6, 0.0  ;;  %v3948_v4 = vmax.f32 %v3946_v55, %v3947_v45  ;;  %v3965_v5 = vsel %vm3719_vm5, %v3626_v57, -inf  ;;  %v3625_v28 = vsel %vm8867_vm4, %v3115_v59, -1e+30  ;;  %v2053_v53 = vpop.permute.xlu0 %2052 }
 0x1eb   : > { %v3956_v30 = vrot.slane %v3955_v34, 1  ;;  %v3966_v44 = vrot.slane %v3965_v5, 4  ;;  %v3958_v23 = vsel %vm3719_vm5, %v3625_v28, -inf  ;;  %v2461_v11 = vsel %vm2353_vm1, %v2332_v60, %v2055_v58  ;;  %1530 = vrot.lane.b32.xlu1 %v531_v7, %s8046_s9  ;;  %v9484_v60 = vld [vmem:[%s8099_s30 + $0x3e0] sm:$0xff]  ;;  %v7997_v58 = vld [vmem:[%s8099_s30 + $0x2b8] sm:$0xff] }
 0x1ec   : > { %v5071_v24 = vrot.slane %v4779_v42, 2  ;;  %v3949_v48 = vrot.slane %v3948_v4, 1  ;;  %v3959_v46 = vrot.slane %v3958_v23, 4  ;;  %v2460_v17 = vsel %vm2353_vm1, %v2331_v33, %v2053_v53  ;;  %1528 = vrot.lane.b32.xlu0 %v530_v37, %s8046_s9  ;;  %v9478_v33 = vld [vmem:[%s8099_s30 + $0x330] sm:$0xff] }
 0x1ed   : > { %v3957_v56 = vmax.f32 %v3955_v34, %v3956_v30  ;;  %v3967_v20 = vmax.f32 %v3965_v5, %v3966_v44  ;;  %7295 = vmatprep.mubr.msk.f32.mxu1 %vm2494_vm2, %v2460_v17  ;;  %v1503_v61 = vpop.permute.xlu1 %1502  ;;  %v5073_v50 = vrot.slane %v4780_v0, 1  ;;  %v533_v31 = vrot.slane %v9470_v38, 1  ;;  %v9491_v5 = vld [vmem:[%s8099_s30 + $0x3e8] sm:$0xff] }
 0x1ee   : > { %v3950_v19 = vmax.f32 %v3948_v4, %v3949_v48  ;;  %v3960_v9 = vmax.f32 %v3958_v23, %v3959_v46  ;;  %7296 = vmatmul.mubr.msk.f32.gmra.mrb[2].mxu1 %vm2494_vm2, %v2461_v11  ;;  %v1501_v7 = vpop.permute.xlu0 %1500  ;;  %v5072_v14 = vsel %vm5028_vm11, %v5071_v24, %v5070_v40  ;;  %v2312_v0 = vsel %vm2224_vm0, %v7997_v58, %v1503_v61 }
 0x1ef   : > { %v4654_v16 = vadd.f32 %v9291_v43, %v3957_v56  ;;  %v3968_v37 = vrot.slane %v3967_v20, 2  ;;  %2040 = vrot.lane.b32.xlu1 %v915_v3, %s8045_s8  ;;  %v9459_v22 = vsel %vm5031_vm12, %v5073_v50, %v5072_v14  ;;  %v2311_v1 = vsel %vm2224_vm0, %v7996_v49, %v1501_v7 }
 0x1f0   : > { %v4653_v10 = vadd.f32 %v9291_v43, %v3950_v19  ;;  %v3961_v12 = vrot.slane %v3960_v9, 2  ;;  %v7192_v13 = vpop.f32.mrb[36].mxu0  ;;  %1572 = vrot.lane.b32.xlu0 %v552_v8, %s8046_s9  ;;  %v532_v23 = vrot.slane %v9478_v33, 1  ;;  %v917_v48 = vrot.slane %v9478_v33, 2 }
 0x1f1   : > { %v4782_v26 = vmax.f32 %v4654_v16, 0.0  ;;  %v3969_v27 = vmax.f32 %v3967_v20, %v3968_v37  ;;  %v3628_v63 = vsel %vm8867_vm4, %v7192_v13, -1e+30  ;;  %v3125_v55 = vpop.f32.mrb[37].mxu0  ;;  %v2013_v35 = vpop.permute.xlu1 %2012  ;;  %v554_v46 = vrot.slane %v9484_v60, 1 }
 0x1f2   : > { %v4781_v39 = vmax.f32 %v4653_v10, 0.0  ;;  %v3962_v15 = vmax.f32 %v3960_v9, %v3961_v12  ;;  %v3979_v51 = vsel %vm3719_vm5, %v3628_v63, -inf  ;;  %v3627_v29 = vsel %vm8867_vm4, %v3125_v55, -1e+30  ;;  %v1545_v3 = vpop.permute.xlu0 %1544  ;;  %v7998_v9 = vld [vmem:[%s8099_s30 + $0x360] sm:$0xff] }
 0x1f3   : > { %v5075_v40 = vrot.slane %v4782_v26, 7  ;;  %v3970_v6 = vrot.slane %v3969_v27, 1  ;;  %v3980_v45 = vrot.slane %v3979_v51, 4  ;;  %v3972_v2 = vsel %vm3719_vm5, %v3627_v29, -inf  ;;  %2042 = vrot.lane.b32.xlu1 %v916_v32, %s8045_s8 }
 0x1f4   : > { %v3963_v54 = vrot.slane %v3962_v15, 1  ;;  %v3973_v8 = vrot.slane %v3972_v2, 4  ;;  %v2440_v34 = vsel %vm2353_vm1, %v2311_v1, %v2013_v35  ;;  %1574 = vrot.lane.b32.xlu0 %v553_v18, %s8046_s9  ;;  %v918_v20 = vrot.slane %v9470_v38, 2 }
 0x1f5   : > { %v5076_v57 = vsel %vm5013_vm6, %v5075_v40, %v4781_v39  ;;  %v3971_v59 = vmax.f32 %v3969_v27, %v3970_v6  ;;  %v3981_v42 = vmax.f32 %v3979_v51, %v3980_v45  ;;  %7265 = vmatprep.mubr.msk.f32.mxu0 %vm2494_vm2, %v2440_v34  ;;  %v2015_v4 = vpop.permute.xlu1 %2014  ;;  %v555_v61 = vrot.slane %v9491_v5, 1  ;;  %v9519_v40 = vld [vmem:[%s8099_s30 + $0x3f8] sm:$0xff]  ;;  %v9522_v6 = vld [vmem:[%s8099_s30 + $0x3f0] sm:$0xff] }
 0x1f6   : > { %v3964_v28 = vmax.f32 %v3962_v15, %v3963_v54  ;;  %v3974_v53 = vmax.f32 %v3972_v2, %v3973_v8  ;;  %v2441_v30 = vsel %vm2353_vm1, %v2312_v0, %v2015_v4  ;;  %v1547_v44 = vpop.permute.xlu0 %1546  ;;  %v2333_v7 = vsel %vm2224_vm0, %v7998_v9, %v1545_v3 }
 0x1f7   : > { %v4656_v11 = vadd.f32 %v9291_v43, %v3971_v59  ;;  %v3982_v24 = vrot.slane %v3981_v42, 2  ;;  %2086 = vrot.lane.b32.xlu1 %v938_v52, %s8045_s8  ;;  %7266 = vmatmul.mubr.msk.f32.gmra.mrb[86].mxu0 %vm2494_vm2, %v2441_v30  ;;  %v940_v8 = vrot.slane %v9491_v5, 2  ;;  %v939_v59 = vrot.slane %v9484_v60, 2 }
 0x1f8   : > { %v4655_v17 = vadd.f32 %v9291_v43, %v3964_v28  ;;  %v3975_v41 = vrot.slane %v3974_v53, 2  ;;  %v7195_v56 = vpop.f32.mrb[38].mxu0  ;;  %2084 = vrot.lane.b32.xlu0 %v937_v25, %s8045_s8  ;;  %v7999_v25 = vld [vmem:[%s8099_s30 + $0x368] sm:$0xff]  ;;  %v557_v4 = vrot.slane %v9519_v40, 1  ;;  %v556_v28 = vrot.slane %v9522_v6, 1 }
 0x1f9   : > { %v4784_v50 = vmax.f32 %v4656_v11, 0.0  ;;  %v3983_v19 = vmax.f32 %v3981_v42, %v3982_v24  ;;  %v3630_v32 = vsel %vm8867_vm4, %v7195_v56, -1e+30  ;;  %v3135_v14 = vpop.f32.mrb[39].mxu0  ;;  %v2059_v16 = vpop.permute.xlu1 %2058  ;;  %v2334_v26 = vsel %vm2224_vm0, %v7999_v25, %v1547_v44  ;;  %v8000_v44 = vld [vmem:[%s8099_s30 + $0x2c8] sm:$0xff] }
 0x1fa   : > { %v4783_v37 = vmax.f32 %v4655_v17, 0.0  ;;  %v3976_v18 = vmax.f32 %v3974_v53, %v3975_v41  ;;  %v3993_v10 = vsel %vm3719_vm5, %v3630_v32, -inf  ;;  %v3629_v12 = vsel %vm8867_vm4, %v3135_v14, -1e+30  ;;  %v2057_v13 = vpop.permute.xlu0 %2056 }
 0x1fb   : > { %v3984_v52 = vrot.slane %v3983_v19, 1  ;;  %v3994_v27 = vrot.slane %v3993_v10, 4  ;;  %v3986_v49 = vsel %vm3719_vm5, %v3629_v12, -inf  ;;  %1534 = vrot.lane.b32.xlu1 %v533_v31, %s8046_s9  ;;  %v2463_v35 = vsel %vm2353_vm1, %v2334_v26, %v2059_v16  ;;  %v4878_v12 = vld [vmem:[%s10678_s1 + $0x68] sm:$0xff] }
 0x1fc   : > { %v5077_v1 = vrot.slane %v4783_v37, 6  ;;  %v3977_v63 = vrot.slane %v3976_v18, 1  ;;  %v3987_v55 = vrot.slane %v3986_v49, 4  ;;  %1532 = vrot.lane.b32.xlu0 %v532_v23, %s8046_s9  ;;  %v5079_v39 = vrot.slane %v4784_v50, 5 }
 0x1fd   : > { %v3985_v15 = vmax.f32 %v3983_v19, %v3984_v52  ;;  %v3995_v51 = vmax.f32 %v3993_v10, %v3994_v27  ;;  %v2462_v29 = vsel %vm2353_vm1, %v2333_v7, %v2057_v13  ;;  %v1507_v3 = vpop.permute.xlu1 %1506  ;;  %v8001_v19 = vld [vmem:[%s8099_s30 + $0x2c0] sm:$0xff] }
 0x1fe   : > { %v5078_v45 = vsel %vm5016_vm7, %v5077_v1, %v5076_v57  ;;  %v3978_v2 = vmax.f32 %v3976_v18, %v3977_v63  ;;  %v3988_v33 = vmax.f32 %v3986_v49, %v3987_v55  ;;  %7298 = vmatprep.mubr.msk.f32.mxu1 %vm2494_vm2, %v2462_v29  ;;  %v1505_v54 = vpop.permute.xlu0 %1504  ;;  %v2314_v23 = vsel %vm2224_vm0, %v8000_v44, %v1507_v3  ;;  %v4877_v10 = vld [vmem:[%s10678_s1 + $0x60] sm:$0xff] }
 0x1ff   : > { %v4658_v34 = vadd.f32 %v9291_v43, %v3985_v15  ;;  %v3996_v31 = vrot.slane %v3995_v51, 2  ;;  %7299 = vmatmul.mubr.msk.f32.gmra.mrb[4].mxu1 %vm2494_vm2, %v2463_v35  ;;  %2044 = vrot.lane.b32.xlu1 %v917_v48, %s8045_s8  ;;  %v5080_v58 = vsel %vm5019_vm8, %v5079_v39, %v5078_v45  ;;  %v2313_v9 = vsel %vm2224_vm0, %v8001_v19, %v1505_v54 }
 0x200   : > { %v4657_v57 = vadd.f32 %v9291_v43, %v3978_v2  ;;  %v3989_v0 = vrot.slane %v3988_v33, 2  ;;  %v7198_v42 = vpop.f32.mrb[40].mxu0  ;;  %1576 = vrot.lane.b32.xlu0 %v554_v46, %s8046_s9  ;;  %v7520_v25 = vpack.c.bf16 %v4878_v12, %v4877_v10  ;;  %v942_v55 = vrot.slane %v9519_v40, 2  ;;  %v8004_v10 = vld [vmem:[%s8099_s30 + $0x2d0] sm:$0xff] }
 0x201   : > { %v4786_v53 = vmax.f32 %v4658_v34, 0.0  ;;  %v3997_v30 = vmax.f32 %v3995_v51, %v3996_v31  ;;  %v3632_v60 = vsel %vm8867_vm4, %v7198_v42, -1e+30  ;;  %v3145_v11 = vpop.f32.mrb[41].mxu0  ;;  %v2017_v24 = vpop.permute.xlu1 %2016  ;;  %v8002_v51 = vld [vmem:[%s8099_s30 + $0x370] sm:$0xff]  ;;  %v941_v45 = vrot.slane %v9522_v6, 2 }
 0x202   : > { %v4785_v48 = vmax.f32 %v4657_v57, 0.0  ;;  %v3990_v17 = vmax.f32 %v3988_v33, %v3989_v0  ;;  %v4007_v41 = vsel %vm3719_vm5, %v3632_v60, -inf  ;;  %v3631_v46 = vsel %vm8867_vm4, %v3145_v11, -1e+30  ;;  %v1549_v56 = vpop.permute.xlu0 %1548  ;;  %7521 = vmatprep.subr.bf16.mxu1 %v7520_v25  ;;  %v8003_v33 = vld [vmem:[%s8099_s30 + $0x378] sm:$0xff] }
 0x203   : > { %v3998_v50 = vrot.slane %v3997_v30, 1  ;;  %v4008_v7 = vrot.slane %v4007_v41, 4  ;;  %v4000_v32 = vsel %vm3719_vm5, %v3631_v46, -inf  ;;  %2046 = vrot.lane.b32.xlu1 %v918_v20, %s8045_s8  ;;  %v2442_v18 = vsel %vm2353_vm1, %v2313_v9, %v2017_v24  ;;  %7523 = vmatpush3.bf16.msra.mxu1 %v7520_v25 }
 0x204   : > { %v5081_v14 = vrot.slane %v4785_v48, 4  ;;  %v3991_v16 = vrot.slane %v3990_v17, 1  ;;  %v4001_v37 = vrot.slane %v4000_v32, 4  ;;  %1578 = vrot.lane.b32.xlu0 %v555_v61, %s8046_s9  ;;  %v5083_v13 = vrot.slane %v4786_v53, 3  ;;  %7268 = vmatprep.mubr.msk.f32.mxu0 %vm2494_vm2, %v2442_v18 }
 0x205   : > { %v3999_v38 = vmax.f32 %v3997_v30, %v3998_v50  ;;  %v4009_v20 = vmax.f32 %v4007_v41, %v4008_v7  ;;  %v2019_v52 = vpop.permute.xlu1 %2018  ;;  %v2335_v29 = vsel %vm2224_vm0, %v8002_v51, %v1549_v56 }
 0x206   : > { %v3992_v26 = vmax.f32 %v3990_v17, %v3991_v16  ;;  %v4002_v27 = vmax.f32 %v4000_v32, %v4001_v37  ;;  %v2443_v5 = vsel %vm2353_vm1, %v2314_v23, %v2019_v52  ;;  %v1551_v61 = vpop.permute.xlu0 %1550  ;;  %v5082_v49 = vsel %vm5022_vm9, %v5081_v14, %v5080_v58 }
 0x207   : > { %v4660_v1 = vadd.f32 %v9291_v43, %v3999_v38  ;;  %v4010_v63 = vrot.slane %v4009_v20, 2  ;;  %2090 = vrot.lane.b32.xlu1 %v940_v8, %s8045_s8  ;;  %7269 = vmatmul.mubr.msk.f32.gmra.mrb[88].mxu0 %vm2494_vm2, %v2443_v5  ;;  %v5084_v35 = vsel %vm5025_vm10, %v5083_v13, %v5082_v49  ;;  %v2336_v54 = vsel %vm2224_vm0, %v8003_v33, %v1551_v61 }
 0x208   : > { %v4659_v39 = vadd.f32 %v9291_v43, %v3992_v26  ;;  %v4003_v15 = vrot.slane %v4002_v27, 2  ;;  %v7201_v3 = vpop.f32.mrb[42].mxu0  ;;  %2088 = vrot.lane.b32.xlu0 %v939_v59, %s8045_s8 }
 0x209   : > { %v4011_v2 = vmax.f32 %v4009_v20, %v4010_v63  ;;  %v3634_v8 = vsel %vm8867_vm4, %v7201_v3, -1e+30  ;;  %v3155_v34 = vpop.f32.mrb[43].mxu0  ;;  %v2063_v31 = vpop.permute.xlu1 %2062  ;;  %v4788_v58 = vmax.f32 %v4660_v1, 0.0 }
 0x20a   : > { %v4787_v57 = vmax.f32 %v4659_v39, 0.0  ;;  %v4004_v0 = vmax.f32 %v4002_v27, %v4003_v15  ;;  %v4021_v42 = vsel %vm3719_vm5, %v3634_v8, -inf  ;;  %v3633_v59 = vsel %vm8867_vm4, %v3155_v34, -1e+30  ;;  %v2061_v53 = vpop.permute.xlu0 %2060 }
 0x20b   : > { %v4012_v30 = vrot.slane %v4011_v2, 1  ;;  %v4022_v44 = vrot.slane %v4021_v42, 4  ;;  %v4014_v23 = vsel %vm3719_vm5, %v3633_v59, -inf  ;;  %v2465_v60 = vsel %vm2353_vm1, %v2336_v54, %v2063_v31  ;;  %1582 = vrot.lane.b32.xlu1 %v557_v4, %s8046_s9 }
 0x20c   : > { %v5085_v11 = vrot.slane %v4787_v57, 2  ;;  %v4005_v24 = vrot.slane %v4004_v0, 1  ;;  %v4015_v48 = vrot.slane %v4014_v23, 4  ;;  %v2464_v17 = vsel %vm2353_vm1, %v2335_v29, %v2061_v53  ;;  %1580 = vrot.lane.b32.xlu0 %v556_v28, %s8046_s9  ;;  %v8005_v29 = vld [vmem:[%s8099_s30 + $0x2d8] sm:$0xff] }
 0x20d   : > { %v4013_v41 = vmax.f32 %v4011_v2, %v4012_v30  ;;  %v4023_v46 = vmax.f32 %v4021_v42, %v4022_v44  ;;  %7301 = vmatprep.mubr.msk.f32.mxu1 %vm2494_vm2, %v2464_v17  ;;  %v1511_v56 = vpop.permute.xlu1 %1510  ;;  %v5087_v50 = vrot.slane %v4788_v58, 1  ;;  %v8006_v30 = vld [vmem:[%s8099_s30 + $0x380] sm:$0xff] }
 0x20e   : > { %v4006_v19 = vmax.f32 %v4004_v0, %v4005_v24  ;;  %v4016_v9 = vmax.f32 %v4014_v23, %v4015_v48  ;;  %7302 = vmatmul.mubr.msk.f32.gmra.mrb[6].mxu1 %vm2494_vm2, %v2465_v60  ;;  %v1509_v40 = vpop.permute.xlu0 %1508  ;;  %v5086_v4 = vsel %vm5028_vm11, %v5085_v11, %v5084_v35  ;;  %v2316_v3 = vsel %vm2224_vm0, %v8005_v29, %v1511_v56 }
 0x20f   : > { %v4662_v7 = vadd.f32 %v9291_v43, %v4013_v41  ;;  %v4024_v32 = vrot.slane %v4023_v46, 2  ;;  %2094 = vrot.lane.b32.xlu1 %v942_v55, %s8045_s8  ;;  %v9594_v6 = vsel %vm5031_vm12, %v5087_v50, %v5086_v4  ;;  %v2315_v12 = vsel %vm2224_vm0, %v8004_v10, %v1509_v40  ;;  %v8007_v50 = vld [vmem:[%s8099_s30 + $0x388] sm:$0xff] }
 0x210   : > { %v4661_v28 = vadd.f32 %v9291_v43, %v4006_v19  ;;  %v4017_v14 = vrot.slane %v4016_v9, 2  ;;  %v7204_v16 = vpop.f32.mrb[44].mxu0  ;;  %2092 = vrot.lane.b32.xlu0 %v941_v45, %s8045_s8 }
 0x211   : > { %v4790_v37 = vmax.f32 %v4662_v7, 0.0  ;;  %v4025_v18 = vmax.f32 %v4023_v46, %v4024_v32  ;;  %v3636_v13 = vsel %vm8867_vm4, %v7204_v16, -1e+30  ;;  %v3165_v38 = vpop.f32.mrb[45].mxu0  ;;  %v2021_v20 = vpop.permute.xlu1 %2020 }
 0x212   : > { %v4789_v52 = vmax.f32 %v4661_v28, 0.0  ;;  %v4018_v25 = vmax.f32 %v4016_v9, %v4017_v14  ;;  %v4035_v26 = vsel %vm3719_vm5, %v3636_v13, -inf  ;;  %v3635_v27 = vsel %vm8867_vm4, %v3165_v38, -1e+30  ;;  %v1553_v5 = vpop.permute.xlu0 %1552 }
 0x213   : > { %v5089_v61 = vrot.slane %v4790_v37, 7  ;;  %v4026_v49 = vrot.slane %v4025_v18, 1  ;;  %v4036_v1 = vrot.slane %v4035_v26, 4  ;;  %v4028_v63 = vsel %vm3719_vm5, %v3635_v27, -inf }
 0x214   : > { %v4019_v55 = vrot.slane %v4018_v25, 1  ;;  %v4029_v35 = vrot.slane %v4028_v63, 4  ;;  %v2444_v39 = vsel %vm2353_vm1, %v2315_v12, %v2021_v20  ;;  %v2337_v44 = vsel %vm2224_vm0, %v8006_v30, %v1553_v5 }
 0x215   : > { %v5090_v15 = vsel %vm5013_vm6, %v5089_v61, %v4789_v52  ;;  %v4027_v51 = vmax.f32 %v4025_v18, %v4026_v49  ;;  %v4037_v45 = vmax.f32 %v4035_v26, %v4036_v1  ;;  %7271 = vmatprep.mubr.msk.f32.mxu0 %vm2494_vm2, %v2444_v39  ;;  %v2023_v2 = vpop.permute.xlu1 %2022 }
 0x216   : > { %v4020_v33 = vmax.f32 %v4018_v25, %v4019_v55  ;;  %v4030_v54 = vmax.f32 %v4028_v63, %v4029_v35  ;;  %v2445_v8 = vsel %vm2353_vm1, %v2316_v3, %v2023_v2  ;;  %v1555_v34 = vpop.permute.xlu0 %1554 }
 0x217   : > { %v4664_v31 = vadd.f32 %v9291_v43, %v4027_v51  ;;  %v4038_v58 = vrot.slane %v4037_v45, 2  ;;  %7272 = vmatmul.mubr.msk.f32.gmra.mrb[90].mxu0 %vm2494_vm2, %v2445_v8  ;;  %v2338_v19 = vsel %vm2224_vm0, %v8007_v50, %v1555_v34 }
 0x218   : > { %v4663_v57 = vadd.f32 %v9291_v43, %v4020_v33  ;;  %v4031_v0 = vrot.slane %v4030_v54, 2  ;;  %v7207_v42 = vpop.f32.mrb[46].mxu0 }
 0x219   : > { %v4792_v59 = vmax.f32 %v4664_v31, 0.0  ;;  %v4039_v53 = vmax.f32 %v4037_v45, %v4038_v58  ;;  %v3638_v23 = vsel %vm8867_vm4, %v7207_v42, -1e+30  ;;  %v3175_v60 = vpop.f32.mrb[47].mxu0  ;;  %v2067_v11 = vpop.permute.xlu1 %2066  ;;  %v8009_v42 = vld [vmem:[%s8099_s30 + $0x2e8] sm:$0xff] }
 0x21a   : > { %v4791_v24 = vmax.f32 %v4663_v57, 0.0  ;;  %v4032_v48 = vmax.f32 %v4030_v54, %v4031_v0  ;;  %v4049_v17 = vsel %vm3719_vm5, %v3638_v23, -inf  ;;  %v3637_v41 = vsel %vm8867_vm4, %v3175_v60, -1e+30  ;;  %v2065_v46 = vpop.permute.xlu0 %2064 }
 0x21b   : > { %v4040_v56 = vrot.slane %v4039_v53, 1  ;;  %v4050_v9 = vrot.slane %v4049_v17, 4  ;;  %v4042_v40 = vsel %vm3719_vm5, %v3637_v41, -inf  ;;  %v2467_v28 = vsel %vm2353_vm1, %v2338_v19, %v2067_v11  ;;  %v8011_v19 = vld [vmem:[%s8099_s30 + $0x390] sm:$0xff] }
 0x21c   : > { %v5091_v4 = vrot.slane %v4791_v24, 6  ;;  %v4033_v7 = vrot.slane %v4032_v48, 1  ;;  %v4043_v32 = vrot.slane %v4042_v40, 4  ;;  %v5093_v14 = vrot.slane %v4792_v59, 5 }
 0x21d   : > { %v4041_v16 = vmax.f32 %v4039_v53, %v4040_v56  ;;  %v4051_v37 = vmax.f32 %v4049_v17, %v4050_v9  ;;  %v2466_v18 = vsel %vm2353_vm1, %v2337_v44, %v2065_v46  ;;  %v1515_v10 = vpop.permute.xlu1 %1514 }
 0x21e   : > { %v5092_v12 = vsel %vm5016_vm7, %v5091_v4, %v5090_v15  ;;  %v4034_v13 = vmax.f32 %v4032_v48, %v4033_v7  ;;  %v4044_v38 = vmax.f32 %v4042_v40, %v4043_v32  ;;  %7304 = vmatprep.mubr.msk.f32.mxu1 %vm2494_vm2, %v2466_v18  ;;  %v1513_v20 = vpop.permute.xlu0 %1512  ;;  %v2318_v59 = vsel %vm2224_vm0, %v8009_v42, %v1515_v10  ;;  %v9650_v48 = vld [vmem:[%s10679_s2] ss:$0 sm:$0xff]  ;;  %v8012_v7 = vld [vmem:[%s8099_s30 + $0x398] sm:$0xff] }
 0x21f   : > { %v4666_v52 = vadd.f32 %v9291_v43, %v4041_v16  ;;  %v4052_v25 = vrot.slane %v4051_v37, 2  ;;  %7305 = vmatmul.mubr.msk.f32.gmra.mrb[8].mxu1 %vm2494_vm2, %v2467_v28  ;;  %v5094_v26 = vsel %vm5019_vm8, %v5093_v14, %v5092_v12 }
 0x220   : > { %v4665_v27 = vadd.f32 %v9291_v43, %v4034_v13  ;;  %v4045_v5 = vrot.slane %v4044_v38, 2  ;;  %v7210_v61 = vpop.f32.mrb[48].mxu0  ;;  %v8008_v43 = vld [vmem:[%s8099_s30 + $0x2e0] sm:$0xff] }
 0x221   : > { %v4794_v49 = vmax.f32 %v4666_v52, 0.0  ;;  %v4053_v1 = vmax.f32 %v4051_v37, %v4052_v25  ;;  %v3640_v63 = vsel %vm8867_vm4, %v7210_v61, -1e+30  ;;  %v3185_v55 = vpop.f32.mrb[49].mxu0  ;;  %v2025_v35 = vpop.permute.xlu1 %2024  ;;  %v2317_v2 = vsel %vm2224_vm0, %v8008_v43, %v1513_v20 }
 0x222   : > { %v4793_v39 = vmax.f32 %v4665_v27, 0.0  ;;  %v4046_v15 = vmax.f32 %v4044_v38, %v4045_v5  ;;  %v4063_v51 = vsel %vm3719_vm5, %v3640_v63, -inf  ;;  %v3639_v29 = vsel %vm8867_vm4, %v3185_v55, -1e+30  ;;  %v1557_v3 = vpop.permute.xlu0 %1556 }
 0x223   : > { %v4054_v45 = vrot.slane %v4053_v1, 1  ;;  %v4064_v33 = vrot.slane %v4063_v51, 4  ;;  %v4056_v54 = vsel %vm3719_vm5, %v3639_v29, -inf  ;;  %v2446_v58 = vsel %vm2353_vm1, %v2317_v2, %v2025_v35 }
 0x224   : > { %v5095_v8 = vrot.slane %v4793_v39, 4  ;;  %v4047_v34 = vrot.slane %v4046_v15, 1  ;;  %v4057_v31 = vrot.slane %v4056_v54, 4  ;;  %v5097_v57 = vrot.slane %v4794_v49, 3  ;;  %7274 = vmatprep.mubr.msk.f32.mxu0 %vm2494_vm2, %v2446_v58 }
 0x225   : > { %v4055_v0 = vmax.f32 %v4053_v1, %v4054_v45  ;;  %v4065_v53 = vmax.f32 %v4063_v51, %v4064_v33  ;;  %v2027_v30 = vpop.permute.xlu1 %2026  ;;  %v2339_v9 = vsel %vm2224_vm0, %v8011_v19, %v1557_v3 }
 0x226   : > { %v4048_v44 = vmax.f32 %v4046_v15, %v4047_v34  ;;  %v4058_v23 = vmax.f32 %v4056_v54, %v4057_v31  ;;  %v2447_v60 = vsel %vm2353_vm1, %v2318_v59, %v2027_v30  ;;  %v1559_v11 = vpop.permute.xlu0 %1558  ;;  %v5096_v24 = vsel %vm5022_vm9, %v5095_v8, %v5094_v26  ;;  %v8013_v31 = vld [vmem:[%s8099_s30 + $0x2f0] sm:$0xff] }
 0x227   : > { %v4668_v17 = vadd.f32 %v9650_v48, %v4055_v0  ;;  %v4066_v41 = vrot.slane %v4065_v53, 2  ;;  %7275 = vmatmul.mubr.msk.f32.gmra.mrb[92].mxu0 %vm2494_vm2, %v2447_v60  ;;  %v5098_v46 = vsel %vm5025_vm10, %v5097_v57, %v5096_v24  ;;  %v2340_v32 = vsel %vm2224_vm0, %v8012_v7, %v1559_v11 }
 0x228   : > { %v4667_v56 = vadd.f32 %v9650_v48, %v4048_v44  ;;  %v4059_v50 = vrot.slane %v4058_v23, 2  ;;  %v7213_v40 = vpop.f32.mrb[50].mxu0 }
 0x229   : > { %v4067_v4 = vmax.f32 %v4065_v53, %v4066_v41  ;;  %v3642_v28 = vsel %vm8867_vm4, %v7213_v40, -1e+30  ;;  %v3195_v14 = vpop.f32.mrb[51].mxu0  ;;  %v2071_v16 = vpop.permute.xlu1 %2070  ;;  %v4796_v37 = vmax.f32 %v4668_v17, 0.0 }
 0x22a   : > { %v4795_v18 = vmax.f32 %v4667_v56, 0.0  ;;  %v4060_v10 = vmax.f32 %v4058_v23, %v4059_v50  ;;  %v4077_v12 = vsel %vm3719_vm5, %v3642_v28, -inf  ;;  %v3641_v13 = vsel %vm8867_vm4, %v3195_v14, -1e+30  ;;  %v2069_v38 = vpop.permute.xlu0 %2068 }
 0x22b   : > { %v4068_v20 = vrot.slane %v4067_v4, 1  ;;  %v4078_v52 = vrot.slane %v4077_v12, 4  ;;  %v4070_v25 = vsel %vm3719_vm5, %v3641_v13, -inf  ;;  %v2469_v26 = vsel %vm2353_vm1, %v2340_v32, %v2071_v16 }
 0x22c   : > { %v5099_v27 = vrot.slane %v4795_v18, 2  ;;  %v4061_v5 = vrot.slane %v4060_v10, 1  ;;  %v4071_v61 = vrot.slane %v4070_v25, 4  ;;  %v2468_v49 = vsel %vm2353_vm1, %v2339_v9, %v2069_v38  ;;  %v8014_v9 = vld [vmem:[%s8099_s30 + $0x2f8] sm:$0xff] }
 0x22d   : > { %v4069_v1 = vmax.f32 %v4067_v4, %v4068_v20  ;;  %v4079_v63 = vmax.f32 %v4077_v12, %v4078_v52  ;;  %7307 = vmatprep.mubr.msk.f32.mxu1 %vm2494_vm2, %v2468_v49  ;;  %v1519_v55 = vpop.permute.xlu1 %1518  ;;  %v5101_v35 = vrot.slane %v4796_v37, 1  ;;  %v8015_v52 = vld [vmem:[%s8099_s30 + $0x3a0] sm:$0xff] }
 0x22e   : > { %v4062_v39 = vmax.f32 %v4060_v10, %v4061_v5  ;;  %v4072_v15 = vmax.f32 %v4070_v25, %v4071_v61  ;;  %7308 = vmatmul.mubr.msk.f32.gmra.mrb[10].mxu1 %vm2494_vm2, %v2469_v26  ;;  %v1517_v51 = vpop.permute.xlu0 %1516  ;;  %v5100_v29 = vsel %vm5028_vm11, %v5099_v27, %v5098_v46  ;;  %v2320_v40 = vsel %vm2224_vm0, %v8014_v9, %v1519_v55 }
 0x22f   : > { %v4670_v3 = vadd.f32 %v9650_v48, %v4069_v1  ;;  %v4080_v45 = vrot.slane %v4079_v63, 2  ;;  %v9673_v43 = vsel %vm5031_vm12, %v5101_v35, %v5100_v29  ;;  %v2319_v58 = vsel %vm2224_vm0, %v8013_v31, %v1517_v51 }
 0x230   : > { %v4669_v2 = vadd.f32 %v9650_v48, %v4062_v39  ;;  %v4073_v33 = vrot.slane %v4072_v15, 2  ;;  %v7216_v54 = vpop.f32.mrb[52].mxu0  ;;  %v8016_v39 = vld [vmem:[%s8099_s30 + $0x3a8] sm:$0xff] }
 0x231   : > { %v4798_v8 = vmax.f32 %v4670_v3, 0.0  ;;  %v4081_v34 = vmax.f32 %v4079_v63, %v4080_v45  ;;  %v3644_v57 = vsel %vm8867_vm4, %v7216_v54, -1e+30  ;;  %v3205_v0 = vpop.f32.mrb[53].mxu0  ;;  %v2029_v42 = vpop.permute.xlu1 %2028 }
 0x232   : > { %v4797_v59 = vmax.f32 %v4669_v2, 0.0  ;;  %v4074_v53 = vmax.f32 %v4072_v15, %v4073_v33  ;;  %v4091_v30 = vsel %vm3719_vm5, %v3644_v57, -inf  ;;  %v3643_v44 = vsel %vm8867_vm4, %v3205_v0, -1e+30  ;;  %v1561_v23 = vpop.permute.xlu0 %1560 }
 0x233   : > { %v5103_v60 = vrot.slane %v4798_v8, 7  ;;  %v4082_v11 = vrot.slane %v4081_v34, 1  ;;  %v4092_v24 = vrot.slane %v4091_v30, 4  ;;  %v4084_v17 = vsel %vm3719_vm5, %v3643_v44, -inf }
 0x234   : > { %v4075_v41 = vrot.slane %v4074_v53, 1  ;;  %v4085_v46 = vrot.slane %v4084_v17, 4  ;;  %v2448_v56 = vsel %vm2353_vm1, %v2319_v58, %v2029_v42  ;;  %v2341_v25 = vsel %vm2224_vm0, %v8015_v52, %v1561_v23 }
 0x235   : > { %v5104_v50 = vsel %vm5013_vm6, %v5103_v60, %v4797_v59  ;;  %v4083_v19 = vmax.f32 %v4081_v34, %v4082_v11  ;;  %v4093_v4 = vmax.f32 %v4091_v30, %v4092_v24  ;;  %7277 = vmatprep.mubr.msk.f32.mxu0 %vm2494_vm2, %v2448_v56  ;;  %v2031_v7 = vpop.permute.xlu1 %2030 }
 0x236   : > { %v4076_v32 = vmax.f32 %v4074_v53, %v4075_v41  ;;  %v4086_v28 = vmax.f32 %v4084_v17, %v4085_v46  ;;  %v2449_v14 = vsel %vm2353_vm1, %v2320_v40, %v2031_v7  ;;  %v1563_v16 = vpop.permute.xlu0 %1562 }
 0x237   : > { %v4672_v37 = vadd.f32 %v9650_v48, %v4083_v19  ;;  %v4094_v18 = vrot.slane %v4093_v4, 2  ;;  %7278 = vmatmul.mubr.msk.f32.gmra.mrb[94].mxu0 %vm2494_vm2, %v2449_v14  ;;  %v2342_v15 = vsel %vm2224_vm0, %v8016_v39, %v1563_v16 }
 0x238   : > { %v4671_v10 = vadd.f32 %v9650_v48, %v4076_v32  ;;  %v4087_v12 = vrot.slane %v4086_v28, 2  ;;  %v7219_v13 = vpop.f32.mrb[54].mxu0  ;;  %v8017_v32 = vld [vmem:[%s8099_s30 + $0x300] sm:$0xff] }
 0x239   : > { %v4800_v38 = vmax.f32 %v4672_v37, 0.0  ;;  %v4095_v20 = vmax.f32 %v4093_v4, %v4094_v18  ;;  %v3646_v26 = vsel %vm8867_vm4, %v7219_v13, -1e+30  ;;  %v3215_v27 = vpop.f32.mrb[55].mxu0  ;;  %v2075_v5 = vpop.permute.xlu1 %2074 }
 0x23a   : > { %v4799_v61 = vmax.f32 %v4671_v10, 0.0  ;;  %v4088_v49 = vmax.f32 %v4086_v28, %v4087_v12  ;;  %v4105_v1 = vsel %vm3719_vm5, %v3646_v26, -inf  ;;  %v3645_v63 = vsel %vm8867_vm4, %v3215_v27, -1e+30  ;;  %v2073_v55 = vpop.permute.xlu0 %2072 }
 0x23b   : > { %v4096_v35 = vrot.slane %v4095_v20, 1  ;;  %v4106_v51 = vrot.slane %v4105_v1, 4  ;;  %v4098_v29 = vsel %vm3719_vm5, %v3645_v63, -inf  ;;  %v2471_v33 = vsel %vm2353_vm1, %v2342_v15, %v2075_v5 }
 0x23c   : > { %v5105_v3 = vrot.slane %v4799_v61, 6  ;;  %v4089_v45 = vrot.slane %v4088_v49, 1  ;;  %v4099_v2 = vrot.slane %v4098_v29, 4  ;;  %v5107_v54 = vrot.slane %v4800_v38, 5 }
 0x23d   : > { %v4097_v8 = vmax.f32 %v4095_v20, %v4096_v35  ;;  %v4107_v34 = vmax.f32 %v4105_v1, %v4106_v51  ;;  %v2470_v31 = vsel %vm2353_vm1, %v2341_v25, %v2073_v55  ;;  %v1523_v58 = vpop.permute.xlu1 %1522  ;;  %v8018_v20 = vld [vmem:[%s8099_s30 + $0x308] sm:$0xff] }
 0x23e   : > { %v5106_v57 = vsel %vm5016_vm7, %v5105_v3, %v5104_v50  ;;  %v4090_v0 = vmax.f32 %v4088_v49, %v4089_v45  ;;  %v4100_v42 = vmax.f32 %v4098_v29, %v4099_v2  ;;  %7310 = vmatprep.mubr.msk.f32.mxu1 %vm2494_vm2, %v2470_v31  ;;  %v1521_v59 = vpop.permute.xlu0 %1520  ;;  %v2322_v52 = vsel %vm2224_vm0, %v8018_v20, %v1523_v58  ;;  %v8019_v29 = vld [vmem:[%s8099_s30 + $0x3b0] sm:$0xff]  ;;  %v8020_v45 = vld [vmem:[%s8099_s30 + $0x3b8] sm:$0xff] }
 0x23f   : > { %v4674_v53 = vadd.f32 %v9650_v48, %v4097_v8  ;;  %v4108_v30 = vrot.slane %v4107_v34, 2  ;;  %7311 = vmatmul.mubr.msk.f32.gmra.mrb[12].mxu1 %vm2494_vm2, %v2471_v33  ;;  %v5108_v44 = vsel %vm5019_vm8, %v5107_v54, %v5106_v57  ;;  %v2321_v28 = vsel %vm2224_vm0, %v8017_v32, %v1521_v59 }
 0x240   : > { %v4673_v23 = vadd.f32 %v9650_v48, %v4090_v0  ;;  %v4101_v60 = vrot.slane %v4100_v42, 2  ;;  %v7222_v11 = vpop.f32.mrb[56].mxu0 }
 0x241   : > { %v4802_v24 = vmax.f32 %v4674_v53, 0.0  ;;  %v4109_v17 = vmax.f32 %v4107_v34, %v4108_v30  ;;  %v3648_v41 = vsel %vm8867_vm4, %v7222_v11, -1e+30  ;;  %v3225_v46 = vpop.f32.mrb[57].mxu0  ;;  %v2033_v56 = vpop.permute.xlu1 %2032 }
 0x242   : > { %v4801_v50 = vmax.f32 %v4673_v23, 0.0  ;;  %v4102_v19 = vmax.f32 %v4100_v42, %v4101_v60  ;;  %v4119_v9 = vsel %vm3719_vm5, %v3648_v41, -inf  ;;  %v3647_v40 = vsel %vm8867_vm4, %v3225_v46, -1e+30  ;;  %v1565_v4 = vpop.permute.xlu0 %1564 }
 0x243   : > { %v4110_v7 = vrot.slane %v4109_v17, 1  ;;  %v4120_v14 = vrot.slane %v4119_v9, 4  ;;  %v4112_v16 = vsel %vm3719_vm5, %v3647_v40, -inf  ;;  %v2450_v12 = vsel %vm2353_vm1, %v2321_v28, %v2033_v56 }
 0x244   : > { %v5109_v37 = vrot.slane %v4801_v50, 4  ;;  %v4103_v18 = vrot.slane %v4102_v19, 1  ;;  %v4113_v10 = vrot.slane %v4112_v16, 4  ;;  %v5111_v13 = vrot.slane %v4802_v24, 3  ;;  %7280 = vmatprep.mubr.msk.f32.mxu0 %vm2494_vm2, %v2450_v12 }
 0x245   : > { %v4111_v38 = vmax.f32 %v4109_v17, %v4110_v7  ;;  %v4121_v25 = vmax.f32 %v4119_v9, %v4120_v14  ;;  %v2035_v26 = vpop.permute.xlu1 %2034  ;;  %v2343_v3 = vsel %vm2224_vm0, %v8019_v29, %v1565_v4 }
 0x246   : > { %v4104_v27 = vmax.f32 %v4102_v19, %v4103_v18  ;;  %v4114_v5 = vmax.f32 %v4112_v16, %v4113_v10  ;;  %v2451_v61 = vsel %vm2353_vm1, %v2322_v52, %v2035_v26  ;;  %v1567_v49 = vpop.permute.xlu0 %1566  ;;  %v5110_v1 = vsel %vm5022_vm9, %v5109_v37, %v5108_v44  ;;  %v8021_v18 = vld [vmem:[%s8099_s30 + $0x310] sm:$0xff] }
 0x247   : > { %v4676_v63 = vadd.f32 %v9650_v48, %v4111_v38  ;;  %v4122_v55 = vrot.slane %v4121_v25, 2  ;;  %7281 = vmatmul.mubr.msk.f32.gmra.mrb[96].mxu0 %vm2494_vm2, %v2451_v61  ;;  %v5112_v35 = vsel %vm5025_vm10, %v5111_v13, %v5110_v1  ;;  %v2344_v2 = vsel %vm2224_vm0, %v8020_v45, %v1567_v49  ;;  %v8022_v1 = vld [vmem:[%s8099_s30 + $0x318] sm:$0xff] }
 0x248   : > { %v4675_v39 = vadd.f32 %v9650_v48, %v4104_v27  ;;  %v4115_v15 = vrot.slane %v4114_v5, 2 }
 0x249   : > { %v4123_v51 = vmax.f32 %v4121_v25, %v4122_v55  ;;  %v7225_v33 = vpop.f32.mrb[58].mxu0  ;;  %v2079_v54 = vpop.permute.xlu1 %2078  ;;  %v4804_v8 = vmax.f32 %v4676_v63, 0.0 }
 0x24a   : > { %v4803_v34 = vmax.f32 %v4675_v39, 0.0  ;;  %v4116_v31 = vmax.f32 %v4114_v5, %v4115_v15  ;;  %v3650_v58 = vsel %vm8867_vm4, %v7225_v33, -1e+30  ;;  %v3235_v57 = vpop.f32.mrb[59].mxu0  ;;  %v2473_v0 = vsel %vm2353_vm1, %v2344_v2, %v2079_v54  ;;  %v2077_v42 = vpop.permute.xlu0 %2076 }
 0x24b   : > { %v4124_v59 = vrot.slane %v4123_v51, 1  ;;  %v4133_v53 = vsel %vm3719_vm5, %v3650_v58, -inf  ;;  %v3649_v30 = vsel %vm8867_vm4, %v3235_v57, -1e+30  ;;  %v2472_v44 = vsel %vm2353_vm1, %v2343_v3, %v2077_v42  ;;  %v8023_v42 = vld [vmem:[%s8099_s30 + $0x3c8] sm:$0xff] }
 0x24c   : > { %v5113_v23 = vrot.slane %v4803_v34, 2  ;;  %v4117_v60 = vrot.slane %v4116_v31, 1  ;;  %v4134_v11 = vrot.slane %v4133_v53, 4  ;;  %v4126_v24 = vsel %vm3719_vm5, %v3649_v30, -inf  ;;  %7313 = vmatprep.mubr.msk.f32.mxu1 %vm2494_vm2, %v2472_v44 }
 0x24d   : > { %v4125_v17 = vmax.f32 %v4123_v51, %v4124_v59  ;;  %v4127_v41 = vrot.slane %v4126_v24, 4  ;;  %7314 = vmatmul.mubr.msk.f32.gmra.mrb[14].mxu1 %vm2494_vm2, %v2473_v0  ;;  %v1527_v46 = vpop.permute.xlu1 %1526  ;;  %v5115_v56 = vrot.slane %v4804_v8, 1 }
 0x24e   : > { %v4118_v50 = vmax.f32 %v4116_v31, %v4117_v60  ;;  %v4135_v19 = vmax.f32 %v4133_v53, %v4134_v11  ;;  %v1525_v9 = vpop.permute.xlu0 %1524  ;;  %v5114_v40 = vsel %vm5028_vm11, %v5113_v23, %v5112_v35  ;;  %v2324_v63 = vsel %vm2224_vm0, %v8022_v1, %v1527_v46  ;;  %v8024_v23 = vld [vmem:[%s8099_s30 + $0x3c0] sm:$0xff] }
 0x24f   : > { %v4678_v4 = vadd.f32 %v9650_v48, %v4125_v17  ;;  %v4128_v7 = vmax.f32 %v4126_v24, %v4127_v41  ;;  %v9746_v32 = vsel %vm5031_vm12, %v5115_v56, %v5114_v40  ;;  %v2323_v10 = vsel %vm2224_vm0, %v8021_v18, %v1525_v9 }
 0x250   : > { %v4677_v28 = vadd.f32 %v9650_v48, %v4118_v50  ;;  %v4136_v14 = vrot.slane %v4135_v19, 2 }
 0x251   : > { %v4806_v16 = vmax.f32 %v4678_v4, 0.0  ;;  %v4129_v37 = vrot.slane %v4128_v7, 2  ;;  %v2037_v12 = vpop.permute.xlu1 %2036  ;;  %v7228_v20 = vpop.f32.mrb[60].mxu0 }
 0x252   : > { %v4805_v13 = vmax.f32 %v4677_v28, 0.0  ;;  %v4137_v38 = vmax.f32 %v4135_v19, %v4136_v14  ;;  %v2452_v52 = vsel %vm2353_vm1, %v2323_v10, %v2037_v12  ;;  %v1569_v25 = vpop.permute.xlu0 %1568  ;;  %v3652_v5 = vsel %vm8867_vm4, %v7228_v20, -1e+30  ;;  %v3245_v61 = vpop.f32.mrb[61].mxu0 }
 0x253   : > { %v5117_v26 = vrot.slane %v4806_v16, 7  ;;  %v4130_v27 = vmax.f32 %v4128_v7, %v4129_v37  ;;  %7283 = vmatprep.mubr.msk.f32.mxu0 %vm2494_vm2, %v2452_v52  ;;  %v4147_v55 = vsel %vm3719_vm5, %v3652_v5, -inf  ;;  %v3651_v35 = vsel %vm8867_vm4, %v3245_v61, -1e+30 }
 0x254   : > { %v4138_v49 = vrot.slane %v4137_v38, 1  ;;  %v4148_v51 = vrot.slane %v4147_v55, 4  ;;  %v4140_v29 = vsel %vm3719_vm5, %v3651_v35, -inf  ;;  %v2345_v60 = vsel %vm2224_vm0, %v8024_v23, %v1569_v25 }
 0x255   : > { %v5118_v39 = vsel %vm5013_vm6, %v5117_v26, %v4805_v13  ;;  %v4131_v15 = vrot.slane %v4130_v27, 1  ;;  %v2039_v3 = vpop.permute.xlu1 %2038  ;;  %v4141_v2 = vrot.slane %v4140_v29, 4 }
 0x256   : > { %v4139_v45 = vmax.f32 %v4137_v38, %v4138_v49  ;;  %v2453_v33 = vsel %vm2353_vm1, %v2324_v63, %v2039_v3  ;;  %v1571_v54 = vpop.permute.xlu0 %1570  ;;  %v4149_v34 = vmax.f32 %v4147_v55, %v4148_v51  ;;  %v8025_v49 = vld [vmem:[%s8099_s30 + $0x320] sm:$0xff] }
 0x257   : > { %v4132_v8 = vmax.f32 %v4130_v27, %v4131_v15  ;;  %7284 = vmatmul.mubr.msk.f32.gmra.mrb[98].mxu0 %vm2494_vm2, %v2453_v33  ;;  %v4142_v58 = vmax.f32 %v4140_v29, %v4141_v2  ;;  %v2346_v59 = vsel %vm2224_vm0, %v8023_v42, %v1571_v54 }
 0x258   : > { %v4680_v31 = vadd.f32 %v9650_v48, %v4139_v45  ;;  %v4150_v0 = vrot.slane %v4149_v34, 2 }
 0x259   : > { %v4679_v57 = vadd.f32 %v9650_v48, %v4132_v8  ;;  %v2083_v53 = vpop.permute.xlu1 %2082  ;;  %v4143_v44 = vrot.slane %v4142_v58, 2  ;;  %v7231_v11 = vpop.f32.mrb[62].mxu0 }
 0x25a   : > { %v4808_v30 = vmax.f32 %v4680_v31, 0.0  ;;  %v2475_v24 = vsel %vm2353_vm1, %v2346_v59, %v2083_v53  ;;  %v2081_v17 = vpop.permute.xlu0 %2080  ;;  %v4151_v46 = vmax.f32 %v4149_v34, %v4150_v0  ;;  %v3654_v56 = vsel %vm8867_vm4, %v7231_v11, -1e+30  ;;  %v3255_v50 = vpop.f32.mrb[63].mxu0  ;;  %v8026_v0 = vld [vmem:[%s8099_s30 + $0x328] sm:$0xff] }
 0x25b   : > { %v4807_v41 = vmax.f32 %v4679_v57, 0.0  ;;  %v2474_v19 = vsel %vm2353_vm1, %v2345_v60, %v2081_v17  ;;  %v4144_v9 = vmax.f32 %v4142_v58, %v4143_v44  ;;  %v4161_v40 = vsel %vm3719_vm5, %v3654_v56, -inf }
 0x25c   : > { %v3653_v4 = vsel %vm8867_vm4, %v3255_v50, -1e+30  ;;  %7316 = vmatprep.mubr.msk.f32.mxu1 %vm2494_vm2, %v2474_v19  ;;  %v4152_v28 = vrot.slane %v4151_v46, 1  ;;  %v4162_v14 = vrot.slane %v4161_v40, 4  ;;  %v5121_v18 = vrot.slane %v4808_v30, 5  ;;  %v8027_v50 = vld [vmem:[%s8099_s30 + $0x3d0] sm:$0xff] }
 0x25d   : > { %v5119_v7 = vrot.slane %v4807_v41, 6  ;;  %v4154_v16 = vsel %vm3719_vm5, %v3653_v4, -inf  ;;  %7317 = vmatmul.mubr.msk.f32.gmra.mrb[16].mxu1 %vm2494_vm2, %v2475_v24  ;;  %v1531_v37 = vpop.permute.xlu1 %1530  ;;  %v4145_v10 = vrot.slane %v4144_v9, 1 }
 0x25e   : > { %v4155_v12 = vrot.slane %v4154_v16, 4  ;;  %v1529_v13 = vpop.permute.xlu0 %1528  ;;  %v4153_v20 = vmax.f32 %v4151_v46, %v4152_v28  ;;  %v4163_v52 = vmax.f32 %v4161_v40, %v4162_v14  ;;  %v2326_v42 = vsel %vm2224_vm0, %v8026_v0, %v1531_v37 }
 0x25f   : > { %v5120_v38 = vsel %vm5016_vm7, %v5119_v7, %v5118_v39  ;;  %v4146_v25 = vmax.f32 %v4144_v9, %v4145_v10  ;;  %v2325_v1 = vsel %vm2224_vm0, %v8025_v49, %v1529_v13  ;;  %v8028_v7 = vld [vmem:[%s8099_s30 + $0x3d8] sm:$0xff] }
 0x260   : > { %v4156_v26 = vmax.f32 %v4154_v16, %v4155_v12  ;;  %v5122_v27 = vsel %vm5019_vm8, %v5121_v18, %v5120_v38  ;;  %v4682_v5 = vadd.f32 %v9650_v48, %v4153_v20  ;;  %v4164_v61 = vrot.slane %v4163_v52, 2 }
 0x261   : > { %v7234_v63 = vpop.f32.mrb[64].mxu0  ;;  %v2041_v55 = vpop.permute.xlu1 %2040  ;;  %v4681_v35 = vadd.f32 %v9650_v48, %v4146_v25 }
 0x262   : > { %v4157_v15 = vrot.slane %v4156_v26, 2  ;;  %v3656_v39 = vsel %vm8867_vm4, %v7234_v63, -1e+30  ;;  %v3265_v51 = vpop.f32.mrb[65].mxu0  ;;  %v2454_v29 = vsel %vm2353_vm1, %v2325_v1, %v2041_v55  ;;  %v1573_v3 = vpop.permute.xlu0 %1572  ;;  %v4810_v45 = vmax.f32 %v4682_v5, 0.0 }
 0x263   : > { %v4165_v2 = vmax.f32 %v4163_v52, %v4164_v61  ;;  %v4175_v33 = vsel %vm3719_vm5, %v3656_v39, -inf  ;;  %v3655_v54 = vsel %vm8867_vm4, %v3265_v51, -1e+30  ;;  %7286 = vmatprep.mubr.msk.f32.mxu0 %vm2494_vm2, %v2454_v29  ;;  %v4809_v8 = vmax.f32 %v4681_v35, 0.0 }
 0x264   : > { %v4158_v34 = vmax.f32 %v4156_v26, %v4157_v15  ;;  %v4176_v31 = vrot.slane %v4175_v33, 4  ;;  %v4168_v58 = vsel %vm3719_vm5, %v3655_v54, -inf  ;;  %v5125_v24 = vrot.slane %v4810_v45, 3 }
 0x265   : > { %v4166_v57 = vrot.slane %v4165_v2, 1  ;;  %v4169_v59 = vrot.slane %v4168_v58, 4  ;;  %v2043_v53 = vpop.permute.xlu1 %2042  ;;  %v5123_v30 = vrot.slane %v4809_v8, 4  ;;  %v2347_v19 = vsel %vm2224_vm0, %v8027_v50, %v1573_v3 }
 0x266   : > { %v4159_v44 = vrot.slane %v4158_v34, 1  ;;  %v4177_v23 = vmax.f32 %v4175_v33, %v4176_v31  ;;  %v2455_v60 = vsel %vm2353_vm1, %v2326_v42, %v2043_v53  ;;  %v1575_v11 = vpop.permute.xlu0 %1574 }
 0x267   : > { %v4167_v17 = vmax.f32 %v4165_v2, %v4166_v57  ;;  %v4170_v41 = vmax.f32 %v4168_v58, %v4169_v59  ;;  %7287 = vmatmul.mubr.msk.f32.gmra.mrb[100].mxu0 %vm2494_vm2, %v2455_v60  ;;  %v5124_v9 = vsel %vm5022_vm9, %v5123_v30, %v5122_v27  ;;  %v2348_v28 = vsel %vm2224_vm0, %v8028_v7, %v1575_v11  ;;  %v8029_v57 = vld [vmem:[%s8099_s30 + $0x330] sm:$0xff] }
 0x268   : > { %v4160_v46 = vmax.f32 %v4158_v34, %v4159_v44  ;;  %v4178_v56 = vrot.slane %v4177_v23, 2  ;;  %v5126_v37 = vsel %vm5025_vm10, %v5125_v24, %v5124_v9 }
 0x269   : > { %v4684_v40 = vadd.f32 %v9650_v48, %v4167_v17  ;;  %v4171_v4 = vrot.slane %v4170_v41, 2  ;;  %v7237_v14 = vpop.f32.mrb[66].mxu0  ;;  %v2087_v16 = vpop.permute.xlu1 %2086 }
 0x26a   : > { %v4683_v18 = vadd.f32 %v9650_v48, %v4160_v46  ;;  %v4179_v10 = vmax.f32 %v4177_v23, %v4178_v56  ;;  %v3658_v12 = vsel %vm8867_vm4, %v7237_v14, -1e+30  ;;  %v3275_v13 = vpop.f32.mrb[67].mxu0  ;;  %v2477_v38 = vsel %vm2353_vm1, %v2348_v28, %v2087_v16  ;;  %v2085_v20 = vpop.permute.xlu0 %2084 }
 0x26b   : > { %v4172_v52 = vmax.f32 %v4170_v41, %v4171_v4  ;;  %v4189_v25 = vsel %vm3719_vm5, %v3658_v12, -inf  ;;  %v3657_v26 = vsel %vm8867_vm4, %v3275_v13, -1e+30  ;;  %v2476_v27 = vsel %vm2353_vm1, %v2347_v19, %v2085_v20 }
 0x26c   : > { %v4811_v5 = vmax.f32 %v4683_v18, 0.0  ;;  %v4180_v61 = vrot.slane %v4179_v10, 1  ;;  %v4190_v49 = vrot.slane %v4189_v25, 4  ;;  %v4182_v1 = vsel %vm3719_vm5, %v3657_v26, -inf  ;;  %7319 = vmatprep.mubr.msk.f32.mxu1 %vm2494_vm2, %v2476_v27  ;;  %v8031_v27 = vld [vmem:[%s8099_s30 + $0x3e8] sm:$0xff] }
 0x26d   : > { %v4173_v63 = vrot.slane %v4172_v52, 1  ;;  %v4183_v55 = vrot.slane %v4182_v1, 4  ;;  %7320 = vmatmul.mubr.msk.f32.gmra.mrb[18].mxu1 %vm2494_vm2, %v2477_v38  ;;  %v1535_v35 = vpop.permute.xlu1 %1534  ;;  %v4812_v15 = vmax.f32 %v4684_v40, 0.0  ;;  %v8030_v40 = vld [vmem:[%s8099_s30 + $0x338] sm:$0xff] }
 0x26e   : > { %v5127_v39 = vrot.slane %v4811_v5, 2  ;;  %v4181_v51 = vmax.f32 %v4179_v10, %v4180_v61  ;;  %v4191_v29 = vmax.f32 %v4189_v25, %v4190_v49  ;;  %v1533_v3 = vpop.permute.xlu0 %1532  ;;  %v2328_v4 = vsel %vm2224_vm0, %v8030_v40, %v1535_v35 }
 0x26f   : > { %v4174_v45 = vmax.f32 %v4172_v52, %v4173_v63  ;;  %v4184_v2 = vmax.f32 %v4182_v1, %v4183_v55  ;;  %v5129_v33 = vrot.slane %v4812_v15, 1  ;;  %v2327_v0 = vsel %vm2224_vm0, %v8029_v57, %v1533_v3  ;;  %v8032_v63 = vld [vmem:[%s8099_s30 + $0x3e0] sm:$0xff] }
 0x270   : > { %v4686_v54 = vadd.f32 %v9650_v48, %v4181_v51  ;;  %v4192_v8 = vrot.slane %v4191_v29, 2  ;;  %v5128_v34 = vsel %vm5028_vm11, %v5127_v39, %v5126_v37 }
 0x271   : > { %v4685_v31 = vadd.f32 %v9650_v48, %v4174_v45  ;;  %v4185_v58 = vrot.slane %v4184_v2, 2  ;;  %v2045_v42 = vpop.permute.xlu1 %2044  ;;  %v9822_v59 = vsel %vm5031_vm12, %v5129_v33, %v5128_v34 }
 0x272   : > { %v4814_v53 = vmax.f32 %v4686_v54, 0.0  ;;  %v4193_v30 = vmax.f32 %v4191_v29, %v4192_v8  ;;  %v7240_v44 = vpop.f32.mrb[68].mxu0  ;;  %v2456_v23 = vsel %vm2353_vm1, %v2327_v0, %v2045_v42  ;;  %v1577_v60 = vpop.permute.xlu0 %1576 }
 0x273   : > { %v4813_v11 = vmax.f32 %v4685_v31, 0.0  ;;  %v4186_v24 = vmax.f32 %v4184_v2, %v4185_v58  ;;  %v3660_v17 = vsel %vm8867_vm4, %v7240_v44, -1e+30  ;;  %v3285_v41 = vpop.f32.mrb[69].mxu0  ;;  %7289 = vmatprep.mubr.msk.f32.mxu0 %vm2494_vm2, %v2456_v23  ;;  %v2349_v55 = vsel %vm2224_vm0, %v8032_v63, %v1577_v60 }
 0x274   : > { %v5131_v46 = vrot.slane %v4814_v53, 7  ;;  %v4194_v56 = vrot.slane %v4193_v30, 1  ;;  %v4203_v50 = vsel %vm3719_vm5, %v3660_v17, -inf  ;;  %v3659_v19 = vsel %vm8867_vm4, %v3285_v41, -1e+30 }
 0x275   : > { %v4187_v9 = vrot.slane %v4186_v24, 1  ;;  %v4204_v7 = vrot.slane %v4203_v50, 4  ;;  %v4196_v28 = vsel %vm3719_vm5, %v3659_v19, -inf  ;;  %v2047_v14 = vpop.permute.xlu1 %2046 }
 0x276   : > { %v5132_v16 = vsel %vm5013_vm6, %v5131_v46, %v4813_v11  ;;  %v4195_v37 = vmax.f32 %v4193_v30, %v4194_v56  ;;  %v4197_v18 = vrot.slane %v4196_v28, 4  ;;  %v2457_v10 = vsel %vm2353_vm1, %v2328_v4, %v2047_v14  ;;  %v1579_v12 = vpop.permute.xlu0 %1578 }
 0x277   : > { %v4188_v13 = vmax.f32 %v4186_v24, %v4187_v9  ;;  %v4205_v38 = vmax.f32 %v4203_v50, %v4204_v7  ;;  %7290 = vmatmul.mubr.msk.f32.gmra.mrb[102].mxu0 %vm2494_vm2, %v2457_v10  ;;  %v2350_v5 = vsel %vm2224_vm0, %v8031_v27, %v1579_v12  ;;  %v8033_v50 = vld [vmem:[%s8099_s30 + $0x3f8] sm:$0xff]  ;;  %v8034_v7 = vld [vmem:[%s8099_s30 + $0x3f0] sm:$0xff] }
 0x278   : > { %v4688_v20 = vadd.f32 %v9650_v48, %v4195_v37  ;;  %v4198_v52 = vmax.f32 %v4196_v28, %v4197_v18 }
 0x279   : > { %v4687_v25 = vadd.f32 %v9650_v48, %v4188_v13  ;;  %v4206_v26 = vrot.slane %v4205_v38, 2  ;;  %v2091_v61 = vpop.permute.xlu1 %2090 }
 0x27a   : > { %v4816_v49 = vmax.f32 %v4688_v20, 0.0  ;;  %v4199_v1 = vrot.slane %v4198_v52, 2  ;;  %v7243_v35 = vpop.f32.mrb[70].mxu0  ;;  %v2479_v15 = vsel %vm2353_vm1, %v2350_v5, %v2091_v61  ;;  %v2089_v39 = vpop.permute.xlu0 %2088 }
 0x27b   : > { %v4815_v51 = vmax.f32 %v4687_v25, 0.0  ;;  %v4207_v29 = vmax.f32 %v4205_v38, %v4206_v26  ;;  %v3662_v3 = vsel %vm8867_vm4, %v7243_v35, -1e+30  ;;  %v3295_v45 = vpop.f32.mrb[71].mxu0  ;;  %v2478_v2 = vsel %vm2353_vm1, %v2349_v55, %v2089_v39 }
 0x27c   : > { %v4200_v33 = vmax.f32 %v4198_v52, %v4199_v1  ;;  %v4217_v54 = vsel %vm3719_vm5, %v3662_v3, -inf  ;;  %v3661_v8 = vsel %vm8867_vm4, %v3295_v45, -1e+30  ;;  %7322 = vmatprep.mubr.msk.f32.mxu1 %vm2494_vm2, %v2478_v2  ;;  %v5135_v42 = vrot.slane %v4816_v49, 5 }
 0x27d   : > { %v5133_v34 = vrot.slane %v4815_v51, 6  ;;  %v4208_v31 = vrot.slane %v4207_v29, 1  ;;  %v4218_v58 = vrot.slane %v4217_v54, 4  ;;  %v4210_v57 = vsel %vm3719_vm5, %v3661_v8, -inf  ;;  %7323 = vmatmul.mubr.msk.f32.gmra.mrb[20].mxu1 %vm2494_vm2, %v2479_v15  ;;  %v1583_v0 = vpop.permute.xlu1 %1582 }
 0x27e   : > { %v4201_v53 = vrot.slane %v4200_v33, 1  ;;  %v4211_v30 = vrot.slane %v4210_v57, 4  ;;  %v1581_v44 = vpop.permute.xlu0 %1580  ;;  %v2352_v19 = vsel %vm2224_vm0, %v8033_v50, %v1583_v0 }
 0x27f   : > { %v5134_v23 = vsel %vm5016_vm7, %v5133_v34, %v5132_v16  ;;  %v4209_v60 = vmax.f32 %v4207_v29, %v4208_v31  ;;  %v4219_v11 = vmax.f32 %v4217_v54, %v4218_v58  ;;  %v2351_v28 = vsel %vm2224_vm0, %v8034_v7, %v1581_v44 }
 0x280   : > { %v4202_v24 = vmax.f32 %v4200_v33, %v4201_v53  ;;  %v4212_v17 = vmax.f32 %v4210_v57, %v4211_v30  ;;  %v5136_v41 = vsel %vm5019_vm8, %v5135_v42, %v5134_v23 }
 0x281   : > { %v4690_v46 = vadd.f32 %v9650_v48, %v4209_v60  ;;  %v4220_v56 = vrot.slane %v4219_v11, 2  ;;  %v2095_v9 = vpop.permute.xlu1 %2094 }
 0x282   : > { %v4689_v40 = vadd.f32 %v9650_v48, %v4202_v24  ;;  %v4213_v4 = vrot.slane %v4212_v17, 2  ;;  %v7246_v14 = vpop.f32.mrb[72].mxu0  ;;  %v2481_v16 = vsel %vm2353_vm1, %v2352_v19, %v2095_v9  ;;  %v2093_v37 = vpop.permute.xlu0 %2092 }
 0x283   : > { %v4818_v18 = vmax.f32 %v4690_v46, 0.0  ;;  %v4221_v10 = vmax.f32 %v4219_v11, %v4220_v56  ;;  %v3664_v12 = vsel %vm8867_vm4, %v7246_v14, -1e+30  ;;  %v3305_v13 = vpop.f32.mrb[73].mxu0  ;;  %v2480_v38 = vsel %vm2353_vm1, %v2351_v28, %v2093_v37 }
 0x284   : > { %v4817_v20 = vmax.f32 %v4689_v40, 0.0  ;;  %v4214_v52 = vmax.f32 %v4212_v17, %v4213_v4  ;;  %v4231_v25 = vsel %vm3719_vm5, %v3664_v12, -inf  ;;  %v3663_v26 = vsel %vm8867_vm4, %v3305_v13, -1e+30  ;;  %7325 = vmatprep.mubr.msk.f32.mxu1 %vm2494_vm2, %v2480_v38 }
 0x285   : > { %v4222_v27 = vrot.slane %v4221_v10, 1  ;;  %v4232_v5 = vrot.slane %v4231_v25, 4  ;;  %v4224_v61 = vsel %vm3719_vm5, %v3663_v26, -inf  ;;  %7326 = vmatmul.mubr.msk.f32.gmra.mrb[22].mxu1 %vm2494_vm2, %v2481_v16  ;;  %v5139_v55 = vrot.slane %v4818_v18, 3 }
 0x286   : > { %v5137_v49 = vrot.slane %v4817_v20, 4  ;;  %v4215_v1 = vrot.slane %v4214_v52, 1  ;;  %v4225_v63 = vrot.slane %v4224_v61, 4  ;;  %7332 = vmatprep.mubr.msk.f32.mxu1 %vm3719_vm5, %v9073_v36 }
 0x287   : > { %v4223_v35 = vmax.f32 %v4221_v10, %v4222_v27  ;;  %v4233_v15 = vmax.f32 %v4231_v25, %v4232_v5 }
 0x288   : > { %v4216_v39 = vmax.f32 %v4214_v52, %v4215_v1  ;;  %v4226_v51 = vmax.f32 %v4224_v61, %v4225_v63  ;;  %v5138_v29 = vsel %vm5022_vm9, %v5137_v49, %v5136_v41 }
 0x289   : > { %v4692_v3 = vadd.f32 %v9650_v48, %v4223_v35  ;;  %v4234_v45 = vrot.slane %v4233_v15, 2  ;;  %v7249_v2 = vpop.f32.mrb[74].mxu0  ;;  %7333 = vmatmul.mubr.msk.f32.vlgmr.msra.gmra.mrb[24].mxu1 %vm3719_vm5, %v9193_v47  ;;  %v5140_v33 = vsel %vm5025_vm10, %v5139_v55, %v5138_v29 }
 0x28a   : > { %v4691_v54 = vadd.f32 %v9650_v48, %v4216_v39  ;;  %v4227_v8 = vrot.slane %v4226_v51, 2  ;;  %v3666_v34 = vsel %vm8867_vm4, %v7249_v2, -1e+30  ;;  %v3315_v31 = vpop.f32.mrb[75].mxu0  ;;  %7335 = vmatprep.mubr.msk.f32.mxu1 %vm3719_vm5, %v9325_v21 }
 0x28b   : > { %v4235_v58 = vmax.f32 %v4233_v15, %v4234_v45  ;;  %v4245_v57 = vsel %vm3719_vm5, %v3666_v34, -inf  ;;  %v3665_v0 = vsel %vm8867_vm4, %v3315_v31, -1e+30  ;;  %v4820_v42 = vmax.f32 %v4692_v3, 0.0 }
 0x28c   : > { %v4819_v53 = vmax.f32 %v4691_v54, 0.0  ;;  %v4228_v30 = vmax.f32 %v4226_v51, %v4227_v8  ;;  %v4246_v44 = vrot.slane %v4245_v57, 4  ;;  %v4238_v23 = vsel %vm3719_vm5, %v3665_v0, -inf }
 0x28d   : > { %v4236_v60 = vrot.slane %v4235_v58, 1  ;;  %v4239_v11 = vrot.slane %v4238_v23, 4  ;;  %7336 = vmatmul.mubr.msk.f32.gmra.mrb[26].mxu1 %vm3719_vm5, %v9459_v22  ;;  %v5143_v50 = vrot.slane %v4820_v42, 1 }
 0x28e   : > { %v5141_v24 = vrot.slane %v4819_v53, 2  ;;  %v4229_v17 = vrot.slane %v4228_v30, 1  ;;  %v4247_v41 = vmax.f32 %v4245_v57, %v4246_v44  ;;  %7338 = vmatprep.mubr.msk.f32.mxu1 %vm3719_vm5, %v9594_v6 }
 0x28f   : > { %v4237_v46 = vmax.f32 %v4235_v58, %v4236_v60  ;;  %v4240_v56 = vmax.f32 %v4238_v23, %v4239_v11 }
 0x290   : > { %v4230_v19 = vmax.f32 %v4228_v30, %v4229_v17  ;;  %v4248_v9 = vrot.slane %v4247_v41, 2  ;;  %v5142_v40 = vsel %vm5028_vm11, %v5141_v24, %v5140_v33 }
 0x291   : > { %v4694_v4 = vadd.f32 %v9650_v48, %v4237_v46  ;;  %v4241_v7 = vrot.slane %v4240_v56, 2  ;;  %7339 = vmatmul.mubr.msk.f32.gmra.mrb[28].mxu1 %vm3719_vm5, %v9673_v43  ;;  %v9896_v28 = vsel %vm5031_vm12, %v5143_v50, %v5142_v40  ;;  %v9926_v40 = vld [vmem:[%s10679_s2] ss:$0 sm:$0xff] }
 0x292   : > { %v4693_v14 = vadd.f32 %v9650_v48, %v4230_v19  ;;  %v4249_v16 = vmax.f32 %v4247_v41, %v4248_v9  ;;  %v7252_v37 = vpop.f32.mrb[76].mxu0  ;;  %7341 = vmatprep.mubr.msk.f32.mxu1 %vm3719_vm5, %v9746_v32 }
 0x293   : > { %v4822_v18 = vmax.f32 %v4694_v4, 0.0  ;;  %v4242_v10 = vmax.f32 %v4240_v56, %v4241_v7  ;;  %v3668_v12 = vsel %vm8867_vm4, %v7252_v37, -1e+30  ;;  %v3325_v13 = vpop.f32.mrb[77].mxu0 }
 0x294   : > { %v4821_v38 = vmax.f32 %v4693_v14, 0.0  ;;  %v4250_v20 = vrot.slane %v4249_v16, 1  ;;  %v4259_v52 = vsel %vm3719_vm5, %v3668_v12, -inf  ;;  %v3667_v25 = vsel %vm8867_vm4, %v3325_v13, -1e+30 }
 0x295   : > { %v5145_v26 = vrot.slane %v4822_v18, 7  ;;  %v4243_v27 = vrot.slane %v4242_v10, 1  ;;  %v4260_v5 = vrot.slane %v4259_v52, 4  ;;  %v4252_v61 = vsel %vm3719_vm5, %v3667_v25, -inf  ;;  %7342 = vmatmul.mubr.msk.f32.gmra.mrb[30].mxu1 %vm3719_vm5, %v9822_v59 }
 0x296   : > { %v4251_v49 = vmax.f32 %v4249_v16, %v4250_v20  ;;  %v4253_v1 = vrot.slane %v4252_v61, 4  ;;  %7344 = vmatprep.mubr.msk.f32.mxu1 %vm3719_vm5, %v9896_v28 }
 0x297   : > { %v5146_v63 = vsel %vm5013_vm6, %v5145_v26, %v4821_v38  ;;  %v4244_v55 = vmax.f32 %v4242_v10, %v4243_v27  ;;  %v4261_v35 = vmax.f32 %v4259_v52, %v4260_v5 }
 0x298   : > { %v4696_v15 = vadd.f32 %v9650_v48, %v4251_v49  ;;  %v4254_v39 = vmax.f32 %v4252_v61, %v4253_v1 }
 0x299   : > { %v4695_v51 = vadd.f32 %v9650_v48, %v4244_v55  ;;  %v4262_v29 = vrot.slane %v4261_v35, 2 }
 0x29a   : > { %v4824_v3 = vmax.f32 %v4696_v15, 0.0  ;;  %v4255_v45 = vrot.slane %v4254_v39, 2  ;;  %v7255_v2 = vpop.f32.mrb[78].mxu0 }
 0x29b   : > { %v4823_v33 = vmax.f32 %v4695_v51, 0.0  ;;  %v4263_v54 = vmax.f32 %v4261_v35, %v4262_v29  ;;  %v3670_v8 = vsel %vm8867_vm4, %v7255_v2, -1e+30  ;;  %v3335_v34 = vpop.f32.mrb[79].mxu0 }
 0x29c   : > { %v4256_v31 = vmax.f32 %v4254_v39, %v4255_v45  ;;  %v4273_v58 = vsel %vm3719_vm5, %v3670_v8, -inf  ;;  %v3669_v57 = vsel %vm8867_vm4, %v3335_v34, -1e+30  ;;  %v5149_v44 = vrot.slane %v4824_v3, 5 }
 0x29d   : > { %v5147_v0 = vrot.slane %v4823_v33, 6  ;;  %v4264_v42 = vrot.slane %v4263_v54, 1  ;;  %v4274_v53 = vrot.slane %v4273_v58, 4  ;;  %v4266_v30 = vsel %vm3719_vm5, %v3669_v57, -inf }
 0x29e   : > { %v4257_v23 = vrot.slane %v4256_v31, 1  ;;  %v4267_v60 = vrot.slane %v4266_v30, 4 }
 0x29f   : > { %v5148_v11 = vsel %vm5016_vm7, %v5147_v0, %v5146_v63  ;;  %v4265_v24 = vmax.f32 %v4263_v54, %v4264_v42  ;;  %v4275_v17 = vmax.f32 %v4273_v58, %v4274_v53 }
 0x2a0   : > { %v4258_v41 = vmax.f32 %v4256_v31, %v4257_v23  ;;  %v4268_v46 = vmax.f32 %v4266_v30, %v4267_v60  ;;  %v5150_v56 = vsel %vm5019_vm8, %v5149_v44, %v5148_v11 }
 0x2a1   : > { %v4698_v50 = vadd.f32 %v9650_v48, %v4265_v24  ;;  %v4276_v19 = vrot.slane %v4275_v17, 2  ;;  %v7258_v9 = vpop.f32.mrb[80].mxu0 }
 0x2a2   : > { %v4697_v4 = vadd.f32 %v9926_v40, %v4258_v41  ;;  %v4269_v7 = vrot.slane %v4268_v46, 2  ;;  %v3672_v14 = vsel %vm8867_vm4, %v7258_v9, -1e+30  ;;  %v3345_v16 = vpop.f32.mrb[81].mxu0 }
 0x2a3   : > { %v4826_v37 = vmax.f32 %v4698_v50, 0.0  ;;  %v4277_v18 = vmax.f32 %v4275_v17, %v4276_v19  ;;  %v4287_v10 = vsel %vm3719_vm5, %v3672_v14, -inf  ;;  %v3671_v48 = vsel %vm8867_vm4, %v3345_v16, -1e+30 }
 0x2a4   : > { %v4825_v12 = vmax.f32 %v4697_v4, 0.0  ;;  %v4270_v13 = vmax.f32 %v4268_v46, %v4269_v7  ;;  %v4288_v38 = vrot.slane %v4287_v10, 4  ;;  %v4280_v20 = vsel %vm3719_vm5, %v3671_v48, -inf }
 0x2a5   : > { %v4278_v52 = vrot.slane %v4277_v18, 1  ;;  %v4281_v25 = vrot.slane %v4280_v20, 4  ;;  %v5153_v61 = vrot.slane %v4826_v37, 3 }
 0x2a6   : > { %v5151_v26 = vrot.slane %v4825_v12, 4  ;;  %v4271_v27 = vrot.slane %v4270_v13, 1  ;;  %v4289_v5 = vmax.f32 %v4287_v10, %v4288_v38 }
 0x2a7   : > { %v4279_v49 = vmax.f32 %v4277_v18, %v4278_v52  ;;  %v4282_v1 = vmax.f32 %v4280_v20, %v4281_v25 }
 0x2a8   : > { %v4272_v63 = vmax.f32 %v4270_v13, %v4271_v27  ;;  %v4290_v55 = vrot.slane %v4289_v5, 2  ;;  %v5152_v35 = vsel %vm5022_vm9, %v5151_v26, %v5150_v56 }
 0x2a9   : > { %v4700_v15 = vadd.f32 %v9926_v40, %v4279_v49  ;;  %v4283_v39 = vrot.slane %v4282_v1, 2  ;;  %v5154_v51 = vsel %vm5025_vm10, %v5153_v61, %v5152_v35 }
 0x2aa   : > { %v4699_v29 = vadd.f32 %v9926_v40, %v4272_v63  ;;  %v4291_v3 = vmax.f32 %v4289_v5, %v4290_v55  ;;  %v7261_v45 = vpop.f32.mrb[82].mxu0 }
 0x2ab   : > { %v4284_v2 = vmax.f32 %v4282_v1, %v4283_v39  ;;  %v3674_v33 = vsel %vm8867_vm4, %v7261_v45, -1e+30  ;;  %v3355_v54 = vpop.f32.mrb[83].mxu0  ;;  %v4828_v8 = vmax.f32 %v4700_v15, 0.0 }
 0x2ac   : > { %v4827_v34 = vmax.f32 %v4699_v29, 0.0  ;;  %v4292_v31 = vrot.slane %v4291_v3, 1  ;;  %v4301_v58 = vsel %vm3719_vm5, %v3674_v33, -inf  ;;  %v3673_v57 = vsel %vm8867_vm4, %v3355_v54, -1e+30 }
 0x2ad   : > { %v4285_v0 = vrot.slane %v4284_v2, 1  ;;  %v4302_v42 = vrot.slane %v4301_v58, 4  ;;  %v4294_v53 = vsel %vm3719_vm5, %v3673_v57, -inf  ;;  %v5157_v24 = vrot.slane %v4828_v8, 1 }
 0x2ae   : > { %v5155_v30 = vrot.slane %v4827_v34, 2  ;;  %v4293_v44 = vmax.f32 %v4291_v3, %v4292_v31  ;;  %v4295_v23 = vrot.slane %v4294_v53, 4 }
 0x2af   : > { %v4286_v60 = vmax.f32 %v4284_v2, %v4285_v0  ;;  %v4303_v11 = vmax.f32 %v4301_v58, %v4302_v42 }
 0x2b0   : > { %v4702_v17 = vadd.f32 %v9926_v40, %v4293_v44  ;;  %v4296_v41 = vmax.f32 %v4294_v53, %v4295_v23  ;;  %v5156_v46 = vsel %vm5028_vm11, %v5155_v30, %v5154_v51 }
 0x2b1   : > { %v4701_v56 = vadd.f32 %v9926_v40, %v4286_v60  ;;  %v4304_v50 = vrot.slane %v4303_v11, 2  ;;  %v9949_v19 = vsel %vm5031_vm12, %v5157_v24, %v5156_v46 }
 0x2b2   : > { %v4830_v9 = vmax.f32 %v4702_v17, 0.0  ;;  %v4297_v4 = vrot.slane %v4296_v41, 2  ;;  %v7294_v7 = vpop.f32.mrb[0].mxu1  ;;  %7345 = vmatmul.mubr.msk.f32.gmra.mrb[32].mxu1 %vm3719_vm5, %v9949_v19 }
 0x2b3   : > { %v4829_v14 = vmax.f32 %v4701_v56, 0.0  ;;  %v4305_v16 = vmax.f32 %v4303_v11, %v4304_v50  ;;  %v3696_v37 = vsel %vm8867_vm4, %v7294_v7, -1e+30  ;;  %v3465_v18 = vpop.f32.mrb[1].mxu1 }
 0x2b4   : > { %v5159_v10 = vrot.slane %v4830_v9, 7  ;;  %v4298_v48 = vmax.f32 %v4296_v41, %v4297_v4  ;;  %v4455_v12 = vsel %vm3719_vm5, %v3696_v37, -inf  ;;  %v3695_v13 = vsel %vm8867_vm4, %v3465_v18, -1e+30 }
 0x2b5   : > { %v4306_v38 = vrot.slane %v4305_v16, 1  ;;  %v4456_v20 = vrot.slane %v4455_v12, 4  ;;  %v4448_v52 = vsel %vm3719_vm5, %v3695_v13, -inf }
 0x2b6   : > { %v5160_v25 = vsel %vm5013_vm6, %v5159_v10, %v4829_v14  ;;  %v4299_v26 = vrot.slane %v4298_v48, 1  ;;  %v4449_v27 = vrot.slane %v4448_v52, 4 }
 0x2b7   : > { %v4307_v5 = vmax.f32 %v4305_v16, %v4306_v38  ;;  %v4457_v61 = vmax.f32 %v4455_v12, %v4456_v20 }
 0x2b8   : > { %v4300_v49 = vmax.f32 %v4298_v48, %v4299_v26  ;;  %v4450_v1 = vmax.f32 %v4448_v52, %v4449_v27 }
 0x2b9   : > { %v4704_v63 = vadd.f32 %v9926_v40, %v4307_v5  ;;  %v4458_v55 = vrot.slane %v4457_v61, 2 }
 0x2ba   : > { %v4703_v35 = vadd.f32 %v9926_v40, %v4300_v49  ;;  %v4451_v15 = vrot.slane %v4450_v1, 2  ;;  %v7264_v39 = vpop.f32.mrb[84].mxu0 }
 0x2bb   : > { %v4832_v51 = vmax.f32 %v4704_v63, 0.0  ;;  %v4459_v29 = vmax.f32 %v4457_v61, %v4458_v55  ;;  %v3676_v3 = vsel %vm8867_vm4, %v7264_v39, -1e+30  ;;  %v3365_v45 = vpop.f32.mrb[85].mxu0 }
 0x2bc   : > { %v4831_v2 = vmax.f32 %v4703_v35, 0.0  ;;  %v4452_v33 = vmax.f32 %v4450_v1, %v4451_v15  ;;  %v4315_v54 = vsel %vm3719_vm5, %v3676_v3, -inf  ;;  %v3675_v8 = vsel %vm8867_vm4, %v3365_v45, -1e+30 }
 0x2bd   : > { %v4460_v34 = vrot.slane %v4459_v29, 1  ;;  %v4316_v31 = vrot.slane %v4315_v54, 4  ;;  %v4308_v58 = vsel %vm3719_vm5, %v3675_v8, -inf  ;;  %v5163_v53 = vrot.slane %v4832_v51, 5 }
 0x2be   : > { %v5161_v57 = vrot.slane %v4831_v2, 6  ;;  %v4453_v0 = vrot.slane %v4452_v33, 1  ;;  %v4309_v42 = vrot.slane %v4308_v58, 4 }
 0x2bf   : > { %v4461_v30 = vmax.f32 %v4459_v29, %v4460_v34  ;;  %v4317_v44 = vmax.f32 %v4315_v54, %v4316_v31 }
 0x2c0   : > { %v5162_v23 = vsel %vm5016_vm7, %v5161_v57, %v5160_v25  ;;  %v4454_v60 = vmax.f32 %v4452_v33, %v4453_v0  ;;  %v4310_v11 = vmax.f32 %v4308_v58, %v4309_v42 }
 0x2c1   : > { %v4726_v24 = vadd.f32 %v9926_v40, %v4461_v30  ;;  %v4318_v17 = vrot.slane %v4317_v44, 2  ;;  %v7297_v41 = vpop.f32.mrb[2].mxu1  ;;  %v5164_v46 = vsel %vm5019_vm8, %v5163_v53, %v5162_v23 }
 0x2c2   : > { %v4725_v56 = vadd.f32 %v9926_v40, %v4454_v60  ;;  %v4311_v50 = vrot.slane %v4310_v11, 2  ;;  %v3698_v9 = vsel %vm8867_vm4, %v7297_v41, -1e+30  ;;  %v3475_v4 = vpop.f32.mrb[3].mxu1 }
 0x2c3   : > { %v4854_v7 = vmax.f32 %v4726_v24, 0.0  ;;  %v4319_v14 = vmax.f32 %v4317_v44, %v4318_v17  ;;  %v4469_v16 = vsel %vm3719_vm5, %v3698_v9, -inf  ;;  %v3697_v37 = vsel %vm8867_vm4, %v3475_v4, -1e+30 }
 0x2c4   : > { %v4853_v18 = vmax.f32 %v4725_v56, 0.0  ;;  %v4312_v10 = vmax.f32 %v4310_v11, %v4311_v50  ;;  %v4470_v48 = vrot.slane %v4469_v16, 4  ;;  %v4462_v12 = vsel %vm3719_vm5, %v3697_v37, -inf }
 0x2c5   : > { %v5201_v13 = vrot.slane %v4854_v7, 7  ;;  %v4320_v38 = vrot.slane %v4319_v14, 1  ;;  %v4463_v20 = vrot.slane %v4462_v12, 4 }
 0x2c6   : > { %v4313_v52 = vrot.slane %v4312_v10, 1  ;;  %v4471_v25 = vmax.f32 %v4469_v16, %v4470_v48 }
 0x2c7   : > { %v5202_v26 = vsel %vm5013_vm6, %v5201_v13, %v4853_v18  ;;  %v4321_v27 = vmax.f32 %v4319_v14, %v4320_v38  ;;  %v4464_v5 = vmax.f32 %v4462_v12, %v4463_v20 }
 0x2c8   : > { %v4314_v61 = vmax.f32 %v4312_v10, %v4313_v52  ;;  %v4472_v49 = vrot.slane %v4471_v25, 2 }
 0x2c9   : > { %v4706_v1 = vadd.f32 %v9926_v40, %v4321_v27  ;;  %v4465_v63 = vrot.slane %v4464_v5, 2 }
 0x2ca   : > { %v4705_v55 = vadd.f32 %v9926_v40, %v4314_v61  ;;  %v4473_v35 = vmax.f32 %v4471_v25, %v4472_v49  ;;  %v7267_v15 = vpop.f32.mrb[86].mxu0 }
 0x2cb   : > { %v4834_v39 = vmax.f32 %v4706_v1, 0.0  ;;  %v4466_v51 = vmax.f32 %v4464_v5, %v4465_v63  ;;  %v3678_v29 = vsel %vm8867_vm4, %v7267_v15, -1e+30  ;;  %v3375_v3 = vpop.f32.mrb[87].mxu0 }
 0x2cc   : > { %v4833_v45 = vmax.f32 %v4705_v55, 0.0  ;;  %v4474_v2 = vrot.slane %v4473_v35, 1  ;;  %v4329_v33 = vsel %vm3719_vm5, %v3678_v29, -inf  ;;  %v3677_v54 = vsel %vm8867_vm4, %v3375_v3, -1e+30 }
 0x2cd   : > { %v4467_v8 = vrot.slane %v4466_v51, 1  ;;  %v4330_v34 = vrot.slane %v4329_v33, 4  ;;  %v4322_v31 = vsel %vm3719_vm5, %v3677_v54, -inf  ;;  %v5167_v42 = vrot.slane %v4834_v39, 3 }
 0x2ce   : > { %v5165_v58 = vrot.slane %v4833_v45, 4  ;;  %v4475_v57 = vmax.f32 %v4473_v35, %v4474_v2  ;;  %v4323_v0 = vrot.slane %v4322_v31, 4 }
 0x2cf   : > { %v4468_v53 = vmax.f32 %v4466_v51, %v4467_v8  ;;  %v4331_v30 = vmax.f32 %v4329_v33, %v4330_v34 }
 0x2d0   : > { %v4728_v44 = vadd.f32 %v9926_v40, %v4475_v57  ;;  %v4324_v23 = vmax.f32 %v4322_v31, %v4323_v0  ;;  %v5166_v60 = vsel %vm5022_vm9, %v5165_v58, %v5164_v46 }
 0x2d1   : > { %v4727_v11 = vadd.f32 %v9926_v40, %v4468_v53  ;;  %v4332_v24 = vrot.slane %v4331_v30, 2  ;;  %v5168_v17 = vsel %vm5025_vm10, %v5167_v42, %v5166_v60 }
 0x2d2   : > { %v4856_v41 = vmax.f32 %v4728_v44, 0.0  ;;  %v4325_v56 = vrot.slane %v4324_v23, 2  ;;  %v7300_v50 = vpop.f32.mrb[4].mxu1 }
 0x2d3   : > { %v4855_v9 = vmax.f32 %v4727_v11, 0.0  ;;  %v4333_v4 = vmax.f32 %v4331_v30, %v4332_v24  ;;  %v3700_v7 = vsel %vm8867_vm4, %v7300_v50, -1e+30  ;;  %v3485_v14 = vpop.f32.mrb[5].mxu1 }
 0x2d4   : > { %v4326_v16 = vmax.f32 %v4324_v23, %v4325_v56  ;;  %v4483_v37 = vsel %vm3719_vm5, %v3700_v7, -inf  ;;  %v3699_v46 = vsel %vm8867_vm4, %v3485_v14, -1e+30  ;;  %v5205_v13 = vrot.slane %v4856_v41, 5 }
 0x2d5   : > { %v5203_v18 = vrot.slane %v4855_v9, 6  ;;  %v4334_v10 = vrot.slane %v4333_v4, 1  ;;  %v4484_v48 = vrot.slane %v4483_v37, 4  ;;  %v4476_v12 = vsel %vm3719_vm5, %v3699_v46, -inf }
 0x2d6   : > { %v4327_v38 = vrot.slane %v4326_v16, 1  ;;  %v4477_v20 = vrot.slane %v4476_v12, 4 }
 0x2d7   : > { %v5204_v52 = vsel %vm5016_vm7, %v5203_v18, %v5202_v26  ;;  %v4335_v25 = vmax.f32 %v4333_v4, %v4334_v10  ;;  %v4485_v27 = vmax.f32 %v4483_v37, %v4484_v48  ;;  %v5420_v48 = vld [vmem:[%s10678_s1 + $0x70] sm:$0xff] }
 0x2d8   : > { %v4328_v5 = vmax.f32 %v4326_v16, %v4327_v38  ;;  %v4478_v61 = vmax.f32 %v4476_v12, %v4477_v20  ;;  %v5206_v49 = vsel %vm5019_vm8, %v5205_v13, %v5204_v52  ;;  %v5421_v12 = vld [vmem:[%s10678_s1 + $0x78] sm:$0xff] }
 0x2d9   : > { %v4708_v1 = vadd.f32 %v9926_v40, %v4335_v25  ;;  %v4486_v63 = vrot.slane %v4485_v27, 2  ;;  %v7524_v20 = vpack.c.bf16 %v5421_v12, %v5420_v48 }
 0x2da   : > { %v4707_v55 = vadd.f32 %v9926_v40, %v4328_v5  ;;  %v4479_v35 = vrot.slane %v4478_v61, 2  ;;  %v7270_v15 = vpop.f32.mrb[88].mxu0 }
 0x2db   : > { %v4487_v39 = vmax.f32 %v4485_v27, %v4486_v63  ;;  %v3680_v51 = vsel %vm8867_vm4, %v7270_v15, -1e+30  ;;  %v3385_v29 = vpop.f32.mrb[89].mxu0  ;;  %v4836_v3 = vmax.f32 %v4708_v1, 0.0  ;;  %7525 = vmatprep.subr.bf16.mxu1 %v7524_v20 }
 0x2dc   : > { %v4835_v26 = vmax.f32 %v4707_v55, 0.0  ;;  %v4480_v45 = vmax.f32 %v4478_v61, %v4479_v35  ;;  %v4343_v2 = vsel %vm3719_vm5, %v3680_v51, -inf  ;;  %v3679_v33 = vsel %vm8867_vm4, %v3385_v29, -1e+30  ;;  %7527 = vmatpush3.bf16.msra.mxu1 %v7524_v20 }
 0x2dd   : > { %v4488_v54 = vrot.slane %v4487_v39, 1  ;;  %v4344_v8 = vrot.slane %v4343_v2, 4  ;;  %v4336_v34 = vsel %vm3719_vm5, %v3679_v33, -inf  ;;  %v5171_v53 = vrot.slane %v4836_v3, 1 }
 0x2de   : > { %v5169_v31 = vrot.slane %v4835_v26, 2  ;;  %v4481_v58 = vrot.slane %v4480_v45, 1  ;;  %v4337_v57 = vrot.slane %v4336_v34, 4 }
 0x2df   : > { %v4489_v0 = vmax.f32 %v4487_v39, %v4488_v54  ;;  %v4345_v42 = vmax.f32 %v4343_v2, %v4344_v8 }
 0x2e0   : > { %v4482_v30 = vmax.f32 %v4480_v45, %v4481_v58  ;;  %v4338_v44 = vmax.f32 %v4336_v34, %v4337_v57  ;;  %v5170_v23 = vsel %vm5028_vm11, %v5169_v31, %v5168_v17 }
 0x2e1   : > { %v4730_v60 = vadd.f32 %v9926_v40, %v4489_v0  ;;  %v4346_v11 = vrot.slane %v4345_v42, 2  ;;  %v7303_v24 = vpop.f32.mrb[6].mxu1  ;;  %v10010_v41 = vsel %vm5031_vm12, %v5171_v53, %v5170_v23 }
 0x2e2   : > { %v4729_v56 = vadd.f32 %v9926_v40, %v4482_v30  ;;  %v4339_v50 = vrot.slane %v4338_v44, 2  ;;  %v3702_v9 = vsel %vm8867_vm4, %v7303_v24, -1e+30  ;;  %v3495_v4 = vpop.f32.mrb[7].mxu1  ;;  %7347 = vmatprep.mubr.msk.f32.mxu1 %vm3719_vm5, %v10010_v41 }
 0x2e3   : > { %v4858_v7 = vmax.f32 %v4730_v60, 0.0  ;;  %v4347_v14 = vmax.f32 %v4345_v42, %v4346_v11  ;;  %v4497_v17 = vsel %vm3719_vm5, %v3702_v9, -inf  ;;  %v3701_v16 = vsel %vm8867_vm4, %v3495_v4, -1e+30 }
 0x2e4   : > { %v4857_v37 = vmax.f32 %v4729_v56, 0.0  ;;  %v4340_v46 = vmax.f32 %v4338_v44, %v4339_v50  ;;  %v4498_v18 = vrot.slane %v4497_v17, 4  ;;  %v4490_v10 = vsel %vm3719_vm5, %v3701_v16, -inf }
 0x2e5   : > { %v4348_v13 = vrot.slane %v4347_v14, 1  ;;  %v4491_v38 = vrot.slane %v4490_v10, 4  ;;  %v5209_v5 = vrot.slane %v4858_v7, 3 }
 0x2e6   : > { %v5207_v52 = vrot.slane %v4857_v37, 4  ;;  %v4341_v25 = vrot.slane %v4340_v46, 1  ;;  %v4499_v27 = vmax.f32 %v4497_v17, %v4498_v18 }
 0x2e7   : > { %v4349_v61 = vmax.f32 %v4347_v14, %v4348_v13  ;;  %v4492_v1 = vmax.f32 %v4490_v10, %v4491_v38 }
 0x2e8   : > { %v4342_v63 = vmax.f32 %v4340_v46, %v4341_v25  ;;  %v4500_v55 = vrot.slane %v4499_v27, 2  ;;  %v5208_v35 = vsel %vm5022_vm9, %v5207_v52, %v5206_v49 }
 0x2e9   : > { %v4710_v15 = vadd.f32 %v9926_v40, %v4349_v61  ;;  %v4493_v39 = vrot.slane %v4492_v1, 2  ;;  %v5210_v51 = vsel %vm5025_vm10, %v5209_v5, %v5208_v35 }
 0x2ea   : > { %v4709_v29 = vadd.f32 %v9926_v40, %v4342_v63  ;;  %v4501_v3 = vmax.f32 %v4499_v27, %v4500_v55  ;;  %v7273_v26 = vpop.f32.mrb[90].mxu0 }
 0x2eb   : > { %v4838_v45 = vmax.f32 %v4710_v15, 0.0  ;;  %v4494_v2 = vmax.f32 %v4492_v1, %v4493_v39  ;;  %v3682_v33 = vsel %vm8867_vm4, %v7273_v26, -1e+30  ;;  %v3395_v54 = vpop.f32.mrb[91].mxu0 }
 0x2ec   : > { %v4837_v8 = vmax.f32 %v4709_v29, 0.0  ;;  %v4502_v34 = vrot.slane %v4501_v3, 1  ;;  %v4357_v31 = vsel %vm3719_vm5, %v3682_v33, -inf  ;;  %v3681_v49 = vsel %vm8867_vm4, %v3395_v54, -1e+30 }
 0x2ed   : > { %v5173_v58 = vrot.slane %v4838_v45, 7  ;;  %v4495_v57 = vrot.slane %v4494_v2, 1  ;;  %v4358_v0 = vrot.slane %v4357_v31, 4  ;;  %v4350_v42 = vsel %vm3719_vm5, %v3681_v49, -inf }
 0x2ee   : > { %v4503_v53 = vmax.f32 %v4501_v3, %v4502_v34  ;;  %v4351_v30 = vrot.slane %v4350_v42, 4 }
 0x2ef   : > { %v5174_v44 = vsel %vm5013_vm6, %v5173_v58, %v4837_v8  ;;  %v4496_v23 = vmax.f32 %v4494_v2, %v4495_v57  ;;  %v4359_v60 = vmax.f32 %v4357_v31, %v4358_v0 }
 0x2f0   : > { %v4732_v11 = vadd.f32 %v9926_v40, %v4503_v53  ;;  %v4352_v24 = vmax.f32 %v4350_v42, %v4351_v30 }
 0x2f1   : > { %v4731_v56 = vadd.f32 %v9926_v40, %v4496_v23  ;;  %v4360_v50 = vrot.slane %v4359_v60, 2 }
 0x2f2   : > { %v4353_v9 = vrot.slane %v4352_v24, 2  ;;  %v7306_v4 = vpop.f32.mrb[8].mxu1  ;;  %v4860_v7 = vmax.f32 %v4732_v11, 0.0  ;;  %v5573_v11 = vld [vmem:[%s10678_s1 + $0x88] sm:$0xff] }
 0x2f3   : > { %v4859_v14 = vmax.f32 %v4731_v56, 0.0  ;;  %v4361_v17 = vmax.f32 %v4359_v60, %v4360_v50  ;;  %v3704_v16 = vsel %vm8867_vm4, %v7306_v4, -1e+30  ;;  %v3505_v37 = vpop.f32.mrb[9].mxu1  ;;  %v5572_v60 = vld [vmem:[%s10678_s1 + $0x80] sm:$0xff] }
 0x2f4   : > { %v4354_v46 = vmax.f32 %v4352_v24, %v4353_v9  ;;  %v4511_v18 = vsel %vm3719_vm5, %v3704_v16, -inf  ;;  %v3703_v10 = vsel %vm8867_vm4, %v3505_v37, -1e+30  ;;  %v5213_v25 = vrot.slane %v4860_v7, 1 }
 0x2f5   : > { %v5211_v48 = vrot.slane %v4859_v14, 2  ;;  %v4362_v12 = vrot.slane %v4361_v17, 1  ;;  %v4512_v13 = vrot.slane %v4511_v18, 4  ;;  %v4504_v38 = vsel %vm3719_vm5, %v3703_v10, -inf }
 0x2f6   : > { %v4355_v20 = vrot.slane %v4354_v46, 1  ;;  %v4505_v52 = vrot.slane %v4504_v38, 4  ;;  %v10065_v9 = vpack.c.bf16 %v5573_v11, %v5572_v60 }
 0x2f7   : > { %v4363_v27 = vmax.f32 %v4361_v17, %v4362_v12  ;;  %v4513_v5 = vmax.f32 %v4511_v18, %v4512_v13  ;;  %v5212_v61 = vsel %vm5028_vm11, %v5211_v48, %v5210_v51 }
 0x2f8   : > { %v4356_v1 = vmax.f32 %v4354_v46, %v4355_v20  ;;  %v4506_v63 = vmax.f32 %v4504_v38, %v4505_v52  ;;  %v10048_v55 = vsel %vm5031_vm12, %v5213_v25, %v5212_v61  ;;  %7529 = vmatprep.subr.bf16.mxu1 %v10065_v9 }
 0x2f9   : > { %v4712_v35 = vadd.f32 %v9926_v40, %v4363_v27  ;;  %v4514_v15 = vrot.slane %v4513_v5, 2 }
 0x2fa   : > { %v4711_v39 = vadd.f32 %v9926_v40, %v4356_v1  ;;  %v4507_v29 = vrot.slane %v4506_v63, 2  ;;  %v7276_v3 = vpop.f32.mrb[92].mxu0 }
 0x2fb   : > { %v4840_v26 = vmax.f32 %v4712_v35, 0.0  ;;  %v4515_v45 = vmax.f32 %v4513_v5, %v4514_v15  ;;  %v3684_v2 = vsel %vm8867_vm4, %v7276_v3, -1e+30  ;;  %v3405_v33 = vpop.f32.mrb[93].mxu0 }
 0x2fc   : > { %v4839_v54 = vmax.f32 %v4711_v39, 0.0  ;;  %v4508_v51 = vmax.f32 %v4506_v63, %v4507_v29  ;;  %v4371_v8 = vsel %vm3719_vm5, %v3684_v2, -inf  ;;  %v3683_v34 = vsel %vm8867_vm4, %v3405_v33, -1e+30 }
 0x2fd   : > { %v4516_v31 = vrot.slane %v4515_v45, 1  ;;  %v4372_v49 = vrot.slane %v4371_v8, 4  ;;  %v4364_v58 = vsel %vm3719_vm5, %v3683_v34, -inf  ;;  %v5177_v53 = vrot.slane %v4840_v26, 5 }
 0x2fe   : > { %v5175_v57 = vrot.slane %v4839_v54, 6  ;;  %v4509_v0 = vrot.slane %v4508_v51, 1  ;;  %v4365_v42 = vrot.slane %v4364_v58, 4 }
 0x2ff   : > { %v4517_v30 = vmax.f32 %v4515_v45, %v4516_v31  ;;  %v4373_v23 = vmax.f32 %v4371_v8, %v4372_v49 }
 0x300   : > { %v5176_v24 = vsel %vm5016_vm7, %v5175_v57, %v5174_v44  ;;  %v4510_v56 = vmax.f32 %v4508_v51, %v4509_v0  ;;  %v4366_v50 = vmax.f32 %v4364_v58, %v4365_v42 }
 0x301   : > { %v4734_v4 = vadd.f32 %v9926_v40, %v4517_v30  ;;  %v4374_v7 = vrot.slane %v4373_v23, 2  ;;  %v7309_v14 = vpop.f32.mrb[10].mxu1  ;;  %v5178_v17 = vsel %vm5019_vm8, %v5177_v53, %v5176_v24 }
 0x302   : > { %v4733_v16 = vadd.f32 %v9926_v40, %v4510_v56  ;;  %v4367_v37 = vrot.slane %v4366_v50, 2  ;;  %v3706_v46 = vsel %vm8867_vm4, %v7309_v14, -1e+30  ;;  %v3515_v18 = vpop.f32.mrb[11].mxu1 }
 0x303   : > { %v4862_v44 = vmax.f32 %v4734_v4, 0.0  ;;  %v4375_v10 = vmax.f32 %v4373_v23, %v4374_v7  ;;  %v4525_v48 = vsel %vm3719_vm5, %v3706_v46, -inf  ;;  %v3705_v12 = vsel %vm8867_vm4, %v3515_v18, -1e+30 }
 0x304   : > { %v4861_v13 = vmax.f32 %v4733_v16, 0.0  ;;  %v4368_v38 = vmax.f32 %v4366_v50, %v4367_v37  ;;  %v4526_v20 = vrot.slane %v4525_v48, 4  ;;  %v4518_v52 = vsel %vm3719_vm5, %v3705_v12, -inf }
 0x305   : > { %v5215_v25 = vrot.slane %v4862_v44, 7  ;;  %v4376_v27 = vrot.slane %v4375_v10, 1  ;;  %v4519_v5 = vrot.slane %v4518_v52, 4 }
 0x306   : > { %v4369_v61 = vrot.slane %v4368_v38, 1  ;;  %v4527_v1 = vmax.f32 %v4525_v48, %v4526_v20 }
 0x307   : > { %v5216_v63 = vsel %vm5013_vm6, %v5215_v25, %v4861_v13  ;;  %v4377_v35 = vmax.f32 %v4375_v10, %v4376_v27  ;;  %v4520_v15 = vmax.f32 %v4518_v52, %v4519_v5 }
 0x308   : > { %v4370_v39 = vmax.f32 %v4368_v38, %v4369_v61  ;;  %v4528_v29 = vrot.slane %v4527_v1, 2 }
 0x309   : > { %v4714_v3 = vadd.f32 %v9926_v40, %v4377_v35  ;;  %v4521_v26 = vrot.slane %v4520_v15, 2 }
 0x30a   : > { %v4713_v45 = vadd.f32 %v9926_v40, %v4370_v39  ;;  %v4529_v2 = vmax.f32 %v4527_v1, %v4528_v29  ;;  %v7279_v33 = vpop.f32.mrb[94].mxu0 }
 0x30b   : > { %v4842_v54 = vmax.f32 %v4714_v3, 0.0  ;;  %v4522_v51 = vmax.f32 %v4520_v15, %v4521_v26  ;;  %v3686_v8 = vsel %vm8867_vm4, %v7279_v33, -1e+30  ;;  %v3415_v34 = vpop.f32.mrb[95].mxu0 }
 0x30c   : > { %v4841_v31 = vmax.f32 %v4713_v45, 0.0  ;;  %v4530_v49 = vrot.slane %v4529_v2, 1  ;;  %v4385_v58 = vsel %vm3719_vm5, %v3686_v8, -inf  ;;  %v3685_v57 = vsel %vm8867_vm4, %v3415_v34, -1e+30 }
 0x30d   : > { %v4523_v0 = vrot.slane %v4522_v51, 1  ;;  %v4386_v42 = vrot.slane %v4385_v58, 4  ;;  %v4378_v53 = vsel %vm3719_vm5, %v3685_v57, -inf  ;;  %v5181_v11 = vrot.slane %v4842_v54, 3 }
 0x30e   : > { %v5179_v30 = vrot.slane %v4841_v31, 4  ;;  %v4531_v23 = vmax.f32 %v4529_v2, %v4530_v49  ;;  %v4379_v60 = vrot.slane %v4378_v53, 4 }
 0x30f   : > { %v4524_v24 = vmax.f32 %v4522_v51, %v4523_v0  ;;  %v4387_v56 = vmax.f32 %v4385_v58, %v4386_v42 }
 0x310   : > { %v4736_v50 = vadd.f32 %v9926_v40, %v4531_v23  ;;  %v4380_v4 = vmax.f32 %v4378_v53, %v4379_v60  ;;  %v5180_v7 = vsel %vm5022_vm9, %v5179_v30, %v5178_v17 }
 0x311   : > { %v4735_v14 = vadd.f32 %v9926_v40, %v4524_v24  ;;  %v4388_v16 = vrot.slane %v4387_v56, 2  ;;  %v5182_v37 = vsel %vm5025_vm10, %v5181_v11, %v5180_v7 }
 0x312   : > { %v4864_v46 = vmax.f32 %v4736_v50, 0.0  ;;  %v4381_v18 = vrot.slane %v4380_v4, 2  ;;  %v7312_v44 = vpop.f32.mrb[12].mxu1 }
 0x313   : > { %v4863_v10 = vmax.f32 %v4735_v14, 0.0  ;;  %v4389_v48 = vmax.f32 %v4387_v56, %v4388_v16  ;;  %v3708_v12 = vsel %vm8867_vm4, %v7312_v44, -1e+30  ;;  %v3525_v13 = vpop.f32.mrb[13].mxu1 }
 0x314   : > { %v4382_v38 = vmax.f32 %v4380_v4, %v4381_v18  ;;  %v4539_v20 = vsel %vm3719_vm5, %v3708_v12, -inf  ;;  %v3707_v17 = vsel %vm8867_vm4, %v3525_v13, -1e+30  ;;  %v5219_v61 = vrot.slane %v4864_v46, 5 }
 0x315   : > { %v5217_v52 = vrot.slane %v4863_v10, 6  ;;  %v4390_v25 = vrot.slane %v4389_v48, 1  ;;  %v4540_v27 = vrot.slane %v4539_v20, 4  ;;  %v4532_v5 = vsel %vm3719_vm5, %v3707_v17, -inf }
 0x316   : > { %v4383_v1 = vrot.slane %v4382_v38, 1  ;;  %v4533_v35 = vrot.slane %v4532_v5, 4 }
 0x317   : > { %v5218_v15 = vsel %vm5016_vm7, %v5217_v52, %v5216_v63  ;;  %v4391_v39 = vmax.f32 %v4389_v48, %v4390_v25  ;;  %v4541_v29 = vmax.f32 %v4539_v20, %v4540_v27 }
 0x318   : > { %v4384_v3 = vmax.f32 %v4382_v38, %v4383_v1  ;;  %v4534_v26 = vmax.f32 %v4532_v5, %v4533_v35  ;;  %v5220_v45 = vsel %vm5019_vm8, %v5219_v61, %v5218_v15 }
 0x319   : > { %v4716_v2 = vadd.f32 %v9926_v40, %v4391_v39  ;;  %v4542_v33 = vrot.slane %v4541_v29, 2 }
 0x31a   : > { %v4715_v54 = vadd.f32 %v9926_v40, %v4384_v3  ;;  %v4535_v51 = vrot.slane %v4534_v26, 2  ;;  %v7282_v8 = vpop.f32.mrb[96].mxu0 }
 0x31b   : > { %v4543_v34 = vmax.f32 %v4541_v29, %v4542_v33  ;;  %v3688_v31 = vsel %vm8867_vm4, %v7282_v8, -1e+30  ;;  %v3425_v49 = vpop.f32.mrb[97].mxu0  ;;  %v4844_v58 = vmax.f32 %v4716_v2, 0.0 }
 0x31c   : > { %v4843_v63 = vmax.f32 %v4715_v54, 0.0  ;;  %v4536_v57 = vmax.f32 %v4534_v26, %v4535_v51  ;;  %v4399_v0 = vsel %vm3719_vm5, %v3688_v31, -inf  ;;  %v3687_v42 = vsel %vm8867_vm4, %v3425_v49, -1e+30 }
 0x31d   : > { %v4544_v53 = vrot.slane %v4543_v34, 1  ;;  %v4400_v30 = vrot.slane %v4399_v0, 4  ;;  %v4392_v23 = vsel %vm3719_vm5, %v3687_v42, -inf  ;;  %v5185_v4 = vrot.slane %v4844_v58, 1 }
 0x31e   : > { %v5183_v60 = vrot.slane %v4843_v63, 2  ;;  %v4537_v11 = vrot.slane %v4536_v57, 1  ;;  %v4393_v24 = vrot.slane %v4392_v23, 4 }
 0x31f   : > { %v4545_v56 = vmax.f32 %v4543_v34, %v4544_v53  ;;  %v4401_v50 = vmax.f32 %v4399_v0, %v4400_v30 }
 0x320   : > { %v4538_v7 = vmax.f32 %v4536_v57, %v4537_v11  ;;  %v4394_v14 = vmax.f32 %v4392_v23, %v4393_v24  ;;  %v7315_v16 = vpop.f32.mrb[14].mxu1  ;;  %v5184_v46 = vsel %vm5028_vm11, %v5183_v60, %v5182_v37 }
 0x321   : > { %v4738_v18 = vadd.f32 %v9926_v40, %v4545_v56  ;;  %v4402_v44 = vrot.slane %v4401_v50, 2  ;;  %v3710_v10 = vsel %vm8867_vm4, %v7315_v16, -1e+30  ;;  %v3535_v48 = vpop.f32.mrb[15].mxu1  ;;  %v10111_v12 = vsel %vm5031_vm12, %v5185_v4, %v5184_v46 }
 0x322   : > { %v4737_v13 = vadd.f32 %v9926_v40, %v4538_v7  ;;  %v4395_v38 = vrot.slane %v4394_v14, 2  ;;  %v4553_v20 = vsel %vm3719_vm5, %v3710_v10, -inf  ;;  %v3709_v17 = vsel %vm8867_vm4, %v3535_v48, -1e+30  ;;  %7348 = vmatmul.mubr.msk.f32.gmra.mrb[34].mxu1 %vm3719_vm5, %v10111_v12 }
 0x323   : > { %v4866_v37 = vmax.f32 %v4738_v18, 0.0  ;;  %v4403_v52 = vmax.f32 %v4401_v50, %v4402_v44  ;;  %v4554_v25 = vrot.slane %v4553_v20, 4  ;;  %v4546_v27 = vsel %vm3719_vm5, %v3709_v17, -inf }
 0x324   : > { %v4865_v5 = vmax.f32 %v4737_v13, 0.0  ;;  %v4396_v61 = vmax.f32 %v4394_v14, %v4395_v38  ;;  %v4547_v1 = vrot.slane %v4546_v27, 4 }
 0x325   : > { %v4404_v35 = vrot.slane %v4403_v52, 1  ;;  %v4555_v15 = vmax.f32 %v4553_v20, %v4554_v25  ;;  %v5223_v26 = vrot.slane %v4866_v37, 3 }
 0x326   : > { %v5221_v39 = vrot.slane %v4865_v5, 4  ;;  %v4397_v29 = vrot.slane %v4396_v61, 1  ;;  %v4548_v3 = vmax.f32 %v4546_v27, %v4547_v1 }
 0x327   : > { %v4405_v2 = vmax.f32 %v4403_v52, %v4404_v35  ;;  %v4556_v33 = vrot.slane %v4555_v15, 2 }
 0x328   : > { %v4398_v54 = vmax.f32 %v4396_v61, %v4397_v29  ;;  %v4549_v51 = vrot.slane %v4548_v3, 2  ;;  %v5222_v8 = vsel %vm5022_vm9, %v5221_v39, %v5220_v45 }
 0x329   : > { %v4718_v34 = vadd.f32 %v9926_v40, %v4405_v2  ;;  %v4557_v31 = vmax.f32 %v4555_v15, %v4556_v33  ;;  %v5224_v49 = vsel %vm5025_vm10, %v5223_v26, %v5222_v8 }
 0x32a   : > { %v4717_v58 = vadd.f32 %v9926_v40, %v4398_v54  ;;  %v4550_v63 = vmax.f32 %v4548_v3, %v4549_v51  ;;  %v7285_v57 = vpop.f32.mrb[98].mxu0 }
 0x32b   : > { %v4846_v0 = vmax.f32 %v4718_v34, 0.0  ;;  %v4558_v42 = vrot.slane %v4557_v31, 1  ;;  %v3690_v53 = vsel %vm8867_vm4, %v7285_v57, -1e+30  ;;  %v3435_v30 = vpop.f32.mrb[99].mxu0 }
 0x32c   : > { %v4845_v23 = vmax.f32 %v4717_v58, 0.0  ;;  %v4551_v60 = vrot.slane %v4550_v63, 1  ;;  %v4413_v11 = vsel %vm3719_vm5, %v3690_v53, -inf  ;;  %v3689_v45 = vsel %vm8867_vm4, %v3435_v30, -1e+30 }
 0x32d   : > { %v5187_v24 = vrot.slane %v4846_v0, 7  ;;  %v4559_v56 = vmax.f32 %v4557_v31, %v4558_v42  ;;  %v4414_v50 = vrot.slane %v4413_v11, 4  ;;  %v4406_v4 = vsel %vm3719_vm5, %v3689_v45, -inf }
 0x32e   : > { %v4552_v7 = vmax.f32 %v4550_v63, %v4551_v60  ;;  %v4407_v14 = vrot.slane %v4406_v4, 4 }
 0x32f   : > { %v5188_v16 = vsel %vm5013_vm6, %v5187_v24, %v4845_v23  ;;  %v4740_v46 = vadd.f32 %v9926_v40, %v4559_v56  ;;  %v4415_v18 = vmax.f32 %v4413_v11, %v4414_v50 }
 0x330   : > { %v4739_v44 = vadd.f32 %v9926_v40, %v4552_v7  ;;  %v4408_v10 = vmax.f32 %v4406_v4, %v4407_v14  ;;  %v7318_v48 = vpop.f32.mrb[16].mxu1 }
 0x331   : > { %v4416_v13 = vrot.slane %v4415_v18, 2  ;;  %v3712_v38 = vsel %vm8867_vm4, %v7318_v48, -1e+30  ;;  %v3545_v20 = vpop.f32.mrb[17].mxu1  ;;  %v4868_v17 = vmax.f32 %v4740_v46, 0.0 }
 0x332   : > { %v4867_v37 = vmax.f32 %v4739_v44, 0.0  ;;  %v4409_v52 = vrot.slane %v4408_v10, 2  ;;  %v4567_v25 = vsel %vm3719_vm5, %v3712_v38, -inf  ;;  %v3711_v27 = vsel %vm8867_vm4, %v3545_v20, -1e+30 }
 0x333   : > { %v4417_v5 = vmax.f32 %v4415_v18, %v4416_v13  ;;  %v4568_v61 = vrot.slane %v4567_v25, 4  ;;  %v4560_v1 = vsel %vm3719_vm5, %v3711_v27, -inf  ;;  %v5227_v26 = vrot.slane %v4868_v17, 1  ;;  %v10154_v44 = vld [vmem:[%s10679_s2] ss:$0 sm:$0xff] }
 0x334   : > { %v5225_v35 = vrot.slane %v4867_v37, 2  ;;  %v4410_v15 = vmax.f32 %v4408_v10, %v4409_v52  ;;  %v4561_v39 = vrot.slane %v4560_v1, 4 }
 0x335   : > { %v4418_v29 = vrot.slane %v4417_v5, 1  ;;  %v4569_v3 = vmax.f32 %v4567_v25, %v4568_v61 }
 0x336   : > { %v4411_v2 = vrot.slane %v4410_v15, 1  ;;  %v4562_v33 = vmax.f32 %v4560_v1, %v4561_v39  ;;  %v5226_v54 = vsel %vm5028_vm11, %v5225_v35, %v5224_v49 }
 0x337   : > { %v4419_v51 = vmax.f32 %v4417_v5, %v4418_v29  ;;  %v4570_v8 = vrot.slane %v4569_v3, 2  ;;  %v10141_v34 = vsel %vm5031_vm12, %v5227_v26, %v5226_v54 }
 0x338   : > { %v4412_v31 = vmax.f32 %v4410_v15, %v4411_v2  ;;  %v4563_v58 = vrot.slane %v4562_v33, 2 }
 0x339   : > { %v4720_v63 = vadd.f32 %v9926_v40, %v4419_v51  ;;  %v4571_v57 = vmax.f32 %v4569_v3, %v4570_v8 }
 0x33a   : > { %v4719_v0 = vadd.f32 %v9926_v40, %v4412_v31  ;;  %v4564_v42 = vmax.f32 %v4562_v33, %v4563_v58  ;;  %v7288_v53 = vpop.f32.mrb[100].mxu0 }
 0x33b   : > { %v4848_v30 = vmax.f32 %v4720_v63, 0.0  ;;  %v4572_v23 = vrot.slane %v4571_v57, 1  ;;  %v3692_v60 = vsel %vm8867_vm4, %v7288_v53, -1e+30  ;;  %v3445_v49 = vpop.f32.mrb[101].mxu0 }
 0x33c   : > { %v4847_v11 = vmax.f32 %v4719_v0, 0.0  ;;  %v4565_v45 = vrot.slane %v4564_v42, 1  ;;  %v4427_v24 = vsel %vm3719_vm5, %v3692_v60, -inf  ;;  %v3691_v56 = vsel %vm8867_vm4, %v3445_v49, -1e+30 }
 0x33d   : > { %v4573_v50 = vmax.f32 %v4571_v57, %v4572_v23  ;;  %v4428_v4 = vrot.slane %v4427_v24, 4  ;;  %v4420_v7 = vsel %vm3719_vm5, %v3691_v56, -inf  ;;  %v5191_v18 = vrot.slane %v4848_v30, 5 }
 0x33e   : > { %v5189_v40 = vrot.slane %v4847_v11, 6  ;;  %v4566_v14 = vmax.f32 %v4564_v42, %v4565_v45  ;;  %v4421_v46 = vrot.slane %v4420_v7, 4 }
 0x33f   : > { %v4742_v10 = vadd.f32 %v10154_v44, %v4573_v50  ;;  %v4429_v48 = vmax.f32 %v4427_v24, %v4428_v4 }
 0x340   : > { %v5190_v13 = vsel %vm5016_vm7, %v5189_v40, %v5188_v16  ;;  %v4741_v38 = vadd.f32 %v10154_v44, %v4566_v14  ;;  %v4422_v20 = vmax.f32 %v4420_v7, %v4421_v46  ;;  %v7321_v17 = vpop.f32.mrb[18].mxu1 }
 0x341   : > { %v4870_v37 = vmax.f32 %v4742_v10, 0.0  ;;  %v4430_v52 = vrot.slane %v4429_v48, 2  ;;  %v3714_v25 = vsel %vm8867_vm4, %v7321_v17, -1e+30  ;;  %v3555_v27 = vpop.f32.mrb[19].mxu1  ;;  %v5192_v5 = vsel %vm5019_vm8, %v5191_v18, %v5190_v13 }
 0x342   : > { %v4869_v61 = vmax.f32 %v4741_v38, 0.0  ;;  %v4423_v1 = vrot.slane %v4422_v20, 2  ;;  %v4581_v35 = vsel %vm3719_vm5, %v3714_v25, -inf  ;;  %v3713_v15 = vsel %vm8867_vm4, %v3555_v27, -1e+30 }
 0x343   : > { %v5229_v16 = vrot.slane %v4870_v37, 7  ;;  %v4431_v39 = vmax.f32 %v4429_v48, %v4430_v52  ;;  %v4582_v29 = vrot.slane %v4581_v35, 4  ;;  %v4574_v3 = vsel %vm3719_vm5, %v3713_v15, -inf }
 0x344   : > { %v4424_v26 = vmax.f32 %v4422_v20, %v4423_v1  ;;  %v4575_v2 = vrot.slane %v4574_v3, 4 }
 0x345   : > { %v5230_v33 = vsel %vm5013_vm6, %v5229_v16, %v4869_v61  ;;  %v4432_v54 = vrot.slane %v4431_v39, 1  ;;  %v4583_v51 = vmax.f32 %v4581_v35, %v4582_v29 }
 0x346   : > { %v4425_v8 = vrot.slane %v4424_v26, 1  ;;  %v4576_v31 = vmax.f32 %v4574_v3, %v4575_v2 }
 0x347   : > { %v4433_v58 = vmax.f32 %v4431_v39, %v4432_v54  ;;  %v4584_v63 = vrot.slane %v4583_v51, 2 }
 0x348   : > { %v4426_v57 = vmax.f32 %v4424_v26, %v4425_v8  ;;  %v4577_v0 = vrot.slane %v4576_v31, 2 }
 0x349   : > { %v4722_v42 = vadd.f32 %v10154_v44, %v4433_v58  ;;  %v4585_v53 = vmax.f32 %v4583_v51, %v4584_v63 }
 0x34a   : > { %v4721_v30 = vadd.f32 %v10154_v44, %v4426_v57  ;;  %v4578_v23 = vmax.f32 %v4576_v31, %v4577_v0  ;;  %v7291_v60 = vpop.f32.mrb[102].mxu0 }
 0x34b   : > { %v4850_v49 = vmax.f32 %v4722_v42, 0.0  ;;  %v4586_v11 = vrot.slane %v4585_v53, 1  ;;  %v3694_v45 = vsel %vm8867_vm4, %v7291_v60, -1e+30  ;;  %v3455_v24 = vpop.f32.mrb[103].mxu0 }
 0x34c   : > { %v4849_v56 = vmax.f32 %v4721_v30, 0.0  ;;  %v4579_v50 = vrot.slane %v4578_v23, 1  ;;  %v4441_v4 = vsel %vm3719_vm5, %v3694_v45, -inf  ;;  %v3693_v7 = vsel %vm8867_vm4, %v3455_v24, -1e+30 }
 0x34d   : > { %v4587_v40 = vmax.f32 %v4585_v53, %v4586_v11  ;;  %v4442_v14 = vrot.slane %v4441_v4, 4  ;;  %v4434_v46 = vsel %vm3719_vm5, %v3693_v7, -inf  ;;  %v5195_v13 = vrot.slane %v4850_v49, 3 }
 0x34e   : > { %v5193_v18 = vrot.slane %v4849_v56, 4  ;;  %v4580_v10 = vmax.f32 %v4578_v23, %v4579_v50  ;;  %v4435_v48 = vrot.slane %v4434_v46, 4 }
 0x34f   : > { %v4744_v38 = vadd.f32 %v10154_v44, %v4587_v40  ;;  %v4443_v20 = vmax.f32 %v4441_v4, %v4442_v14 }
 0x350   : > { %v4743_v17 = vadd.f32 %v10154_v44, %v4580_v10  ;;  %v4436_v37 = vmax.f32 %v4434_v46, %v4435_v48  ;;  %v7324_v52 = vpop.f32.mrb[20].mxu1  ;;  %v5194_v25 = vsel %vm5022_vm9, %v5193_v18, %v5192_v5 }
 0x351   : > { %v4872_v27 = vmax.f32 %v4744_v38, 0.0  ;;  %v4444_v61 = vrot.slane %v4443_v20, 2  ;;  %v3716_v1 = vsel %vm8867_vm4, %v7324_v52, -1e+30  ;;  %v3565_v35 = vpop.f32.mrb[21].mxu1  ;;  %v5196_v15 = vsel %vm5025_vm10, %v5195_v13, %v5194_v25 }
 0x352   : > { %v4871_v16 = vmax.f32 %v4743_v17, 0.0  ;;  %v4437_v39 = vrot.slane %v4436_v37, 2  ;;  %v4595_v29 = vsel %vm3719_vm5, %v3716_v1, -inf  ;;  %v3715_v3 = vsel %vm8867_vm4, %v3565_v35, -1e+30 }
 0x353   : > { %v4445_v26 = vmax.f32 %v4443_v20, %v4444_v61  ;;  %v4596_v2 = vrot.slane %v4595_v29, 4  ;;  %v4588_v54 = vsel %vm3719_vm5, %v3715_v3, -inf  ;;  %v5233_v31 = vrot.slane %v4872_v27, 5 }
 0x354   : > { %v5231_v5 = vrot.slane %v4871_v16, 6  ;;  %v4438_v51 = vmax.f32 %v4436_v37, %v4437_v39  ;;  %v4589_v8 = vrot.slane %v4588_v54, 4 }
 0x355   : > { %v4446_v58 = vrot.slane %v4445_v26, 1  ;;  %v4597_v63 = vmax.f32 %v4595_v29, %v4596_v2 }
 0x356   : > { %v5232_v57 = vsel %vm5016_vm7, %v5231_v5, %v5230_v33  ;;  %v4439_v0 = vrot.slane %v4438_v51, 1  ;;  %v4590_v42 = vmax.f32 %v4588_v54, %v4589_v8 }
 0x357   : > { %v4447_v53 = vmax.f32 %v4445_v26, %v4446_v58  ;;  %v4598_v30 = vrot.slane %v4597_v63, 2  ;;  %v5234_v23 = vsel %vm5019_vm8, %v5233_v31, %v5232_v57 }
 0x358   : > { %v4440_v60 = vmax.f32 %v4438_v51, %v4439_v0  ;;  %v4591_v49 = vrot.slane %v4590_v42, 2  ;;  %v7327_v11 = vpop.f32.mrb[22].mxu1 }
 0x359   : > { %v4599_v45 = vmax.f32 %v4597_v63, %v4598_v30  ;;  %v3718_v24 = vsel %vm8867_vm4, %v7327_v11, -1e+30  ;;  %v3575_v56 = vpop.f32.mrb[23].mxu1  ;;  %v4724_v40 = vadd.f32 %v10154_v44, %v4447_v53 }
 0x35a   : > { %v4723_v50 = vadd.f32 %v10154_v44, %v4440_v60  ;;  %v4592_v4 = vmax.f32 %v4590_v42, %v4591_v49  ;;  %v4609_v7 = vsel %vm3719_vm5, %v3718_v24, -inf  ;;  %v3717_v33 = vsel %vm8867_vm4, %v3575_v56, -1e+30 }
 0x35b   : > { %v4600_v14 = vrot.slane %v4599_v45, 1  ;;  %v4610_v46 = vrot.slane %v4609_v7, 4  ;;  %v4602_v18 = vsel %vm3719_vm5, %v3717_v33, -inf  ;;  %v4852_v1 = vmax.f32 %v4724_v40, 0.0  ;;  %v5956_v40 = vld [vmem:[%s10678_s1 + $0xd0] sm:$0xff] }
 0x35c   : > { %v4851_v10 = vmax.f32 %v4723_v50, 0.0  ;;  %v4593_v48 = vrot.slane %v4592_v4, 1  ;;  %v4603_v13 = vrot.slane %v4602_v18, 4  ;;  %v10195_v38 = vpop.f32.mrb[24].mxu1 }
 0x35d   : > { %v4601_v20 = vmax.f32 %v4599_v45, %v4600_v14  ;;  %v4611_v17 = vmax.f32 %v4609_v7, %v4610_v46  ;;  %v10197_v37 = vpop.f32.mrb[25].mxu1  ;;  %v5199_v8 = vrot.slane %v4852_v1, 1  ;;  %v5957_v14 = vld [vmem:[%s10678_s1 + $0xd8] sm:$0xff] }
 0x35e   : > { %v5197_v52 = vrot.slane %v4851_v10, 2  ;;  %v4594_v25 = vmax.f32 %v4592_v4, %v4593_v48  ;;  %v4604_v27 = vmax.f32 %v4602_v18, %v4603_v13  ;;  %v7548_v46 = vpack.c.bf16 %v5957_v14, %v5956_v40  ;;  %v5958_v18 = vld [vmem:[%s10678_s1 + $0xe0] sm:$0xff]  ;;  %v5959_v10 = vld [vmem:[%s10678_s1 + $0xe8] sm:$0xff]  ;;  %v5960_v13 = vld [vmem:[%s10678_s1 + $0xf0] sm:$0xff] }
 0x35f   : > { %v4746_v62 = vadd.f32 %v10154_v44, %v4601_v20  ;;  %v4612_v61 = vrot.slane %v4611_v17, 2  ;;  %v7552_v48 = vpack.c.bf16 %v5959_v10, %v5958_v18  ;;  %v5961_v20 = vld [vmem:[%s10678_s1 + $0xf8] sm:$0xff]  ;;  %v10379_v10 = vld [vmem:[%s10679_s2 + $0x5] ss:$0 sm:$0xff] }
 0x360   : > { %v4745_v35 = vadd.f32 %v10154_v44, %v4594_v25  ;;  %v4605_v16 = vrot.slane %v4604_v27, 2  ;;  %v10201_v39 = vpop.f32.mrb[26].mxu1  ;;  %v5198_v29 = vsel %vm5028_vm11, %v5197_v52, %v5196_v15  ;;  %v5962_v52 = vld [vmem:[%s10678_s1 + $0x100] sm:$0xff]  ;;  %v5963_v25 = vld [vmem:[%s10678_s1 + $0x108] sm:$0xff] }
 0x361   : > { %v4874_v3 = vmax.f32 %v4746_v62, 0.0  ;;  %v4613_v26 = vmax.f32 %v4611_v17, %v4612_v61  ;;  %v10204_v2 = vpop.f32.mrb[27].mxu1  ;;  %v5200_v42 = vsel %vm5031_vm12, %v5199_v8, %v5198_v29  ;;  %v7556_v17 = vpack.c.bf16 %v5961_v20, %v5960_v13  ;;  %v10347_v62 = vld [vmem:[%s10679_s2 + $0x4] ss:$0 sm:$0xff] }
 0x362   : > { %v4873_v54 = vmax.f32 %v4745_v35, 0.0  ;;  %v4606_v5 = vmax.f32 %v4604_v27, %v4605_v16  ;;  %7350 = vmatprep.mubr.msk.f32.mxu1 %vm3719_vm5, %v5200_v42  ;;  %v7560_v27 = vpack.c.bf16 %v5963_v25, %v5962_v52  ;;  %v5347_v61 = vadd.f32 %v10195_v38, %v10347_v62 }
 0x363   : > { %v4614_v51 = vrot.slane %v4613_v26, 1  ;;  %v5237_v57 = vrot.slane %v4874_v3, 3  ;;  %7351 = vmatmul.mubr.msk.f32.gmra.mrb[36].mxu1 %vm3719_vm5, %v10048_v55  ;;  %v5342_v1 = vadd.f32 %v10347_v62, %v10197_v37  ;;  %v5357_v35 = vadd.f32 %v10201_v39, %v10347_v62 }
 0x364   : > { %v5235_v31 = vrot.slane %v4873_v54, 4  ;;  %v4607_v58 = vrot.slane %v4606_v5, 1  ;;  %v10206_v63 = vpop.f32.mrb[28].mxu1  ;;  %7353 = vmatprep.mubr.msk.f32.mxu1 %vm3719_vm5, %v10141_v34  ;;  %v5725_v16 = vsub.f32 0.0, %v5347_v61  ;;  %v5352_v29 = vadd.f32 %v10347_v62, %v10204_v2 }
 0x365   : > { %v4615_v0 = vmax.f32 %v4613_v26, %v4614_v51  ;;  %v10209_v53 = vpop.f32.mrb[29].mxu1  ;;  %v5724_v3 = vsub.f32 0.0, %v5342_v1  ;;  %v5367_v26 = vadd.f32 %v10206_v63, %v10347_v62 }
 0x366   : > { %v4608_v30 = vmax.f32 %v4606_v5, %v4607_v58  ;;  %v5236_v15 = vsel %vm5022_vm9, %v5235_v31, %v5234_v23  ;;  %v5362_v54 = vadd.f32 %v10347_v62, %v10209_v53  ;;  %v5727_v5 = vsub.f32 0.0, %v5357_v35 }
 0x367   : > { %v4748_v60 = vadd.f32 %v10154_v44, %v4615_v0  ;;  %v5238_v49 = vsel %vm5025_vm10, %v5237_v57, %v5236_v15  ;;  %v5742_v51 = vmul.f32 1.442695, %v5725_v16  ;;  %v5726_v38 = vsub.f32 0.0, %v5352_v29 }
 0x368   : > { %v4747_v11 = vadd.f32 %v10154_v44, %v4608_v30  ;;  %v10220_v45 = vpop.f32.mrb[30].mxu1  ;;  %v5740_v8 = vmul.f32 1.442695, %v5724_v3  ;;  %v5729_v31 = vsub.f32 0.0, %v5367_v26  ;;  %v5728_v37 = vsub.f32 0.0, %v5362_v54 }
 0x369   : > { %v10222_v24 = vpop.f32.mrb[31].mxu1  ;;  %v4876_v56 = vmax.f32 %v4748_v60, 0.0  ;;  %v5746_v58 = vmul.f32 1.442695, %v5727_v5  ;;  %7591 = vpow2.f32 %v5742_v51  ;;  %v5744_v39 = vmul.f32 1.442695, %v5726_v38 }
 0x36a   : > { %v4875_v50 = vmax.f32 %v4747_v11, 0.0  ;;  %7593 = vpow2.f32 %v5740_v8  ;;  %v5750_v57 = vmul.f32 1.442695, %v5729_v31  ;;  %v5748_v0 = vmul.f32 1.442695, %v5728_v37 }
 0x36b   : > { %v5241_v23 = vrot.slane %v4876_v56, 1  ;;  %7595 = vpow2.f32 %v5746_v58  ;;  %v5377_v2 = vadd.f32 %v10220_v45, %v10347_v62  ;;  %v5372_v63 = vadd.f32 %v10347_v62, %v10222_v24 }
 0x36c   : > { %v5239_v4 = vrot.slane %v4875_v50, 2  ;;  %7597 = vpow2.f32 %v5744_v39 }
 0x36d   : > { %7599 = vpow2.f32 %v5750_v57  ;;  %v5730_v15 = vsub.f32 0.0, %v5372_v63 }
 0x36e   : > { %v5240_v7 = vsel %vm5028_vm11, %v5239_v4, %v5238_v49  ;;  %7601 = vpow2.f32 %v5748_v0 }
 0x36f   : > { %v5242_v33 = vsel %vm5031_vm12, %v5241_v23, %v5240_v7 }
 0x370   : > { %7354 = vmatmul.mubr.msk.f32.gmra.mrb[38].mxu1 %vm3719_vm5, %v5242_v33 }
 0x371   : > { %7360 = vmatprep.mubr.msk.f32.mxu1 %vm3719_vm5, %v9073_v36 }
 0x373   : > { %v7592_v53 = vpop.eup %7591 }
 0x374   : > { %7361 = vmatmul.mubr.msk.f32.vlgmr.msra.gmra.mrb[40].mxu1 %vm3719_vm5, %v9193_v47  ;;  %v7594_v30 = vpop.eup %7593  ;;  %v5773_v4 = vadd.f32 1.0, %v7592_v53 }
 0x375   : > { %7531 = vmatpush3.bf16.msra.mxu1 %v10065_v9  ;;  %7363 = vmatprep.mubr.msk.f32.mxu1 %vm3719_vm5, %v9325_v21  ;;  %v7596_v50 = vpop.eup %7595  ;;  %v5772_v7 = vadd.f32 1.0, %v7594_v30 }
 0x376   : > { %v7598_v23 = vpop.eup %7597 }
 0x378   : > { %7364 = vmatmul.mubr.msk.f32.gmra.mrb[42].mxu1 %vm3719_vm5, %v9459_v22 }
 0x379   : > { %7366 = vmatprep.mubr.msk.f32.mxu1 %vm3719_vm5, %v9594_v6 }
 0x37c   : > { %7367 = vmatmul.mubr.msk.f32.gmra.mrb[44].mxu1 %vm3719_vm5, %v9673_v43 }
 0x37d   : > { %7369 = vmatprep.mubr.msk.f32.mxu1 %vm3719_vm5, %v9746_v32 }
 0x380   : > { %7370 = vmatmul.mubr.msk.f32.gmra.mrb[46].mxu1 %vm3719_vm5, %v9822_v59 }
 0x381   : > { %7372 = vmatprep.mubr.msk.f32.mxu1 %vm3719_vm5, %v9896_v28 }
 0x384   : > { %7373 = vmatmul.mubr.msk.f32.gmra.mrb[48].mxu1 %vm3719_vm5, %v9949_v19 }
 0x385   : > { %v10248_v9 = vpop.f32.mrb[32].mxu1  ;;  %7375 = vmatprep.mubr.msk.f32.mxu1 %vm3719_vm5, %v10010_v41 }
 0x386   : > { %v10252_v44 = vpop.f32.mrb[33].mxu1  ;;  %v5387_v11 = vadd.f32 %v10248_v9, %v10347_v62 }
 0x387   : > { %v5382_v45 = vadd.f32 %v10347_v62, %v10252_v44 }
 0x388   : > { %7376 = vmatmul.mubr.msk.f32.gmra.mrb[50].mxu1 %vm3719_vm5, %v10111_v12  ;;  %v5733_v9 = vsub.f32 0.0, %v5387_v11 }
 0x389   : > { %7378 = vmatprep.mubr.msk.f32.mxu1 %vm3719_vm5, %v5200_v42 }
 0x38c   : > { %7379 = vmatmul.mubr.msk.f32.gmra.mrb[52].mxu1 %vm3719_vm5, %v10048_v55 }
 0x38d   : > { %7381 = vmatprep.mubr.msk.f32.mxu1 %vm3719_vm5, %v10141_v34 }
 0x390   : > { %7382 = vmatmul.mubr.msk.f32.gmra.mrb[54].mxu1 %vm3719_vm5, %v5242_v33 }
 0x391   : > { %7388 = vmatprep.mubr.msk.f32.mxu1 %vm3719_vm5, %v9073_v36  ;;  %v5948_v36 = vld [vmem:[%s10678_s1 + $0x90] sm:$0xff] }
 0x394   : > { %7389 = vmatmul.mubr.msk.f32.vlgmr.msra.gmra.mrb[56].mxu1 %vm3719_vm5, %v9193_v47  ;;  %v5949_v47 = vld [vmem:[%s10678_s1 + $0x98] sm:$0xff] }
 0x395   : > { %7391 = vmatprep.mubr.msk.f32.mxu1 %vm3719_vm5, %v9325_v21  ;;  %v7532_v21 = vpack.c.bf16 %v5949_v47, %v5948_v36  ;;  %v5752_v36 = vmul.f32 1.442695, %v5730_v15 }
 0x397   : > { %7533 = vmatprep.subr.bf16.mxu1 %v7532_v21 }
 0x398   : > { %7392 = vmatmul.mubr.msk.f32.gmra.mrb[58].mxu1 %vm3719_vm5, %v9459_v22  ;;  %v5950_v22 = vld [vmem:[%s10678_s1 + $0xa0] sm:$0xff] }
 0x399   : > { %7394 = vmatprep.mubr.msk.f32.mxu1 %vm3719_vm5, %v9594_v6  ;;  %7535 = vmatpush3.bf16.msra.mxu1 %v7532_v21  ;;  %v5951_v6 = vld [vmem:[%s10678_s1 + $0xa8] sm:$0xff] }
 0x39c   : > { %7395 = vmatmul.mubr.msk.f32.gmra.mrb[60].mxu1 %vm3719_vm5, %v9673_v43  ;;  %v7536_v43 = vpack.c.bf16 %v5951_v6, %v5950_v22  ;;  %v5775_v22 = vadd.f32 1.0, %v7596_v50 }
 0x39d   : > { %7397 = vmatprep.mubr.msk.f32.mxu1 %vm3719_vm5, %v9746_v32 }
 0x39e   : > { %7537 = vmatprep.subr.bf16.mxu1 %v7536_v43 }
 0x39f   : > { %7539 = vmatpush3.bf16.msra.mxu1 %v7536_v43  ;;  %v5774_v43 = vadd.f32 1.0, %v7598_v23 }
 0x3a0   : > { %7398 = vmatmul.mubr.msk.f32.gmra.mrb[62].mxu1 %vm3719_vm5, %v9822_v59  ;;  %v5952_v59 = vld [vmem:[%s10678_s1 + $0xb0] sm:$0xff] }
 0x3a1   : > { %7400 = vmatprep.mubr.msk.f32.mxu1 %vm3719_vm5, %v9896_v28  ;;  %v5953_v28 = vld [vmem:[%s10678_s1 + $0xb8] sm:$0xff] }
 0x3a4   : > { %7401 = vmatmul.mubr.msk.f32.gmra.mrb[64].mxu1 %vm3719_vm5, %v9949_v19 }
 0x3a5   : > { %7403 = vmatprep.mubr.msk.f32.mxu1 %vm3719_vm5, %v10010_v41  ;;  %v7540_v41 = vpack.c.bf16 %v5953_v28, %v5952_v59  ;;  %v5732_v59 = vsub.f32 0.0, %v5382_v45 }
 0x3a7   : > { %7541 = vmatprep.subr.bf16.mxu1 %v7540_v41  ;;  %v5756_v40 = vmul.f32 1.442695, %v5732_v59 }
 0x3a8   : > { %7404 = vmatmul.mubr.msk.f32.gmra.mrb[66].mxu1 %vm3719_vm5, %v10111_v12  ;;  %v5955_v12 = vld [vmem:[%s10678_s1 + $0xc8] sm:$0xff] }
 0x3a9   : > { %7406 = vmatprep.mubr.msk.f32.mxu1 %vm3719_vm5, %v5200_v42  ;;  %7543 = vmatpush3.bf16.msra.mxu1 %v7540_v41  ;;  %v5731_v42 = vsub.f32 0.0, %v5377_v2 }
 0x3ab   : > { %v5754_v49 = vmul.f32 1.442695, %v5731_v42 }
 0x3ac   : > { %7407 = vmatmul.mubr.msk.f32.gmra.mrb[68].mxu1 %vm3719_vm5, %v10048_v55  ;;  %v5954_v55 = vld [vmem:[%s10678_s1 + $0xc0] sm:$0xff] }
 0x3ad   : > { %7409 = vmatprep.mubr.msk.f32.mxu1 %vm3719_vm5, %v10141_v34  ;;  %v7544_v34 = vpack.c.bf16 %v5955_v12, %v5954_v55  ;;  %7603 = vpow2.f32 %v5754_v49  ;;  %v5758_v12 = vmul.f32 1.442695, %v5733_v9 }
 0x3ae   : > { %7605 = vrcp.f32 %v5773_v4 }
 0x3af   : > { %7545 = vmatprep.subr.bf16.mxu1 %v7544_v34  ;;  %7607 = vrcp.f32 %v5772_v7 }
 0x3b0   : > { %7410 = vmatmul.mubr.msk.f32.gmra.mrb[70].mxu1 %vm3719_vm5, %v5242_v33  ;;  %v7600_v33 = vpop.eup %7599  ;;  %7609 = vpow2.f32 %v5752_v36 }
 0x3b1   : > { %7547 = vmatpush3.bf16.msra.mxu1 %v7544_v34  ;;  %v7602_v21 = vpop.eup %7601  ;;  %v5777_v44 = vadd.f32 1.0, %v7600_v33  ;;  %7611 = vrcp.f32 %v5775_v22 }
 0x3b2   : > { %7549 = vmatprep.subr.bf16.mxu1 %v7548_v46  ;;  %v5776_v41 = vadd.f32 1.0, %v7602_v21  ;;  %7613 = vrcp.f32 %v5774_v43 }
 0x3b3   : > { %7615 = vrcp.f32 %v5777_v44 }
 0x3b4   : > { %7617 = vrcp.f32 %v5776_v41 }
 0x3b5   : > { %7551 = vmatpush3.bf16.msra.mxu1 %v7548_v46  ;;  %7619 = vpow2.f32 %v5758_v12 }
 0x3b6   : > { %7553 = vmatprep.subr.bf16.mxu1 %v7552_v48  ;;  %7621 = vpow2.f32 %v5756_v40 }
 0x3b7   : > { %v7604_v61 = vpop.eup %7603 }
 0x3b8   : > { %v7606_v35 = vpop.eup %7605  ;;  %v5779_v42 = vadd.f32 1.0, %v7604_v61 }
 0x3b9   : > { %7555 = vmatpush3.bf16.msra.mxu1 %v7552_v48  ;;  %v7608_v29 = vpop.eup %7607 }
 0x3ba   : > { %7557 = vmatprep.subr.bf16.mxu1 %v7556_v17  ;;  %v7610_v54 = vpop.eup %7609 }
 0x3bb   : > { %v7612_v8 = vpop.eup %7611 }
 0x3bc   : > { %v7614_v37 = vpop.eup %7613 }
 0x3bd   : > { %7559 = vmatpush3.bf16.msra.mxu1 %v7556_v17  ;;  %v7616_v58 = vpop.eup %7615 }
 0x3be   : > { %7561 = vmatprep.subr.bf16.mxu1 %v7560_v27  ;;  %v7618_v57 = vpop.eup %7617 }
 0x3c1   : > { %7563 = vmatpush3.bf16.msra.mxu1 %v7560_v27 }
 0x3f5   : > { %v10304_v32 = vpop.f32.mrb[34].mxu1 }
 0x3f6   : > { %v10312_v19 = vpop.f32.mrb[35].mxu1  ;;  %v5397_v24 = vadd.f32 %v10304_v32, %v10347_v62 }
 0x3f7   : > { %v5392_v47 = vadd.f32 %v10347_v62, %v10312_v19 }
 0x3f8   : > { %v5735_v28 = vsub.f32 0.0, %v5397_v24 }
 0x3f9   : > { %v5734_v32 = vsub.f32 0.0, %v5392_v47 }
 0x3fa   : > { %v5762_v18 = vmul.f32 1.442695, %v5735_v28 }
 0x3fb   : > { %v5760_v48 = vmul.f32 1.442695, %v5734_v32 }
 0x3fc   : > { %7623 = vpow2.f32 %v5762_v18 }
 0x3fd   : > { %7625 = vpow2.f32 %v5760_v48 }
 0x436   : > { %v7352_v60 = vpop.f32.mrb[36].mxu1 }
 0x437   : > { %v5401_v56 = vpop.f32.mrb[37].mxu1  ;;  %v5407_v6 = vadd.f32 %v7352_v60, %v10347_v62  ;;  %v5778_v60 = vadd.f32 1.0, %v7610_v54 }
 0x438   : > { %v5402_v55 = vadd.f32 %v10347_v62, %v5401_v56 }
 0x439   : > { %v5737_v19 = vsub.f32 0.0, %v5407_v6 }
 0x43a   : > { %v5736_v13 = vsub.f32 0.0, %v5402_v55 }
 0x43b   : > { %v5766_v20 = vmul.f32 1.442695, %v5737_v19 }
 0x43c   : > { %v5764_v16 = vmul.f32 1.442695, %v5736_v13 }
 0x43d   : > { %7627 = vpow2.f32 %v5766_v20 }
 0x443   : > { %v7355_v34 = vpop.f32.mrb[38].mxu1 }
 0x444   : > { %v5417_v14 = vadd.f32 %v7355_v34, %v10347_v62  ;;  %v5411_v46 = vpop.f32.mrb[39].mxu1 }
 0x445   : > { %v5412_v5 = vadd.f32 %v10347_v62, %v5411_v46  ;;  %v7620_v62 = vpop.eup %7619 }
 0x446   : > { %v5739_v17 = vsub.f32 0.0, %v5417_v14  ;;  %v7622_v30 = vpop.eup %7621  ;;  %v5781_v23 = vadd.f32 1.0, %v7620_v62 }
 0x447   : > { %v7362_v52 = vpop.f32.mrb[40].mxu1  ;;  %v5738_v0 = vsub.f32 0.0, %v5412_v5  ;;  %v7624_v15 = vpop.eup %7623  ;;  %v5780_v24 = vadd.f32 1.0, %v7622_v30 }
 0x448   : > { %v5499_v25 = vadd.f32 %v7362_v52, %v10379_v10  ;;  %v5493_v27 = vpop.f32.mrb[41].mxu1  ;;  %v5770_v3 = vmul.f32 1.442695, %v5739_v17  ;;  %v7626_v11 = vpop.eup %7625  ;;  %v5783_v44 = vadd.f32 1.0, %v7624_v15 }
 0x449   : > { %v5494_v1 = vadd.f32 %v10379_v10, %v5493_v27  ;;  %v5768_v56 = vmul.f32 1.442695, %v5738_v0  ;;  %v7628_v45 = vpop.eup %7627  ;;  %v5782_v41 = vadd.f32 1.0, %v7626_v11 }
 0x44a   : > { %7629 = vtanh.f32 %v5499_v25  ;;  %v5785_v55 = vadd.f32 1.0, %v7628_v45 }
 0x44b   : > { %v7365_v26 = vpop.f32.mrb[42].mxu1  ;;  %7631 = vtanh.f32 %v5494_v1 }
 0x44c   : > { %v5509_v51 = vadd.f32 %v7365_v26, %v10379_v10  ;;  %v5503_v38 = vpop.f32.mrb[43].mxu1  ;;  %7633 = vpow2.f32 %v5764_v16 }
 0x44d   : > { %v5504_v31 = vadd.f32 %v10379_v10, %v5503_v38  ;;  %7635 = vpow2.f32 %v5770_v3 }
 0x44e   : > { %7637 = vtanh.f32 %v5509_v51 }
 0x44f   : > { %v7368_v39 = vpop.f32.mrb[44].mxu1  ;;  %7639 = vtanh.f32 %v5504_v31 }
 0x450   : > { %v5519_v2 = vadd.f32 %v7368_v39, %v10379_v10  ;;  %v5513_v63 = vpop.f32.mrb[45].mxu1  ;;  %v10414_v39 = vld [vmem:[%s10679_s2 + $0x6] ss:$0 sm:$0xff] }
 0x451   : > { %v5514_v53 = vadd.f32 %v10379_v10, %v5513_v63 }
 0x452   : > { %7641 = vtanh.f32 %v5519_v2 }
 0x453   : > { %7643 = vtanh.f32 %v5514_v53  ;;  %v7371_v49 = vpop.f32.mrb[46].mxu1 }
 0x454   : > { %v5529_v50 = vadd.f32 %v7371_v49, %v10379_v10  ;;  %v5523_v4 = vpop.f32.mrb[47].mxu1  ;;  %7645 = vrcp.f32 %v5779_v42  ;;  %v7630_v7 = vpop.eup %7629 }
 0x455   : > { %v7632_v33 = vpop.eup %7631  ;;  %v10389_v36 = vmul.f32 %v7630_v7, %v7606_v35  ;;  %v5524_v47 = vadd.f32 %v10379_v10, %v5523_v4 }
 0x456   : > { %7647 = vtanh.f32 %v5529_v50  ;;  %v7634_v22 = vpop.eup %7633  ;;  %v10392_v9 = vmul.f32 %v7632_v33, %v7608_v29 }
 0x457   : > { %7649 = vrcp.f32 %v5778_v60  ;;  %v7374_v21 = vpop.f32.mrb[48].mxu1  ;;  %v7636_v59 = vpop.eup %7635  ;;  %v5784_v40 = vadd.f32 1.0, %v7634_v22 }
 0x458   : > { %7651 = vpow2.f32 %v5768_v56  ;;  %v5539_v6 = vadd.f32 %v7374_v21, %v10379_v10  ;;  %v5533_v43 = vpop.f32.mrb[49].mxu1  ;;  %v7638_v28 = vpop.eup %7637  ;;  %v5787_v25 = vadd.f32 1.0, %v7636_v59 }
 0x459   : > { %7653 = vrcp.f32 %v5781_v23  ;;  %v7640_v32 = vpop.eup %7639  ;;  %v10395_v12 = vmul.f32 %v7638_v28, %v7612_v8  ;;  %v5534_v13 = vadd.f32 %v10379_v10, %v5533_v43 }
 0x45a   : > { %7655 = vrcp.f32 %v5780_v24  ;;  %v10397_v14 = vmul.f32 %v7640_v32, %v7614_v37 }
 0x45b   : > { %7657 = vtanh.f32 %v5524_v47  ;;  %v7377_v19 = vpop.f32.mrb[50].mxu1 }
 0x45c   : > { %v7642_v34 = vpop.eup %7641  ;;  %7659 = vtanh.f32 %v5539_v6  ;;  %v5543_v46 = vpop.f32.mrb[51].mxu1  ;;  %v5549_v17 = vadd.f32 %v7377_v19, %v10379_v10 }
 0x45d   : > { %v7644_v18 = vpop.eup %7643  ;;  %7661 = vrcp.f32 %v5783_v44  ;;  %v10399_v48 = vmul.f32 %v7642_v34, %v7616_v58  ;;  %v5544_v1 = vadd.f32 %v10379_v10, %v5543_v46 }
 0x45e   : > { %7663 = vrcp.f32 %v5782_v41  ;;  %v10402_v20 = vmul.f32 %v7644_v18, %v7618_v57  ;;  %v7646_v52 = vpop.eup %7645 }
 0x45f   : > { %7665 = vrcp.f32 %v5785_v55  ;;  %v7380_v27 = vpop.f32.mrb[52].mxu1 }
 0x460   : > { %v7648_v61 = vpop.eup %7647  ;;  %7667 = vrcp.f32 %v5784_v40  ;;  %v5553_v35 = vpop.f32.mrb[53].mxu1  ;;  %v5559_v3 = vadd.f32 %v7380_v27, %v10379_v10 }
 0x461   : > { %v7650_v16 = vpop.eup %7649  ;;  %v10406_v29 = vmul.f32 %v7648_v61, %v7646_v52  ;;  %7669 = vtanh.f32 %v5534_v13  ;;  %v5554_v54 = vadd.f32 %v10379_v10, %v5553_v35 }
 0x462   : > { %v7652_v26 = vpop.eup %7651  ;;  %7671 = vtanh.f32 %v5549_v17 }
 0x463   : > { %v7654_v5 = vpop.eup %7653  ;;  %7673 = vrcp.f32 %v5787_v25  ;;  %v7383_v51 = vpop.f32.mrb[54].mxu1  ;;  %v5786_v58 = vadd.f32 1.0, %v7652_v26 }
 0x464   : > { %v7656_v38 = vpop.eup %7655  ;;  %7675 = vtanh.f32 %v5544_v1  ;;  %v5569_v8 = vadd.f32 %v7383_v51, %v10379_v10  ;;  %v5563_v31 = vpop.f32.mrb[55].mxu1 }
 0x465   : > { %v7658_v37 = vpop.eup %7657  ;;  %7677 = vtanh.f32 %v5559_v3  ;;  %v5564_v2 = vadd.f32 %v10379_v10, %v5563_v31 }
 0x466   : > { %v7660_v57 = vpop.eup %7659  ;;  %v5826_v0 = vmul.f32 %v7658_v37, %v7650_v16  ;;  %7679 = vtanh.f32 %v5554_v54 }
 0x467   : > { %v7662_v63 = vpop.eup %7661  ;;  %v10417_v62 = vmul.f32 %v7660_v57, %v7654_v5  ;;  %7681 = vtanh.f32 %v5569_v8  ;;  %v7390_v42 = vpop.f32.mrb[56].mxu1 }
 0x468   : > { %v7664_v53 = vpop.eup %7663  ;;  %v5651_v30 = vadd.f32 %v7390_v42, %v10414_v39  ;;  %v5645_v15 = vpop.f32.mrb[57].mxu1  ;;  %7683 = vrcp.f32 %v5786_v58 }
 0x469   : > { %v7666_v60 = vpop.eup %7665  ;;  %v5646_v49 = vadd.f32 %v10414_v39, %v5645_v15  ;;  %7685 = vtanh.f32 %v5564_v2 }
 0x46a   : > { %v7668_v11 = vpop.eup %7667  ;;  %v5837_v56 = vsub.f32 0.0, %v5651_v30  ;;  %7687 = vtanh.f32 %v10389_v36 }
 0x46b   : > { %v7670_v50 = vpop.eup %7669  ;;  %v7393_v4 = vpop.f32.mrb[58].mxu1  ;;  %7689 = vtanh.f32 %v10392_v9  ;;  %v5836_v21 = vsub.f32 0.0, %v5646_v49 }
 0x46c   : > { %v7672_v45 = vpop.eup %7671  ;;  %v10422_v10 = vmul.f32 %v7670_v50, %v7656_v38  ;;  %v5854_v23 = vmul.f32 1.442695, %v5837_v56  ;;  %v5661_v7 = vadd.f32 %v7393_v4, %v10414_v39  ;;  %v5655_v24 = vpop.f32.mrb[59].mxu1  ;;  %7691 = vtanh.f32 %v10395_v12 }
 0x46d   : > { %v7674_v33 = vpop.eup %7673  ;;  %v10426_v47 = vmul.f32 %v7672_v45, %v7662_v63  ;;  %v5656_v22 = vadd.f32 %v10414_v39, %v5655_v24  ;;  %7693 = vtanh.f32 %v10397_v14  ;;  %v5852_v12 = vmul.f32 1.442695, %v5836_v21 }
 0x46e   : > { %v7676_v6 = vpop.eup %7675  ;;  %v5839_v43 = vsub.f32 0.0, %v5661_v7  ;;  %7695 = vpow2.f32 %v5854_v23 }
 0x46f   : > { %v7678_v59 = vpop.eup %7677  ;;  %v10431_v36 = vmul.f32 %v7676_v6, %v7664_v53  ;;  %v7396_v44 = vpop.f32.mrb[60].mxu1  ;;  %v5838_v9 = vsub.f32 0.0, %v5656_v22  ;;  %7697 = vtanh.f32 %v10399_v48 }
 0x470   : > { %v7680_v28 = vpop.eup %7679  ;;  %v10433_v41 = vmul.f32 %v7678_v59, %v7666_v60  ;;  %v5671_v32 = vadd.f32 %v7396_v44, %v10414_v39  ;;  %v5665_v55 = vpop.f32.mrb[61].mxu1  ;;  %7699 = vtanh.f32 %v10402_v20  ;;  %v5858_v46 = vmul.f32 1.442695, %v5839_v43 }
 0x471   : > { %v7682_v19 = vpop.eup %7681  ;;  %v10437_v34 = vmul.f32 %v7680_v28, %v7668_v11  ;;  %v5666_v40 = vadd.f32 %v10414_v39, %v5665_v55  ;;  %7701 = vtanh.f32 %v10406_v29  ;;  %v5856_v27 = vmul.f32 1.442695, %v5838_v9 }
 0x472   : > { %v10441_v14 = vmul.f32 %v7682_v19, %v7674_v33  ;;  %v5841_v18 = vsub.f32 0.0, %v5671_v32  ;;  %v7684_v13 = vpop.eup %7683  ;;  %7703 = vtanh.f32 %v5826_v0 }
 0x473   : > { %v5840_v17 = vsub.f32 0.0, %v5666_v40  ;;  %v7399_v52 = vpop.f32.mrb[62].mxu1  ;;  %v7686_v25 = vpop.eup %7685  ;;  %7705 = vpow2.f32 %v5852_v12 }
 0x474   : > { %v5681_v48 = vadd.f32 %v7399_v52, %v10414_v39  ;;  %v5675_v61 = vpop.f32.mrb[63].mxu1  ;;  %v10445_v1 = vmul.f32 %v7686_v25, %v7684_v13  ;;  %v5862_v35 = vmul.f32 1.442695, %v5841_v18  ;;  %v10448_v16 = vpop.eup %7687  ;;  %7707 = vpow2.f32 %v5858_v46 }
 0x475   : > { %v5676_v20 = vadd.f32 %v10414_v39, %v5675_v61  ;;  %v5860_v3 = vmul.f32 1.442695, %v5840_v17  ;;  %v10450_v29 = vpop.eup %7689  ;;  %7709 = vtanh.f32 %v10417_v62 }
 0x476   : > { %v5843_v26 = vsub.f32 0.0, %v5681_v48  ;;  %v10453_v51 = vpop.eup %7691  ;;  %7711 = vpow2.f32 %v5856_v27 }
 0x477   : > { %v5842_v54 = vsub.f32 0.0, %v5676_v20  ;;  %v7402_v5 = vpop.f32.mrb[64].mxu1  ;;  %v10456_v37 = vpop.eup %7693  ;;  %7713 = vpow2.f32 %v5862_v35 }
 0x478   : > { %v5866_v38 = vmul.f32 1.442695, %v5843_v26  ;;  %v5691_v8 = vadd.f32 %v7402_v5, %v10414_v39  ;;  %v5685_v31 = vpop.f32.mrb[65].mxu1  ;;  %v7696_v0 = vpop.eup %7695  ;;  %7715 = vpow2.f32 %v5860_v3 }
 0x479   : > { %v5864_v58 = vmul.f32 1.442695, %v5842_v54  ;;  %v5686_v57 = vadd.f32 %v10414_v39, %v5685_v31  ;;  %v10459_v63 = vpop.eup %7697  ;;  %v5885_v62 = vadd.f32 1.0, %v7696_v0 }
 0x47a   : > { %v5845_v2 = vsub.f32 0.0, %v5691_v8  ;;  %7717 = vpow2.f32 %v5866_v38  ;;  %v10461_v30 = vpop.eup %7699 }
 0x47b   : > { %v5844_v42 = vsub.f32 0.0, %v5686_v57  ;;  %v7405_v53 = vpop.f32.mrb[66].mxu1  ;;  %7719 = vpow2.f32 %v5864_v58  ;;  %v10464_v11 = vpop.eup %7701 }
 0x47c   : > { %v5870_v15 = vmul.f32 1.442695, %v5845_v2  ;;  %v5701_v60 = vadd.f32 %v7405_v53, %v10414_v39  ;;  %v5695_v49 = vpop.f32.mrb[67].mxu1  ;;  %7721 = vrcp.f32 %v5885_v62  ;;  %v10466_v50 = vpop.eup %7703 }
 0x47d   : > { %v5868_v56 = vmul.f32 1.442695, %v5844_v42  ;;  %v5696_v45 = vadd.f32 %v10414_v39, %v5695_v49  ;;  %v7706_v23 = vpop.eup %7705 }
 0x47e   : > { %7723 = vpow2.f32 %v5870_v15  ;;  %v5847_v4 = vsub.f32 0.0, %v5701_v60  ;;  %v7708_v24 = vpop.eup %7707  ;;  %v5884_v33 = vadd.f32 1.0, %v7706_v23 }
 0x47f   : > { %7725 = vpow2.f32 %v5868_v56  ;;  %v7408_v7 = vpop.f32.mrb[68].mxu1  ;;  %v10470_v6 = vpop.eup %7709  ;;  %v5887_v43 = vadd.f32 1.0, %v7708_v24  ;;  %v5846_v28 = vsub.f32 0.0, %v5696_v45 }
 0x480   : > { %7727 = vtanh.f32 %v10422_v10  ;;  %v5874_v21 = vmul.f32 1.442695, %v5847_v4  ;;  %v5705_v22 = vpop.f32.mrb[69].mxu1  ;;  %v5711_v59 = vadd.f32 %v7408_v7, %v10414_v39  ;;  %v7712_v44 = vpop.eup %7711 }
 0x481   : > { %7729 = vtanh.f32 %v10426_v47  ;;  %v5706_v9 = vadd.f32 %v10414_v39, %v5705_v22  ;;  %v7714_v32 = vpop.eup %7713  ;;  %v5886_v55 = vadd.f32 1.0, %v7712_v44  ;;  %v5872_v27 = vmul.f32 1.442695, %v5846_v28 }
 0x482   : > { %7731 = vrcp.f32 %v5884_v33  ;;  %v7716_v10 = vpop.eup %7715  ;;  %v5889_v12 = vadd.f32 1.0, %v7714_v32  ;;  %v5849_v13 = vsub.f32 0.0, %v5711_v59 }
 0x483   : > { %7733 = vrcp.f32 %v5887_v43  ;;  %v7411_v19 = vpop.f32.mrb[70].mxu1  ;;  %v5888_v47 = vadd.f32 1.0, %v7716_v10  ;;  %v5848_v48 = vsub.f32 0.0, %v5706_v9 }
 0x484   : > { %7735 = vpow2.f32 %v5874_v21  ;;  %v5721_v40 = vadd.f32 %v7411_v19, %v10414_v39  ;;  %v5715_v46 = vpop.f32.mrb[71].mxu1  ;;  %v7718_v18 = vpop.eup %7717  ;;  %v5878_v8 = vmul.f32 1.442695, %v5849_v13 }
 0x485   : > { %7737 = vrcp.f32 %v5886_v55  ;;  %v5716_v17 = vadd.f32 %v10414_v39, %v5715_v46  ;;  %v7720_v52 = vpop.eup %7719  ;;  %v5891_v25 = vadd.f32 1.0, %v7718_v18  ;;  %v5876_v58 = vmul.f32 1.442695, %v5848_v48  ;;  %v6195_v48 = vld [vmem:[%s10678_s1 + $0x118] sm:$0xff] }
 0x486   : > { %7739 = vrcp.f32 %v5889_v12  ;;  %v7722_v61 = vpop.eup %7721  ;;  %v5890_v35 = vadd.f32 1.0, %v7720_v52  ;;  %v5851_v20 = vsub.f32 0.0, %v5721_v40 }
 0x487   : > { %7741 = vrcp.f32 %v5888_v47  ;;  %v5850_v26 = vsub.f32 0.0, %v5716_v17  ;;  %v5933_v54 = vmul.f32 %v7722_v61, %v10448_v16 }
 0x488   : > { %v7724_v3 = vpop.eup %7723  ;;  %7743 = vrcp.f32 %v5891_v25  ;;  %v5882_v0 = vmul.f32 1.442695, %v5851_v20 }
 0x489   : > { %v7726_v5 = vpop.eup %7725  ;;  %7745 = vrcp.f32 %v5890_v35  ;;  %v5893_v38 = vadd.f32 1.0, %v7724_v3  ;;  %v5880_v62 = vmul.f32 1.442695, %v5850_v26  ;;  %v10500_v35 = vld [vmem:[%s10679_s2 + $0x2] ss:$0 sm:$0xff] }
 0x48a   : > { %v7728_v31 = vpop.eup %7727  ;;  %v5892_v39 = vadd.f32 1.0, %v7726_v5  ;;  %7747 = vpow2.f32 %v5872_v27  ;;  %v6194_v27 = vld [vmem:[%s10678_s1 + $0x110] sm:$0xff] }
 0x48b   : > { %v7730_v57 = vpop.eup %7729  ;;  %7749 = vrcp.f32 %v5893_v38  ;;  %v7564_v61 = vpack.c.bf16 %v6195_v48, %v6194_v27 }
 0x48c   : > { %v7732_v2 = vpop.eup %7731  ;;  %7751 = vrcp.f32 %v5892_v39 }
 0x48d   : > { %v7734_v42 = vpop.eup %7733  ;;  %7753 = vpow2.f32 %v5878_v8  ;;  %v5932_v53 = vmul.f32 %v7732_v2, %v10450_v29  ;;  %7565 = vmatprep.subr.bf16.mxu1 %v7564_v61 }
 0x48e   : > { %v7736_v15 = vpop.eup %7735  ;;  %7755 = vpow2.f32 %v5876_v58  ;;  %v5935_v16 = vmul.f32 %v7734_v42, %v10453_v51 }
 0x48f   : > { %v7738_v60 = vpop.eup %7737  ;;  %v5895_v49 = vadd.f32 1.0, %v7736_v15  ;;  %7757 = vpow2.f32 %v5882_v0  ;;  %7444 = vmatprep.mubr.f32.mxu1 %v5932_v53 }
 0x490   : > { %v7740_v56 = vpop.eup %7739  ;;  %7759 = vpow2.f32 %v5880_v62  ;;  %7445 = vmatmul.mubr.f32.vlgmr.msra.gmra.mrb[72].mxu1 %v5933_v54  ;;  %v5934_v4 = vmul.f32 %v7738_v60, %v10456_v37 }
 0x491   : > { %v7742_v45 = vpop.eup %7741  ;;  %7761 = vrcp.f32 %v5895_v49  ;;  %v5937_v23 = vmul.f32 %v7740_v56, %v10459_v63  ;;  %7567 = vmatpush3.bf16.msra.mxu1 %v7564_v61 }
 0x492   : > { %v7744_v7 = vpop.eup %7743  ;;  %7447 = vmatprep.mubr.f32.mxu1 %v5934_v4  ;;  %v5936_v29 = vmul.f32 %v7742_v45, %v10461_v30  ;;  %7763 = vtanh.f32 %v10431_v36 }
 0x493   : > { %v7746_v24 = vpop.eup %7745  ;;  %v5939_v51 = vmul.f32 %v7744_v7, %v10464_v11  ;;  %7765 = vtanh.f32 %v10433_v41 }
 0x494   : > { %v7748_v33 = vpop.eup %7747  ;;  %7448 = vmatmul.mubr.f32.gmra.mrb[74].mxu1 %v5935_v16  ;;  %v5938_v21 = vmul.f32 %v7746_v24, %v10466_v50  ;;  %7767 = vtanh.f32 %v10437_v34 }
 0x495   : > { %v7750_v22 = vpop.eup %7749  ;;  %v5894_v37 = vadd.f32 1.0, %v7748_v33  ;;  %7450 = vmatprep.mubr.f32.mxu1 %v5936_v29 }
 0x496   : > { %v7752_v43 = vpop.eup %7751  ;;  %v5941_v63 = vmul.f32 %v7750_v22, %v10470_v6 }
 0x497   : > { %v7754_v30 = vpop.eup %7753  ;;  %7769 = vrcp.f32 %v5894_v37  ;;  %v5940_v59 = vmul.f32 %v7752_v43, %v7728_v31 }
 0x498   : > { %v7756_v11 = vpop.eup %7755  ;;  %7771 = vtanh.f32 %v10441_v14  ;;  %v5897_v36 = vadd.f32 1.0, %v7754_v30  ;;  %7451 = vmatmul.mubr.f32.gmra.mrb[76].mxu1 %v5937_v23 }
 0x499   : > { %v7758_v44 = vpop.eup %7757  ;;  %7773 = vtanh.f32 %v10445_v1  ;;  %v5896_v50 = vadd.f32 1.0, %v7756_v11  ;;  %7453 = vmatprep.mubr.f32.mxu1 %v5938_v21 }
 0x49a   : > { %v7760_v41 = vpop.eup %7759  ;;  %7775 = vrcp.f32 %v5897_v36  ;;  %v5899_v28 = vadd.f32 1.0, %v7758_v44 }
 0x49b   : > { %v7762_v9 = vpop.eup %7761  ;;  %7777 = vrcp.f32 %v5896_v50  ;;  %v5898_v34 = vadd.f32 1.0, %v7760_v41 }
 0x49c   : > { %7779 = vrcp.f32 %v5899_v28  ;;  %7454 = vmatmul.mubr.f32.gmra.mrb[78].mxu1 %v5939_v51  ;;  %v5943_v6 = vmul.f32 %v7762_v9, %v7730_v57  ;;  %v7764_v32 = vpop.eup %7763 }
 0x49d   : > { %7781 = vrcp.f32 %v5898_v34  ;;  %7456 = vmatprep.mubr.f32.mxu1 %v5940_v59  ;;  %v7766_v14 = vpop.eup %7765 }
 0x49e   : > { %v7768_v55 = vpop.eup %7767 }
 0x4a0   : > { %7457 = vmatmul.mubr.f32.gmra.mrb[80].mxu1 %v5941_v63 }
 0x4a1   : > { %v7770_v19 = vpop.eup %7769 }
 0x4a2   : > { %v7772_v10 = vpop.eup %7771  ;;  %v5942_v1 = vmul.f32 %v7770_v19, %v7764_v32 }
 0x4a3   : > { %v7774_v12 = vpop.eup %7773 }
 0x4a4   : > { %v7776_v40 = vpop.eup %7775  ;;  %7459 = vmatprep.mubr.f32.mxu1 %v5942_v1 }
 0x4a5   : > { %v7778_v46 = vpop.eup %7777  ;;  %7460 = vmatmul.mubr.f32.gmra.mrb[82].mxu1 %v5943_v6  ;;  %v5945_v18 = vmul.f32 %v7776_v40, %v7766_v14 }
 0x4a6   : > { %v7780_v47 = vpop.eup %7779  ;;  %v5944_v13 = vmul.f32 %v7778_v46, %v7768_v55 }
 0x4a7   : > { %v7782_v17 = vpop.eup %7781  ;;  %v5947_v52 = vmul.f32 %v7780_v47, %v7772_v10 }
 0x4a8   : > { %7462 = vmatprep.mubr.f32.mxu1 %v5944_v13  ;;  %v5946_v25 = vmul.f32 %v7782_v17, %v7774_v12 }
 0x4a9   : > { %7463 = vmatmul.mubr.f32.gmra.mrb[84].mxu1 %v5945_v18 }
 0x4aa   : > { %7465 = vmatprep.mubr.f32.mxu1 %v5946_v25 }
 0x4ad   : > { %7466 = vmatmul.mubr.f32.gmra.mrb[86].mxu1 %v5947_v52 }
 0x563   : > { %v7446_v20 = vpop.f32.mrb[72].mxu1 }
 0x564   : > { %v6041_v3 = vadd.f32 %v7446_v20, %v10500_v35  ;;  %v6035_v26 = vpop.f32.mrb[73].mxu1 }
 0x565   : > { %v6036_v54 = vadd.f32 %v10500_v35, %v6035_v26 }
 0x566   : > { %v6115_v5 = vsub.f32 0.0, %v6041_v3 }
 0x567   : > { %v6114_v38 = vsub.f32 0.0, %v6036_v54  ;;  %v7449_v8 = vpop.f32.mrb[74].mxu1 }
 0x568   : > { %v6132_v31 = vmul.f32 1.442695, %v6115_v5  ;;  %v6051_v39 = vadd.f32 %v7449_v8, %v10500_v35  ;;  %v6045_v58 = vpop.f32.mrb[75].mxu1 }
 0x569   : > { %v6130_v57 = vmul.f32 1.442695, %v6114_v38  ;;  %v6046_v0 = vadd.f32 %v10500_v35, %v6045_v58 }
 0x56a   : > { %7783 = vpow2.f32 %v6132_v31  ;;  %v6117_v2 = vsub.f32 0.0, %v6051_v39 }
 0x56b   : > { %7785 = vpow2.f32 %v6130_v57  ;;  %v6116_v62 = vsub.f32 0.0, %v6046_v0  ;;  %v7452_v42 = vpop.f32.mrb[76].mxu1 }
 0x56c   : > { %v6136_v53 = vmul.f32 1.442695, %v6117_v2  ;;  %v6061_v15 = vadd.f32 %v7452_v42, %v10500_v35  ;;  %v6055_v16 = vpop.f32.mrb[77].mxu1 }
 0x56d   : > { %v6134_v60 = vmul.f32 1.442695, %v6116_v62  ;;  %v6056_v49 = vadd.f32 %v10500_v35, %v6055_v16 }
 0x56e   : > { %7787 = vpow2.f32 %v6136_v53  ;;  %v6119_v56 = vsub.f32 0.0, %v6061_v15 }
 0x56f   : > { %7789 = vpow2.f32 %v6134_v60  ;;  %v6118_v4 = vsub.f32 0.0, %v6056_v49  ;;  %v7455_v45 = vpop.f32.mrb[78].mxu1 }
 0x570   : > { %v6140_v23 = vmul.f32 1.442695, %v6119_v56  ;;  %v6071_v7 = vadd.f32 %v7455_v45, %v10500_v35  ;;  %v6065_v29 = vpop.f32.mrb[79].mxu1 }
 0x571   : > { %v6138_v24 = vmul.f32 1.442695, %v6118_v4  ;;  %v6066_v51 = vadd.f32 %v10500_v35, %v6065_v29 }
 0x572   : > { %7791 = vpow2.f32 %v6140_v23  ;;  %v6121_v33 = vsub.f32 0.0, %v6071_v7 }
 0x573   : > { %7793 = vpow2.f32 %v6138_v24  ;;  %v6120_v21 = vsub.f32 0.0, %v6066_v51  ;;  %v7458_v22 = vpop.f32.mrb[80].mxu1 }
 0x574   : > { %v7784_v37 = vpop.eup %7783  ;;  %v6144_v43 = vmul.f32 1.442695, %v6121_v33  ;;  %v6081_v63 = vadd.f32 %v7458_v22, %v10500_v35  ;;  %v6075_v30 = vpop.f32.mrb[81].mxu1 }
 0x575   : > { %v7786_v59 = vpop.eup %7785  ;;  %v6163_v11 = vadd.f32 1.0, %v7784_v37  ;;  %v6142_v36 = vmul.f32 1.442695, %v6120_v21  ;;  %v6076_v44 = vadd.f32 %v10500_v35, %v6075_v30 }
 0x576   : > { %v6162_v50 = vadd.f32 1.0, %v7786_v59  ;;  %7795 = vpow2.f32 %v6144_v43  ;;  %v6123_v41 = vsub.f32 0.0, %v6081_v63 }
 0x577   : > { %7797 = vrcp.f32 %v6163_v11  ;;  %v6122_v28 = vsub.f32 0.0, %v6076_v44 }
 0x578   : > { %v7788_v9 = vpop.eup %7787  ;;  %7799 = vrcp.f32 %v6162_v50  ;;  %v6148_v34 = vmul.f32 1.442695, %v6123_v41  ;;  %v7461_v6 = vpop.f32.mrb[82].mxu1 }
 0x579   : > { %v7790_v32 = vpop.eup %7789  ;;  %v6165_v14 = vadd.f32 1.0, %v7788_v9  ;;  %7801 = vpow2.f32 %v6142_v36  ;;  %v6146_v55 = vmul.f32 1.442695, %v6122_v28  ;;  %v6091_v19 = vadd.f32 %v7461_v6, %v10500_v35  ;;  %v6085_v10 = vpop.f32.mrb[83].mxu1 }
 0x57a   : > { %v6164_v1 = vadd.f32 1.0, %v7790_v32  ;;  %7803 = vpow2.f32 %v6148_v34  ;;  %v6086_v12 = vadd.f32 %v10500_v35, %v6085_v10 }
 0x57b   : > { %7805 = vrcp.f32 %v6165_v14  ;;  %v6125_v40 = vsub.f32 0.0, %v6091_v19  ;;  %v10537_v19 = vld [vmem:[%s10679_s2 + $0x3] ss:$0 sm:$0xff] }
 0x57c   : > { %v7792_v46 = vpop.eup %7791  ;;  %7807 = vrcp.f32 %v6164_v1  ;;  %v6124_v18 = vsub.f32 0.0, %v6086_v12  ;;  %v7464_v47 = vpop.f32.mrb[84].mxu1 }
 0x57d   : > { %v7794_v13 = vpop.eup %7793  ;;  %v6167_v17 = vadd.f32 1.0, %v7792_v46  ;;  %7809 = vpow2.f32 %v6146_v55  ;;  %v6152_v52 = vmul.f32 1.442695, %v6125_v40  ;;  %v6101_v25 = vadd.f32 %v7464_v47, %v10500_v35  ;;  %v6095_v27 = vpop.f32.mrb[85].mxu1 }
 0x57e   : > { %v6166_v48 = vadd.f32 1.0, %v7794_v13  ;;  %v6150_v61 = vmul.f32 1.442695, %v6124_v18  ;;  %v6096_v20 = vadd.f32 %v10500_v35, %v6095_v27 }
 0x57f   : > { %7811 = vrcp.f32 %v6167_v17  ;;  %v6127_v3 = vsub.f32 0.0, %v6101_v25 }
 0x580   : > { %v7796_v26 = vpop.eup %7795  ;;  %7813 = vrcp.f32 %v6166_v48  ;;  %v6126_v54 = vsub.f32 0.0, %v6096_v20  ;;  %v7467_v5 = vpop.f32.mrb[86].mxu1 }
 0x581   : > { %v7798_v38 = vpop.eup %7797  ;;  %7815 = vpow2.f32 %v6152_v52  ;;  %v6156_v8 = vmul.f32 1.442695, %v6127_v3  ;;  %v6111_v31 = vadd.f32 %v7467_v5, %v10500_v35  ;;  %v6105_v39 = vpop.f32.mrb[87].mxu1  ;;  %v6169_v62 = vadd.f32 1.0, %v7796_v26 }
 0x582   : > { %v7800_v58 = vpop.eup %7799  ;;  %7817 = vpow2.f32 %v6150_v61  ;;  %v6154_v57 = vmul.f32 1.442695, %v6126_v54  ;;  %v6106_v0 = vadd.f32 %v10500_v35, %v6105_v39 }
 0x583   : > { %v7802_v2 = vpop.eup %7801  ;;  %v6129_v42 = vsub.f32 0.0, %v6111_v31  ;;  %7472 = vmatprep.mubr.msk.f32.mxu1 %vm3719_vm5, %v7800_v58  ;;  %7819 = vpow2.f32 %v6156_v8 }
 0x584   : > { %v7804_v53 = vpop.eup %7803  ;;  %v6168_v15 = vadd.f32 1.0, %v7802_v2  ;;  %v6128_v16 = vsub.f32 0.0, %v6106_v0  ;;  %7473 = vmatmul.mubr.msk.f32.vlgmr.msra.gmra.mrb[88].mxu1 %vm3719_vm5, %v7798_v38  ;;  %7821 = vpow2.f32 %v6154_v57 }
 0x585   : > { %v7806_v60 = vpop.eup %7805  ;;  %v6160_v49 = vmul.f32 1.442695, %v6129_v42  ;;  %v6171_v35 = vadd.f32 1.0, %v7804_v53 }
 0x586   : > { %v7808_v56 = vpop.eup %7807  ;;  %7823 = vrcp.f32 %v6168_v15  ;;  %v6158_v4 = vmul.f32 1.442695, %v6128_v16 }
 0x587   : > { %v7810_v45 = vpop.eup %7809  ;;  %7825 = vrcp.f32 %v6169_v62  ;;  %7475 = vmatprep.mubr.msk.f32.mxu1 %vm3719_vm5, %v7808_v56 }
 0x588   : > { %v6170_v23 = vadd.f32 1.0, %v7810_v45  ;;  %7827 = vpow2.f32 %v6160_v49  ;;  %7476 = vmatmul.mubr.msk.f32.gmra.mrb[90].mxu1 %vm3719_vm5, %v7806_v60 }
 0x589   : > { %v7812_v7 = vpop.eup %7811  ;;  %7829 = vpow2.f32 %v6158_v4 }
 0x58a   : > { %v7814_v29 = vpop.eup %7813  ;;  %7831 = vrcp.f32 %v6170_v23 }
 0x58b   : > { %v7816_v24 = vpop.eup %7815  ;;  %7833 = vrcp.f32 %v6171_v35  ;;  %7478 = vmatprep.mubr.msk.f32.mxu1 %vm3719_vm5, %v7814_v29 }
 0x58c   : > { %v7818_v51 = vpop.eup %7817  ;;  %v6173_v33 = vadd.f32 1.0, %v7816_v24  ;;  %7479 = vmatmul.mubr.msk.f32.gmra.mrb[92].mxu1 %vm3719_vm5, %v7812_v7 }
 0x58d   : > { %v6172_v21 = vadd.f32 1.0, %v7818_v51  ;;  %v7820_v22 = vpop.eup %7819 }
 0x58e   : > { %v7822_v37 = vpop.eup %7821  ;;  %v6175_v63 = vadd.f32 1.0, %v7820_v22 }
 0x58f   : > { %7835 = vrcp.f32 %v6172_v21  ;;  %v6174_v30 = vadd.f32 1.0, %v7822_v37 }
 0x590   : > { %v7824_v43 = vpop.eup %7823  ;;  %7837 = vrcp.f32 %v6173_v33 }
 0x591   : > { %v7826_v59 = vpop.eup %7825  ;;  %7481 = vmatprep.mubr.msk.f32.mxu1 %vm3719_vm5, %v7824_v43  ;;  %7839 = vrcp.f32 %v6174_v30 }
 0x592   : > { %v7828_v11 = vpop.eup %7827  ;;  %7482 = vmatmul.mubr.msk.f32.gmra.mrb[94].mxu1 %vm3719_vm5, %v7826_v59  ;;  %7841 = vrcp.f32 %v6175_v63 }
 0x593   : > { %v7830_v36 = vpop.eup %7829  ;;  %v6177_v50 = vadd.f32 1.0, %v7828_v11 }
 0x594   : > { %v7832_v44 = vpop.eup %7831  ;;  %v6176_v41 = vadd.f32 1.0, %v7830_v36 }
 0x595   : > { %v7834_v28 = vpop.eup %7833  ;;  %7484 = vmatprep.mubr.msk.f32.mxu1 %vm3719_vm5, %v7832_v44 }
 0x596   : > { %7843 = vrcp.f32 %v6176_v41  ;;  %7485 = vmatmul.mubr.msk.f32.gmra.mrb[96].mxu1 %vm3719_vm5, %v7834_v28 }
 0x597   : > { %7845 = vrcp.f32 %v6177_v50 }
 0x599   : > { %v7836_v9 = vpop.eup %7835 }
 0x59a   : > { %v7838_v34 = vpop.eup %7837  ;;  %7487 = vmatprep.mubr.msk.f32.mxu1 %vm3719_vm5, %v7836_v9 }
 0x59b   : > { %7488 = vmatmul.mubr.msk.f32.gmra.mrb[98].mxu1 %vm3719_vm5, %v7838_v34  ;;  %v7840_v6 = vpop.eup %7839 }
 0x59c   : > { %7490 = vmatprep.mubr.msk.f32.mxu1 %vm3719_vm5, %v7840_v6  ;;  %v7842_v32 = vpop.eup %7841 }
 0x59f   : > { %7491 = vmatmul.mubr.msk.f32.gmra.mrb[100].mxu1 %vm3719_vm5, %v7842_v32 }
 0x5a0   : > { %v7844_v14 = vpop.eup %7843 }
 0x5a1   : > { %7493 = vmatprep.mubr.msk.f32.mxu1 %vm3719_vm5, %v7844_v14  ;;  %v7846_v55 = vpop.eup %7845 }
 0x5a3   : > { %7494 = vmatmul.mubr.msk.f32.gmra.mrb[102].mxu1 %vm3719_vm5, %v7846_v55 }
 0x657   : > { %v7474_v10 = vpop.f32.mrb[88].mxu1 }
 0x658   : > { %v6321_v1 = vadd.f32 %v7474_v10, %v10537_v19  ;;  %v6315_v12 = vpop.f32.mrb[89].mxu1 }
 0x659   : > { %v6316_v40 = vadd.f32 %v10537_v19, %v6315_v12 }
 0x65a   : > { %v6395_v46 = vsub.f32 0.0, %v6321_v1 }
 0x65b   : > { %v6394_v18 = vsub.f32 0.0, %v6316_v40  ;;  %v7477_v47 = vpop.f32.mrb[90].mxu1 }
 0x65c   : > { %v6412_v13 = vmul.f32 1.442695, %v6395_v46  ;;  %v6331_v17 = vadd.f32 %v7477_v47, %v10537_v19  ;;  %v6325_v52 = vpop.f32.mrb[91].mxu1 }
 0x65d   : > { %v6410_v25 = vmul.f32 1.442695, %v6394_v18  ;;  %v6326_v27 = vadd.f32 %v10537_v19, %v6325_v52 }
 0x65e   : > { %7847 = vpow2.f32 %v6412_v13  ;;  %v6397_v48 = vsub.f32 0.0, %v6331_v17 }
 0x65f   : > { %7849 = vpow2.f32 %v6410_v25  ;;  %v6396_v61 = vsub.f32 0.0, %v6326_v27  ;;  %v7480_v20 = vpop.f32.mrb[92].mxu1 }
 0x660   : > { %v6416_v3 = vmul.f32 1.442695, %v6397_v48  ;;  %v6341_v26 = vadd.f32 %v7480_v20, %v10537_v19  ;;  %v6335_v54 = vpop.f32.mrb[93].mxu1 }
 0x661   : > { %v6414_v5 = vmul.f32 1.442695, %v6396_v61  ;;  %v6336_v38 = vadd.f32 %v10537_v19, %v6335_v54 }
 0x662   : > { %7851 = vpow2.f32 %v6416_v3  ;;  %v6399_v8 = vsub.f32 0.0, %v6341_v26 }
 0x663   : > { %7853 = vpow2.f32 %v6414_v5  ;;  %v6398_v31 = vsub.f32 0.0, %v6336_v38 }
 0x664   : > { %v6420_v39 = vmul.f32 1.442695, %v6399_v8 }
 0x665   : > { %v6418_v58 = vmul.f32 1.442695, %v6398_v31  ;;  %v7483_v57 = vpop.f32.mrb[94].mxu1 }
 0x666   : > { %7855 = vpow2.f32 %v6420_v39  ;;  %v6351_v0 = vadd.f32 %v7483_v57, %v10537_v19  ;;  %v6345_v2 = vpop.f32.mrb[95].mxu1 }
 0x667   : > { %7857 = vpow2.f32 %v6418_v58  ;;  %v6346_v62 = vadd.f32 %v10537_v19, %v6345_v2 }
 0x668   : > { %v7848_v42 = vpop.eup %7847  ;;  %v6401_v53 = vsub.f32 0.0, %v6351_v0 }
 0x669   : > { %v7850_v15 = vpop.eup %7849  ;;  %v6443_v16 = vadd.f32 1.0, %v7848_v42  ;;  %v6400_v60 = vsub.f32 0.0, %v6346_v62  ;;  %v7486_v49 = vpop.f32.mrb[96].mxu1 }
 0x66a   : > { %v6442_v56 = vadd.f32 1.0, %v7850_v15  ;;  %v6424_v4 = vmul.f32 1.442695, %v6401_v53  ;;  %v6361_v45 = vadd.f32 %v7486_v49, %v10537_v19  ;;  %v6355_v35 = vpop.f32.mrb[97].mxu1 }
 0x66b   : > { %7859 = vrcp.f32 %v6443_v16  ;;  %v6422_v23 = vmul.f32 1.442695, %v6400_v60  ;;  %v6356_v7 = vadd.f32 %v10537_v19, %v6355_v35 }
 0x66c   : > { %v7852_v29 = vpop.eup %7851  ;;  %7861 = vrcp.f32 %v6442_v56  ;;  %v6403_v24 = vsub.f32 0.0, %v6361_v45 }
 0x66d   : > { %v7854_v51 = vpop.eup %7853  ;;  %v6445_v33 = vadd.f32 1.0, %v7852_v29  ;;  %7863 = vpow2.f32 %v6424_v4  ;;  %v6402_v21 = vsub.f32 0.0, %v6356_v7 }
 0x66e   : > { %v6444_v22 = vadd.f32 1.0, %v7854_v51  ;;  %7865 = vpow2.f32 %v6422_v23  ;;  %v6428_v37 = vmul.f32 1.442695, %v6403_v24  ;;  %v7489_v43 = vpop.f32.mrb[98].mxu1 }
 0x66f   : > { %7867 = vrcp.f32 %v6445_v33  ;;  %v6426_v63 = vmul.f32 1.442695, %v6402_v21  ;;  %v6371_v30 = vadd.f32 %v7489_v43, %v10537_v19  ;;  %v6365_v59 = vpop.f32.mrb[99].mxu1 }
 0x670   : > { %v7856_v11 = vpop.eup %7855  ;;  %7869 = vrcp.f32 %v6444_v22  ;;  %v6366_v36 = vadd.f32 %v10537_v19, %v6365_v59 }
 0x671   : > { %v7858_v44 = vpop.eup %7857  ;;  %v6447_v50 = vadd.f32 1.0, %v7856_v11  ;;  %7871 = vpow2.f32 %v6428_v37  ;;  %v6405_v41 = vsub.f32 0.0, %v6371_v30 }
 0x672   : > { %v6446_v28 = vadd.f32 1.0, %v7858_v44  ;;  %7873 = vpow2.f32 %v6426_v63  ;;  %v6404_v9 = vsub.f32 0.0, %v6366_v36  ;;  %v7492_v34 = vpop.f32.mrb[100].mxu1 }
 0x673   : > { %7875 = vrcp.f32 %v6447_v50  ;;  %v6432_v6 = vmul.f32 1.442695, %v6405_v41  ;;  %v6375_v32 = vpop.f32.mrb[101].mxu1  ;;  %v6381_v17 = vadd.f32 %v7492_v34, %v10537_v19 }
 0x674   : > { %7877 = vrcp.f32 %v6446_v28  ;;  %v6430_v14 = vmul.f32 1.442695, %v6404_v9  ;;  %v6376_v27 = vadd.f32 %v10537_v19, %v6375_v32 }
 0x675   : > { %v7860_v55 = vpop.eup %7859  ;;  %7879 = vpow2.f32 %v6432_v6  ;;  %v6407_v38 = vsub.f32 0.0, %v6381_v17 }
 0x676   : > { %v7862_v10 = vpop.eup %7861  ;;  %v6476_v1 = vmul.f32 1.442695, %v7860_v55  ;;  %7881 = vpow2.f32 %v6430_v14  ;;  %v7495_v12 = vpop.f32.mrb[102].mxu1  ;;  %v6406_v39 = vsub.f32 0.0, %v6376_v27 }
 0x677   : > { %v7864_v40 = vpop.eup %7863  ;;  %v6474_v46 = vmul.f32 1.442695, %v7862_v10  ;;  %v6385_v18 = vpop.f32.mrb[103].mxu1  ;;  %v6391_v20 = vadd.f32 %v7495_v12, %v10537_v19  ;;  %v6436_v16 = vmul.f32 1.442695, %v6407_v38 }
 0x678   : > { %v7866_v47 = vpop.eup %7865  ;;  %7883 = vpow2.f32 %v6476_v1  ;;  %v6449_v13 = vadd.f32 1.0, %v7864_v40  ;;  %v6386_v58 = vadd.f32 %v10537_v19, %v6385_v18  ;;  %v6434_v49 = vmul.f32 1.442695, %v6406_v39 }
 0x679   : > { %v7868_v52 = vpop.eup %7867  ;;  %7885 = vpow2.f32 %v6474_v46  ;;  %v6448_v25 = vadd.f32 1.0, %v7866_v47  ;;  %v6409_v2 = vsub.f32 0.0, %v6391_v20 }
 0x67a   : > { %v7870_v48 = vpop.eup %7869  ;;  %v6480_v61 = vmul.f32 1.442695, %v7868_v52  ;;  %7887 = vrcp.f32 %v6449_v13  ;;  %v6408_v56 = vsub.f32 0.0, %v6386_v58 }
 0x67b   : > { %v7872_v3 = vpop.eup %7871  ;;  %v6478_v26 = vmul.f32 1.442695, %v7870_v48  ;;  %7889 = vrcp.f32 %v6448_v25  ;;  %v6440_v19 = vmul.f32 1.442695, %v6409_v2 }
 0x67c   : > { %v7874_v54 = vpop.eup %7873  ;;  %7891 = vpow2.f32 %v6480_v61  ;;  %v6451_v5 = vadd.f32 1.0, %v7872_v3  ;;  %v6438_v51 = vmul.f32 1.442695, %v6408_v56 }
 0x67d   : > { %v7876_v8 = vpop.eup %7875  ;;  %7893 = vpow2.f32 %v6478_v26  ;;  %v6450_v31 = vadd.f32 1.0, %v7874_v54 }
 0x67e   : > { %v7878_v57 = vpop.eup %7877  ;;  %v6484_v0 = vmul.f32 1.442695, %v7876_v8  ;;  %7895 = vrcp.f32 %v6451_v5 }
 0x67f   : > { %v7880_v62 = vpop.eup %7879  ;;  %v6482_v42 = vmul.f32 1.442695, %v7878_v57  ;;  %7897 = vrcp.f32 %v6450_v31 }
 0x680   : > { %v7882_v53 = vpop.eup %7881  ;;  %7899 = vpow2.f32 %v6484_v0  ;;  %v6453_v15 = vadd.f32 1.0, %v7880_v62 }
 0x681   : > { %7901 = vpow2.f32 %v6482_v42  ;;  %v6452_v60 = vadd.f32 1.0, %v7882_v53 }
 0x682   : > { %v10555_v4 = vpop.eup %7883  ;;  %7903 = vrcp.f32 %v6453_v15 }
 0x683   : > { %v10557_v45 = vpop.eup %7885  ;;  %7905 = vrcp.f32 %v6452_v60  ;;  %v6510_v35 = vsel %vm6506_vm13, %v10555_v4, 0.0 }
 0x684   : > { %v7888_v23 = vpop.eup %7887  ;;  %7907 = vpow2.f32 %v6436_v16  ;;  %6511 = vadd.xlane.f32.xlu1 %v6510_v35  ;;  %v6507_v7 = vsel %vm6506_vm13, %v10557_v45, 0.0 }
 0x685   : > { %v7890_v29 = vpop.eup %7889  ;;  %v6488_v24 = vmul.f32 1.442695, %v7888_v23  ;;  %7909 = vpow2.f32 %v6434_v49  ;;  %6508 = vadd.xlane.f32.xlu0 %v6507_v7 }
 0x686   : > { %v10563_v33 = vpop.eup %7891  ;;  %v6486_v21 = vmul.f32 1.442695, %v7890_v29  ;;  %7911 = vpow2.f32 %v6440_v19 }
 0x687   : > { %v10565_v22 = vpop.eup %7893  ;;  %7913 = vpow2.f32 %v6488_v24  ;;  %v6516_v37 = vsel %vm6506_vm13, %v10563_v33, 0.0 }
 0x688   : > { %v7896_v43 = vpop.eup %7895  ;;  %7915 = vpow2.f32 %v6486_v21  ;;  %v6513_v41 = vsel %vm6506_vm13, %v10565_v22, 0.0 }
 0x689   : > { %v7898_v63 = vpop.eup %7897  ;;  %v6492_v30 = vmul.f32 1.442695, %v7896_v43  ;;  %7917 = vpow2.f32 %v6438_v51  ;;  %6517 = vadd.xlane.f32.xlu0 %v6516_v37 }
 0x68a   : > { %v10569_v59 = vpop.eup %7899  ;;  %v6490_v11 = vmul.f32 1.442695, %v7898_v63 }
 0x68b   : > { %v10571_v36 = vpop.eup %7901  ;;  %7919 = vpow2.f32 %v6492_v30  ;;  %v6522_v1 = vsel %vm6506_vm13, %v10569_v59, 0.0 }
 0x68c   : > { %v7904_v44 = vpop.eup %7903  ;;  %7921 = vpow2.f32 %v6490_v11  ;;  %v6519_v50 = vsel %vm6506_vm13, %v10571_v36, 0.0 }
 0x68d   : > { %v7906_v28 = vpop.eup %7905  ;;  %v6496_v9 = vmul.f32 1.442695, %v7904_v44  ;;  %6520 = vadd.xlane.f32.xlu1 %v6519_v50  ;;  %6514 = vadd.xlane.f32.xlu0 %v6513_v41 }
 0x68e   : > { %v7908_v34 = vpop.eup %7907  ;;  %v6494_v6 = vmul.f32 1.442695, %v7906_v28 }
 0x68f   : > { %v7910_v32 = vpop.eup %7909  ;;  %7923 = vpow2.f32 %v6496_v9  ;;  %v6455_v14 = vadd.f32 1.0, %v7908_v34 }
 0x690   : > { %v7912_v55 = vpop.eup %7911  ;;  %7925 = vpow2.f32 %v6494_v6  ;;  %v6454_v10 = vadd.f32 1.0, %v7910_v32 }
 0x691   : > { %v10579_v12 = vpop.eup %7913  ;;  %7927 = vrcp.f32 %v6455_v14  ;;  %v6457_v40 = vadd.f32 1.0, %v7912_v55  ;;  %6523 = vadd.xlane.f32.xlu0 %v6522_v1 }
 0x692   : > { %v10581_v46 = vpop.eup %7915  ;;  %7929 = vrcp.f32 %v6454_v10  ;;  %v6528_v17 = vsel %vm6506_vm13, %v10579_v12, 0.0 }
 0x693   : > { %v7918_v18 = vpop.eup %7917  ;;  %7931 = vrcp.f32 %v6457_v40  ;;  %v6525_v47 = vsel %vm6506_vm13, %v10581_v46, 0.0 }
 0x694   : > { %v6456_v13 = vadd.f32 1.0, %v7918_v18  ;;  %6526 = vadd.xlane.f32.xlu1 %v6525_v47 }
 0x695   : > { %v10587_v52 = vpop.eup %7919  ;;  %6529 = vadd.xlane.f32.xlu0 %v6528_v17 }
 0x696   : > { %v10589_v25 = vpop.eup %7921  ;;  %7933 = vrcp.f32 %v6456_v13  ;;  %v6534_v48 = vsel %vm6506_vm13, %v10587_v52, 0.0 }
 0x697   : > { %v6531_v27 = vsel %vm6506_vm13, %v10589_v25, 0.0 }
 0x698   : > { %6532 = vadd.xlane.f32.xlu1 %v6531_v27 }
 0x699   : > { %v10595_v61 = vpop.eup %7923  ;;  %6535 = vadd.xlane.f32.xlu0 %v6534_v48 }
 0x69a   : > { %v10597_v20 = vpop.eup %7925  ;;  %v6540_v38 = vsel %vm6506_vm13, %v10595_v61, 0.0 }
 0x69b   : > { %v7928_v3 = vpop.eup %7927  ;;  %v6537_v26 = vsel %vm6506_vm13, %v10597_v20, 0.0 }
 0x69c   : > { %v7930_v54 = vpop.eup %7929  ;;  %v6500_v5 = vmul.f32 1.442695, %v7928_v3  ;;  %6538 = vadd.xlane.f32.xlu1 %v6537_v26 }
 0x69d   : > { %v7932_v8 = vpop.eup %7931  ;;  %v6498_v31 = vmul.f32 1.442695, %v7930_v54  ;;  %6541 = vadd.xlane.f32.xlu0 %v6540_v38 }
 0x69e   : > { %7935 = vpow2.f32 %v6500_v5  ;;  %v6504_v39 = vmul.f32 1.442695, %v7932_v8 }
 0x69f   : > { %7937 = vpow2.f32 %v6498_v31 }
 0x6a0   : > { %v7934_v58 = vpop.eup %7933  ;;  %7939 = vpow2.f32 %v6504_v39 }
 0x6a1   : > { %v6502_v57 = vmul.f32 1.442695, %v7934_v58 }
 0x6a3   : > { %7941 = vpow2.f32 %v6502_v57 }
 0x6a8   : > { %v10603_v0 = vpop.eup %7935 }
 0x6a9   : > { %v10605_v2 = vpop.eup %7937  ;;  %v6546_v62 = vsel %vm6506_vm13, %v10603_v0, 0.0 }
 0x6aa   : > { %v10609_v42 = vpop.eup %7939  ;;  %v6543_v53 = vsel %vm6506_vm13, %v10605_v2, 0.0  ;;  %6547 = vadd.xlane.f32.xlu0 %v6546_v62 }
 0x6ab   : > { %6544 = vadd.xlane.f32.xlu1 %v6543_v53  ;;  %v6552_v16 = vsel %vm6506_vm13, %v10609_v42, 0.0 }
 0x6ad   : > { %v10613_v15 = vpop.eup %7941 }
 0x6ae   : > { %v6549_v60 = vsel %vm6506_vm13, %v10613_v15, 0.0  ;;  %6553 = vadd.xlane.f32.xlu0 %v6552_v16 }
 0x6af   : > { %6550 = vadd.xlane.f32.xlu1 %v6549_v60 }
 0x711   : > { %v6512_v49 = vpop.xlane.xlu1 %6511 }
 0x712   : > { %7943 = vrcp.f32 %v6512_v49  ;;  %v6509_v56 = vpop.xlane.xlu0 %6508 }
 0x713   : > { %7945 = vrcp.f32 %v6509_v56 }
 0x716   : > { %v6518_v19 = vpop.xlane.xlu0 %6517 }
 0x717   : > { %7947 = vrcp.f32 %v6518_v19 }
 0x71a   : > { %v6521_v35 = vpop.xlane.xlu1 %6520  ;;  %v6515_v23 = vpop.xlane.xlu0 %6514 }
 0x71b   : > { %7949 = vrcp.f32 %v6521_v35 }
 0x71c   : > { %v7944_v7 = vpop.eup %7943  ;;  %7951 = vrcp.f32 %v6515_v23 }
 0x71d   : > { %v7946_v29 = vpop.eup %7945  ;;  %v6572_v24 = vmul.f32 %v7944_v7, %v10555_v4 }
 0x71e   : > { %v6571_v51 = vmul.f32 %v7946_v29, %v10557_v45  ;;  %v6524_v21 = vpop.xlane.xlu0 %6523 }
 0x71f   : > { %6588 = vst.msk [vmem:[%s10624_s17 + $0x8] sm:$0xff] %vm6506_vm13, %v6572_v24  ;;  %7953 = vrcp.f32 %v6524_v21 }
 0x720   : > { %6587 = vst.msk [vmem:[%s10624_s17] sm:$0xff] %vm6506_vm13, %v6571_v51 }
 0x721   : > { %v7948_v37 = vpop.eup %7947  ;;  %v6527_v43 = vpop.xlane.xlu1 %6526 }
 0x722   : > { %v6574_v63 = vmul.f32 %v7948_v37, %v10563_v33  ;;  %7955 = vrcp.f32 %v6527_v43  ;;  %v6530_v30 = vpop.xlane.xlu0 %6529 }
 0x723   : > { %7957 = vrcp.f32 %v6530_v30 }
 0x724   : > { %6590 = vst.msk [vmem:[%s10624_s17 + $0x18] sm:$0xff] %vm6506_vm13, %v6574_v63 }
 0x725   : > { %v7950_v4 = vpop.eup %7949  ;;  %v6533_v11 = vpop.xlane.xlu1 %6532 }
 0x726   : > { %v7952_v45 = vpop.eup %7951  ;;  %v6575_v44 = vmul.f32 %v7950_v4, %v10571_v36  ;;  %7959 = vrcp.f32 %v6533_v11  ;;  %v6536_v50 = vpop.xlane.xlu0 %6535 }
 0x727   : > { %v6573_v41 = vmul.f32 %v7952_v45, %v10565_v22  ;;  %7961 = vrcp.f32 %v6536_v50 }
 0x728   : > { %6591 = vst.msk [vmem:[%s10624_s17 + $0x20] sm:$0xff] %vm6506_vm13, %v6575_v44 }
 0x729   : > { %v7954_v33 = vpop.eup %7953  ;;  %6589 = vst.msk [vmem:[%s10624_s17 + $0x10] sm:$0xff] %vm6506_vm13, %v6573_v41  ;;  %v6539_v28 = vpop.xlane.xlu1 %6538 }
 0x72a   : > { %v6576_v9 = vmul.f32 %v7954_v33, %v10569_v59  ;;  %7963 = vrcp.f32 %v6539_v28  ;;  %v6542_v34 = vpop.xlane.xlu0 %6541 }
 0x72b   : > { %7965 = vrcp.f32 %v6542_v34 }
 0x72c   : > { %v7956_v36 = vpop.eup %7955  ;;  %6592 = vst.msk [vmem:[%s10624_s17 + $0x28] sm:$0xff] %vm6506_vm13, %v6576_v9 }
 0x72d   : > { %v7958_v22 = vpop.eup %7957  ;;  %v6577_v6 = vmul.f32 %v7956_v36, %v10581_v46 }
 0x72e   : > { %v6578_v32 = vmul.f32 %v7958_v22, %v10579_v12 }
 0x72f   : > { %6593 = vst.msk [vmem:[%s10624_s17 + $0x30] sm:$0xff] %vm6506_vm13, %v6577_v6 }
 0x730   : > { %v7960_v14 = vpop.eup %7959  ;;  %6594 = vst.msk [vmem:[%s10624_s17 + $0x38] sm:$0xff] %vm6506_vm13, %v6578_v32 }
 0x731   : > { %v7962_v59 = vpop.eup %7961  ;;  %v6579_v55 = vmul.f32 %v7960_v14, %v10589_v25 }
 0x732   : > { %v6580_v10 = vmul.f32 %v7962_v59, %v10587_v52 }
 0x733   : > { %6595 = vst.msk [vmem:[%s10624_s17 + $0x40] sm:$0xff] %vm6506_vm13, %v6579_v55 }
 0x734   : > { %v7964_v1 = vpop.eup %7963  ;;  %6596 = vst.msk [vmem:[%s10624_s17 + $0x48] sm:$0xff] %vm6506_vm13, %v6580_v10 }
 0x735   : > { %v7966_v40 = vpop.eup %7965  ;;  %v6581_v46 = vmul.f32 %v7964_v1, %v10597_v20 }
 0x736   : > { %v6582_v12 = vmul.f32 %v7966_v40, %v10595_v61 }
 0x737   : > { %6597 = vst.msk [vmem:[%s10624_s17 + $0x50] sm:$0xff] %vm6506_vm13, %v6581_v46  ;;  %v6548_v18 = vpop.xlane.xlu0 %6547 }
 0x738   : > { %v6545_v47 = vpop.xlane.xlu1 %6544  ;;  %6598 = vst.msk [vmem:[%s10624_s17 + $0x58] sm:$0xff] %vm6506_vm13, %v6582_v12  ;;  %7967 = vrcp.f32 %v6548_v18 }
 0x739   : > { %7969 = vrcp.f32 %v6545_v47 }
 0x73b   : > { %v6554_v13 = vpop.xlane.xlu0 %6553 }
 0x73c   : > { %v6551_v17 = vpop.xlane.xlu1 %6550  ;;  %7971 = vrcp.f32 %v6554_v13 }
 0x73d   : > { %7973 = vrcp.f32 %v6551_v17 }
 0x742   : > { %v7968_v52 = vpop.eup %7967 }
 0x743   : > { %v7970_v25 = vpop.eup %7969  ;;  %v6584_v27 = vmul.f32 %v7968_v52, %v10603_v0 }
 0x744   : > { %v6583_v48 = vmul.f32 %v7970_v25, %v10605_v2 }
 0x745   : > { %6600 = vst.msk [vmem:[%s10624_s17 + $0x68] sm:$0xff] %vm6506_vm13, %v6584_v27 }
 0x746   : > { %v7972_v61 = vpop.eup %7971  ;;  %6599 = vst.msk [vmem:[%s10624_s17 + $0x60] sm:$0xff] %vm6506_vm13, %v6583_v48 }
 0x747   : > { %v7974_v20 = vpop.eup %7973  ;;  %v6586_v3 = vmul.f32 %v7972_v61, %v10609_v42 }
 0x748   : > { %v6585_v26 = vmul.f32 %v7974_v20, %v10613_v15 }
 0x749   : > { %6602 = vst.msk [vmem:[%s10624_s17 + $0x78] sm:$0xff] %vm6506_vm13, %v6586_v3 }
 0x74a   : > { %6601 = vst.msk [vmem:[%s10624_s17 + $0x70] sm:$0xff] %vm6506_vm13, %v6585_v26 }
 0x74b PF: > { %s13_s12 = sadd.s32 1, %s8043_s12  }
 0x74c   : > { %p10_p5 = scmp.ge.s32.totalorder %s13_s12, 4  }
 0x74e   :  { %12 = sbr.rel (!%p10_p5) target bundleno = 1 (0x1), region = 62 }

</bundles_post_ra>
